<compile_context>
chip_gen: v6e
topology: v6e:2x2x1
jax: 0.10.0
libtpu: 0.0.40
codegen_flags: <defaults>
</compile_context>

<pallas_src>
import functools

import numpy as np
import jax
import jax.numpy as jnp
from jax.experimental import pallas as pl
from jax.experimental.pallas import tpu as pltpu

VMEM_LIMIT = 32 * 1024 * 1024  # explicit scoped-VMEM budget for every call


# --------------------------------------------------------------------------
# tiling helpers
# --------------------------------------------------------------------------
def _pick_tile(n, candidates):
    """Largest candidate that evenly divides n, else the full extent."""
    for c in candidates:
        if c <= n and n % c == 0:
            return c
    return n


def _ensure_two_blocks(n, tile):
    """Halve the tile until the axis has >=2 blocks (keeps both v7x TCs busy)."""
    while n // tile < 2 and tile % 16 == 0 and n % (tile // 2) == 0:
        tile //= 2
    return tile


def _pick_kv_tile(n):
    """KV (reduction) axis tile: prefer large lane-friendly tiles; fall back to
    the full extent when the sequence is short or has no clean divisor (a
    padded partial KV tile would poison the softmax sum)."""
    for c in (512, 256, 128):
        if n % c == 0:
            return c
    if n <= 512:
        return n
    for c in (448, 384, 320, 192, 96, 64, 48, 32, 16, 8):
        if n % c == 0:
            return c
    return n


# --------------------------------------------------------------------------
# Tiled matmul with bias:  out = x @ w + b
# --------------------------------------------------------------------------
def _matmul_kernel(x_ref, w_ref, b_ref, o_ref, acc_ref):
    @pl.when(pl.program_id(2) == 0)
    def _init():
        acc_ref[...] = jnp.zeros_like(acc_ref)

    acc_ref[...] += jnp.dot(x_ref[...], w_ref[...],
                            preferred_element_type=jnp.float32)

    @pl.when(pl.program_id(2) == pl.num_programs(2) - 1)
    def _finalize():
        o_ref[...] = (acc_ref[...] + b_ref[...].astype(jnp.float32)
                      ).astype(o_ref.dtype)


def linear(x2d, w, b):
    # x2d: (M, K), w: (K, N), b: (N,)
    M, K = x2d.shape
    N = w.shape[1]
    tm = _pick_tile(M, (256, 128, 64, 32, 16, 8))
    tn = _pick_tile(N, (512, 256, 128))
    tk = _pick_tile(K, (512, 256, 128))
    if M // tm < 2 and N // tn < 2:          # v7x: >=2 blocks on a parallel axis
        tm = _ensure_two_blocks(M, tm)
    grid = (M // tm, N // tn, K // tk)
    return pl.pallas_call(
        _matmul_kernel,
        out_shape=jax.ShapeDtypeStruct((M, N), x2d.dtype),
        grid_spec=pltpu.PrefetchScalarGridSpec(
            num_scalar_prefetch=0,
            grid=grid,
            in_specs=[
                pl.BlockSpec((tm, tk), lambda i, j, k: (i, k)),
                pl.BlockSpec((tk, tn), lambda i, j, k: (k, j)),
                pl.BlockSpec((1, tn), lambda i, j, k: (0, j)),
            ],
            out_specs=pl.BlockSpec((tm, tn), lambda i, j, k: (i, j)),
            scratch_shapes=[pltpu.VMEM((tm, tn), jnp.float32)],
        ),
        compiler_params=pltpu.CompilerParams(
            dimension_semantics=("parallel", "parallel", "arbitrary"),
            vmem_limit_bytes=VMEM_LIMIT),
    )(x2d, w, b.reshape(1, N))


# --------------------------------------------------------------------------
# Fused concat + projection:  out = concat(xs) @ W + b  (concat never built)
#   Tiled over (M, N, K) with a VMEM scratch accumulator; the weight rows for
#   each source are gathered from the single (n*C, N) weight via index_maps.
# --------------------------------------------------------------------------
def _make_fused_proj_kernel(n):
    def kernel(*args):
        x_refs = args[:n]
        w_refs = args[n:2 * n]
        b_ref = args[2 * n]
        o_ref = args[2 * n + 1]
        acc_ref = args[2 * n + 2]

        @pl.when(pl.program_id(2) == 0)
        def _init():
            acc_ref[...] = jnp.zeros_like(acc_ref)

        for xr, wr in zip(x_refs, w_refs):
            acc_ref[...] += jnp.dot(xr[...], wr[...],
                                    preferred_element_type=jnp.float32)

        @pl.when(pl.program_id(2) == pl.num_programs(2) - 1)
        def _finalize():
            o_ref[...] = (acc_ref[...] + b_ref[...].astype(jnp.float32)
                          ).astype(o_ref.dtype)
    return kernel


def fused_concat_linear(xs, proj_w, proj_b):
    # xs: list of (M, C); proj_w: (len(xs)*C, N); proj_b: (N,)
    n = len(xs)
    M, C = xs[0].shape
    N = proj_w.shape[1]
    assert proj_w.shape[0] == n * C

    tm = _pick_tile(M, (256, 128, 64, 32, 16, 8))
    tn = _pick_tile(N, (512, 256, 128))
    tk = _pick_tile(C, (512, 256, 128))
    if M // tm < 2 and N // tn < 2:
        tm = _ensure_two_blocks(M, tm)
    kblocks = C // tk
    grid = (M // tm, N // tn, kblocks)

    in_specs = []
    for _ in range(n):
        in_specs.append(pl.BlockSpec((tm, tk), lambda i, j, k: (i, k)))
    for s in range(n):
        in_specs.append(pl.BlockSpec(
            (tk, tn), lambda i, j, k, s=s: (s * kblocks + k, j)))
    in_specs.append(pl.BlockSpec((1, tn), lambda i, j, k: (0, j)))

    return pl.pallas_call(
        _make_fused_proj_kernel(n),
        out_shape=jax.ShapeDtypeStruct((M, N), xs[0].dtype),
        grid_spec=pltpu.PrefetchScalarGridSpec(
            num_scalar_prefetch=0,
            grid=grid,
            in_specs=in_specs,
            out_specs=pl.BlockSpec((tm, tn), lambda i, j, k: (i, j)),
            scratch_shapes=[pltpu.VMEM((tm, tn), jnp.float32)],
        ),
        compiler_params=pltpu.CompilerParams(
            dimension_semantics=("parallel", "parallel", "arbitrary"),
            vmem_limit_bytes=VMEM_LIMIT),
    )(*xs, *(proj_w for _ in range(n)), proj_b.reshape(1, N))


# --------------------------------------------------------------------------
# Fused (kv-projection + flash cross-attention), one kernel per
# (batch, head, q-tile, kv-tile) grid point:
#   k = src @ Wk_h + bk_h ; v = src @ Wv_h + bv_h   (computed on the fly)
#   out_h = softmax(q_h @ k^T) @ v                  (online softmax over kv)
# --------------------------------------------------------------------------
def _flash_kv_attn_kernel(q_ref, src_ref, wk_ref, wv_ref, bk_ref, bv_ref,
                          o_ref, m_sc, l_sc, acc_sc):
    ki = pl.program_id(3)

    @pl.when(ki == 0)
    def _init():
        m_sc[...] = jnp.full_like(m_sc, -jnp.inf)
        l_sc[...] = jnp.zeros_like(l_sc)
        acc_sc[...] = jnp.zeros_like(acc_sc)

    src = src_ref[...]                                         # (tkv, Dsrc)
    # On-the-fly kv projection: f32 accumulation, MXU fed in native dtype.
    k = (jnp.dot(src, wk_ref[...], preferred_element_type=jnp.float32)
         + bk_ref[...].astype(jnp.float32)).astype(src.dtype)  # (tkv, hd)
    v = (jnp.dot(src, wv_ref[...], preferred_element_type=jnp.float32)
         + bv_ref[...].astype(jnp.float32)).astype(src.dtype)  # (tkv, hd)

    # q is pre-scaled (softmax scale folded into the q projection weights).
    # TODO(synk): check the Mosaic dump for a per-step XLU transpose of k here;
    # if present, stage k^T in a VMEM scratch instead of contracting dim 1.
    s = jax.lax.dot_general(q_ref[...], k, (((1,), (1,)), ((), ())),
                            preferred_element_type=jnp.float32)  # (tq, tkv)

    m_prev = m_sc[...]
    m_new = jnp.maximum(m_prev, jnp.max(s, axis=-1, keepdims=True))
    alpha = jnp.exp(m_prev - m_new)
    p = jnp.exp(s - m_new)                                     # f32 stats only
    l_sc[...] = alpha * l_sc[...] + jnp.sum(p, axis=-1, keepdims=True)
    acc_sc[...] = alpha * acc_sc[...] + jnp.dot(
        p.astype(v.dtype), v, preferred_element_type=jnp.float32)
    m_sc[...] = m_new

    @pl.when(ki == pl.num_programs(3) - 1)
    def _finalize():
        o_ref[...] = (acc_sc[...] * pl.reciprocal(l_sc[...], approx=True)
                      ).astype(o_ref.dtype)


def fused_kv_cross_attention(q, src, kv_w, kv_b, heads):
    # q:   (B, L, C)     head h lives in channels [h*hd, (h+1)*hd); pre-scaled
    # src: (B, Lk, Dsrc) raw fore_x / post_x
    # kv_w:(Dsrc, 2C)    k of head h in cols [h*hd, ...), v in [C + h*hd, ...)
    B, L, C = q.shape
    _, Lk, Dsrc = src.shape
    hd = C // heads
    # TODO(synk): for head_dim not a multiple of 128, pack several heads into
    # one lane-dense tile instead of slicing one head per grid point.
    assert hd % 128 == 0, "head_dim must be a multiple of 128"

    tq = _pick_tile(L, (256, 128, 64, 32, 16, 8))
    tkv = _pick_kv_tile(Lk)
    if B * heads * (L // tq) < 2:            # v7x: keep both TensorCores busy
        tq = _ensure_two_blocks(L, tq)
    grid = (B, heads, L // tq, Lk // tkv)
    kv_b2d = kv_b.reshape(1, 2 * C)

    return pl.pallas_call(
        _flash_kv_attn_kernel,
        out_shape=jax.ShapeDtypeStruct((B, L, C), q.dtype),
        grid_spec=pltpu.PrefetchScalarGridSpec(
            num_scalar_prefetch=0,
            grid=grid,
            in_specs=[
                pl.BlockSpec((None, tq, hd),
                             lambda b, h, qi, ki: (b, qi, h)),
                pl.BlockSpec((None, tkv, Dsrc),
                             lambda b, h, qi, ki: (b, ki, 0)),
                pl.BlockSpec((Dsrc, hd),
                             lambda b, h, qi, ki: (0, h)),
                pl.BlockSpec((Dsrc, hd),
                             lambda b, h, qi, ki: (0, heads + h)),
                pl.BlockSpec((1, hd),
                             lambda b, h, qi, ki: (0, h)),
                pl.BlockSpec((1, hd),
                             lambda b, h, qi, ki: (0, heads + h)),
            ],
            out_specs=pl.BlockSpec((None, tq, hd),
                                   lambda b, h, qi, ki: (b, qi, h)),
            scratch_shapes=[
                pltpu.VMEM((tq, 1), jnp.float32),    # running max
                pltpu.VMEM((tq, 1), jnp.float32),    # running denom
                pltpu.VMEM((tq, hd), jnp.float32),   # running output
            ],
        ),
        compiler_params=pltpu.CompilerParams(
            dimension_semantics=("parallel", "parallel", "parallel",
                                 "arbitrary"),
            vmem_limit_bytes=VMEM_LIMIT),
    )(q, src, kv_w, kv_w, kv_b2d, kv_b2d)


# --------------------------------------------------------------------------
# CCA2 forward (Pallas)
# --------------------------------------------------------------------------
def cca2_forward(x, fore_x, post_x, params, heads, resolution):
    H = W = resolution
    B, L, C = x.shape
    assert L == H * W, "input feature has wrong size"
    hd = C // heads
    scale = hd ** (-0.5)

    x2d = x.reshape(B * L, C)
    # fold the softmax scale into the q projection (free constant fold)
    q = linear(x2d, params["q_w"] * scale,
               params["q_b"] * scale).reshape(B, L, C)

    x_2 = fused_kv_cross_attention(q, post_x, params["kv2_w"],
                                   params["kv2_b"], heads)

    if fore_x is not None:
        x_1 = fused_kv_cross_attention(q, fore_x, params["kv1_w"],
                                       params["kv1_b"], heads)
        out = fused_concat_linear(
            [x2d, x_1.reshape(B * L, C), x_2.reshape(B * L, C)],
            params["proj_w"], params["proj_b"])
    else:
        out = fused_concat_linear(
            [x2d, x_2.reshape(B * L, C)],
            params["proj_w"], params["proj_b"])
    return out.reshape(B, L, C)


# --------------------------------------------------------------------------
# Pure-JAX reference (mirrors the PyTorch module exactly)
# --------------------------------------------------------------------------
def cca2_ref(x, fore_x, post_x, params, heads, resolution):
    B, L, C = x.shape
    hd = C // heads
    scale = hd ** (-0.5)
    hp = jax.lax.Precision.HIGHEST

    q = jnp.dot(x, params["q_w"], precision=hp) + params["q_b"]
    q = q.reshape(B, L, heads, hd).transpose(0, 2, 1, 3) * scale

    def branch(src, wkey, bkey):
        kv = jnp.dot(src, params[wkey], precision=hp) + params[bkey]
        Lk = kv.shape[1]
        kv = kv.reshape(B, Lk, 2, heads, hd).transpose(2, 0, 3, 1, 4)
        k, v = kv[0], kv[1]
        s = jnp.einsum("bhqd,bhkd->bhqk", q, k, precision=hp)
        p = jax.nn.softmax(s, axis=-1)
        o = jnp.einsum("bhqk,bhkd->bhqd", p, v, precision=hp)
        return o.transpose(0, 2, 1, 3).reshape(B, L, C)

    x_2 = branch(post_x, "kv2_w", "kv2_b")
    if fore_x is not None:
        x_1 = branch(fore_x, "kv1_w", "kv1_b")
        cat = jnp.concatenate([x, x_1, x_2], axis=-1)
    else:
        cat = jnp.concatenate([x, x_2], axis=-1)
    return jnp.dot(cat, params["proj_w"], precision=hp) + params["proj_b"]


# --------------------------------------------------------------------------
# Deterministic parameter init (shapes from the module __init__)
# --------------------------------------------------------------------------
def init_params(key, dim, fore_dim, post_dim):
    ks = jax.random.split(key, 8)

    def w(k, shape, s=0.05):
        return (s * jax.random.normal(k, shape)).astype(jnp.float32)

    cat_in = (3 if fore_dim is not None else 2) * dim
    p = dict(
        q_w=w(ks[0], (dim, dim)), q_b=w(ks[1], (dim,)),
        kv2_w=w(ks[2], (post_dim, 2 * dim)), kv2_b=w(ks[3], (2 * dim,)),
        proj_w=w(ks[4], (cat_in, dim)), proj_b=w(ks[5], (dim,)),
    )
    if fore_dim is not None:
        p["kv1_w"] = w(ks[6], (fore_dim, 2 * dim))
        p["kv1_b"] = w(ks[7], (2 * dim,))
    return p


if __name__ == "__main__":
    # head_dim = 128 keeps every BlockSpec lane-dense (no masked partial
    # stores).  L_post = 384 exercises the multi-step online-softmax path
    # (3 KV tiles of 128); L_fore = 96 exercises the single-tile path.
    dim, heads = 256, 2
    resolution = 8
    B = 2
    L = resolution * resolution          # 64
    fore_dim, post_dim = 192, 160
    L_fore, L_post = 96, 384

    key = jax.random.PRNGKey(0)
    kx, kf, kp, kw = jax.random.split(key, 4)
    x = jax.random.normal(kx, (B, L, dim), dtype=jnp.float32)
    fore_x = jax.random.normal(kf, (B, L_fore, fore_dim), dtype=jnp.float32)
    post_x = jax.random.normal(kp, (B, L_post, post_dim), dtype=jnp.float32)
    params = init_params(kw, dim, fore_dim, post_dim)

    fwd = jax.jit(functools.partial(cca2_forward, heads=heads,
                                    resolution=resolution))
    out = jax.block_until_ready(fwd(x, fore_x, post_x, params))

    ref = jax.block_until_ready(
        cca2_ref(x, fore_x, post_x, params, heads, resolution))

    assert out.shape == (B, L, dim)
    np.testing.assert_allclose(np.asarray(out), np.asarray(ref),
                               atol=3e-2, rtol=3e-2)
    print("KERNEL_OK")
</pallas_src>

<mosaic_0001>
module attributes {stable_mosaic.version = 11 : i64} {
  func.func @_matmul_kernel(%arg0: i32, %arg1: i32, %arg2: i32, %arg3: memref<64x256xf32, #tpu.memory_space<vmem>>, %arg4: memref<256x256xf32, #tpu.memory_space<vmem>>, %arg5: memref<1x256xf32, #tpu.memory_space<vmem>>, %arg6: memref<64x256xf32, #tpu.memory_space<vmem>>, %arg7: memref<64x256xf32, #tpu.memory_space<vmem>>) attributes {dimension_semantics = [#tpu.dimension_semantics<parallel>, #tpu.dimension_semantics<parallel>, #tpu.dimension_semantics<arbitrary>], iteration_bounds = array<i64: 2, 1, 1>, scalar_prefetch = 0 : i64, scratch_operands = 1 : i64, tpu.core_type = #tpu.core_type<tc>, window_params = [{transform_indices = @transform_0, window_bounds = array<i64: 64, 256>}, {transform_indices = @transform_1, window_bounds = array<i64: 256, 256>}, {transform_indices = @transform_2, window_bounds = array<i64: 1, 256>}, {transform_indices = @transform_3, window_bounds = array<i64: 64, 256>}]} {
    %c0_i32 = arith.constant 0 : i32
    %0 = arith.cmpi eq, %arg2, %c0_i32 : i32
    %1 = arith.extui %0 : i1 to i32
    %c0_i32_0 = arith.constant 0 : i32
    %2 = arith.cmpi ne, %1, %c0_i32_0 : i32
    scf.if %2 {
      %cst_10 = arith.constant 0.000000e+00 : f32
      %12 = vector.broadcast %cst_10 : f32 to vector<64x256xf32>
      %c0_11 = arith.constant 0 : index
      %c0_12 = arith.constant 0 : index
      %13 = vector.load %arg7[%c0_11, %c0_12] : memref<64x256xf32, #tpu.memory_space<vmem>>, vector<64x256xf32>
      tpu.vector_store %arg7[%c0_11, %c0_12], %12 {strides = array<i32>} : memref<64x256xf32, #tpu.memory_space<vmem>>, vector<64x256xf32>,
    } else {
    }
    %c0 = arith.constant 0 : index
    %c0_1 = arith.constant 0 : index
    %3 = vector.load %arg7[%c0, %c0_1] : memref<64x256xf32, #tpu.memory_space<vmem>>, vector<64x256xf32>
    %c0_2 = arith.constant 0 : index
    %c0_3 = arith.constant 0 : index
    %4 = vector.load %arg3[%c0_2, %c0_3] : memref<64x256xf32, #tpu.memory_space<vmem>>, vector<64x256xf32>
    %c0_4 = arith.constant 0 : index
    %c0_5 = arith.constant 0 : index
    %5 = vector.load %arg4[%c0_4, %c0_5] : memref<256x256xf32, #tpu.memory_space<vmem>>, vector<256x256xf32>
    %cst = arith.constant dense<0.000000e+00> : vector<64x256xf32>
    %6 = tpu.matmul %4, %5, %cst {dimension_numbers = #tpu.dot_dimension_numbers<[1], [0], [0], [1], [0, 0, 1, 1], [], []>} : vector<64x256xf32>, vector<256x256xf32>, vector<64x256xf32> -> vector<64x256xf32>
    %7 = arith.addf %3, %6 : vector<64x256xf32>
    %c0_6 = arith.constant 0 : index
    %c0_7 = arith.constant 0 : index
    %8 = vector.load %arg7[%c0_6, %c0_7] : memref<64x256xf32, #tpu.memory_space<vmem>>, vector<64x256xf32>
    tpu.vector_store %arg7[%c0_6, %c0_7], %7 {strides = array<i32>} : memref<64x256xf32, #tpu.memory_space<vmem>>, vector<64x256xf32>,
    %c0_i32_8 = arith.constant 0 : i32
    %9 = arith.cmpi eq, %arg2, %c0_i32_8 : i32
    %10 = arith.extui %9 : i1 to i32
    %c0_i32_9 = arith.constant 0 : i32
    %11 = arith.cmpi ne, %10, %c0_i32_9 : i32
    scf.if %11 {
      %c0_10 = arith.constant 0 : index
      %c0_11 = arith.constant 0 : index
      %12 = vector.load %arg7[%c0_10, %c0_11] : memref<64x256xf32, #tpu.memory_space<vmem>>, vector<64x256xf32>
      %c0_12 = arith.constant 0 : index
      %c0_13 = arith.constant 0 : index
      %13 = vector.load %arg5[%c0_12, %c0_13] : memref<1x256xf32, #tpu.memory_space<vmem>>, vector<1x256xf32>
      %14 = vector.broadcast %13 : vector<1x256xf32> to vector<64x256xf32>
      %15 = arith.addf %12, %14 : vector<64x256xf32>
      %c0_14 = arith.constant 0 : index
      %c0_15 = arith.constant 0 : index
      %16 = vector.load %arg6[%c0_14, %c0_15] : memref<64x256xf32, #tpu.memory_space<vmem>>, vector<64x256xf32>
      tpu.vector_store %arg6[%c0_14, %c0_15], %15 {strides = array<i32>} : memref<64x256xf32, #tpu.memory_space<vmem>>, vector<64x256xf32>,
    } else {
    }
    return
  }
  func.func @transform_0(%arg0: i32, %arg1: i32, %arg2: i32) -> (i32, i32) {
    %c0_i32 = arith.constant 0 : i32
    return %arg0, %arg2 : i32, i32
  }
  func.func @transform_1(%arg0: i32, %arg1: i32, %arg2: i32) -> (i32, i32) {
    %c0_i32 = arith.constant 0 : i32
    return %arg2, %arg1 : i32, i32
  }
  func.func @transform_2(%arg0: i32, %arg1: i32, %arg2: i32) -> (i32, i32) {
    %c0_i32 = arith.constant 0 : i32
    %c0_i32_0 = arith.constant 0 : i32
    return %c0_i32, %arg1 : i32, i32
  }
  func.func @transform_3(%arg0: i32, %arg1: i32, %arg2: i32) -> (i32, i32) {
    %c0_i32 = arith.constant 0 : i32
    return %arg0, %arg1 : i32, i32
  }
}

module attributes {stable_mosaic.version = 11 : i64} {
  func.func @_flash_kv_attn_kernel(%arg0: i32, %arg1: i32, %arg2: i32, %arg3: i32, %arg4: memref<1x64x128xf32, #tpu.memory_space<vmem>>, %arg5: memref<1x128x160xf32, #tpu.memory_space<vmem>>, %arg6: memref<160x128xf32, #tpu.memory_space<vmem>>, %arg7: memref<160x128xf32, #tpu.memory_space<vmem>>, %arg8: memref<1x128xf32, #tpu.memory_space<vmem>>, %arg9: memref<1x128xf32, #tpu.memory_space<vmem>>, %arg10: memref<1x64x128xf32, #tpu.memory_space<vmem>>, %arg11: memref<64x1xf32, #tpu.memory_space<vmem>>, %arg12: memref<64x1xf32, #tpu.memory_space<vmem>>, %arg13: memref<64x128xf32, #tpu.memory_space<vmem>>) attributes {dimension_semantics = [#tpu.dimension_semantics<parallel>, #tpu.dimension_semantics<parallel>, #tpu.dimension_semantics<parallel>, #tpu.dimension_semantics<arbitrary>], iteration_bounds = array<i64: 2, 2, 1, 3>, scalar_prefetch = 0 : i64, scratch_operands = 3 : i64, tpu.core_type = #tpu.core_type<tc>, window_params = [{transform_indices = @transform_0, window_bounds = array<i64: 1, 64, 128>}, {transform_indices = @transform_1, window_bounds = array<i64: 1, 128, 160>}, {transform_indices = @transform_2, window_bounds = array<i64: 160, 128>}, {transform_indices = @transform_3, window_bounds = array<i64: 160, 128>}, {transform_indices = @transform_4, window_bounds = array<i64: 1, 128>}, {transform_indices = @transform_5, window_bounds = array<i64: 1, 128>}, {transform_indices = @transform_6, window_bounds = array<i64: 1, 64, 128>}]} {
    %c0_i32 = arith.constant 0 : i32
    %0 = arith.cmpi eq, %arg3, %c0_i32 : i32
    %1 = arith.extui %0 : i1 to i32
    %c0_i32_0 = arith.constant 0 : i32
    %2 = arith.cmpi ne, %1, %c0_i32_0 : i32
    scf.if %2 {
      %cst_32 = arith.constant 0xFF800000 : f32
      %43 = vector.broadcast %cst_32 : f32 to vector<64x1xf32>
      %c0_33 = arith.constant 0 : index
      %c0_34 = arith.constant 0 : index
      %44 = vector.load %arg11[%c0_33, %c0_34] : memref<64x1xf32, #tpu.memory_space<vmem>>, vector<64x1xf32>
      tpu.vector_store %arg11[%c0_33, %c0_34], %43 {strides = array<i32>} : memref<64x1xf32, #tpu.memory_space<vmem>>, vector<64x1xf32>,
      %cst_35 = arith.constant 0.000000e+00 : f32
      %45 = vector.broadcast %cst_35 : f32 to vector<64x1xf32>
      %c0_36 = arith.constant 0 : index
      %c0_37 = arith.constant 0 : index
      %46 = vector.load %arg12[%c0_36, %c0_37] : memref<64x1xf32, #tpu.memory_space<vmem>>, vector<64x1xf32>
      tpu.vector_store %arg12[%c0_36, %c0_37], %45 {strides = array<i32>} : memref<64x1xf32, #tpu.memory_space<vmem>>, vector<64x1xf32>,
      %cst_38 = arith.constant 0.000000e+00 : f32
      %47 = vector.broadcast %cst_38 : f32 to vector<64x128xf32>
      %c0_39 = arith.constant 0 : index
      %c0_40 = arith.constant 0 : index
      %48 = vector.load %arg13[%c0_39, %c0_40] : memref<64x128xf32, #tpu.memory_space<vmem>>, vector<64x128xf32>
      tpu.vector_store %arg13[%c0_39, %c0_40], %47 {strides = array<i32>} : memref<64x128xf32, #tpu.memory_space<vmem>>, vector<64x128xf32>,
    } else {
    }
    %c0 = arith.constant 0 : index
    %c0_1 = arith.constant 0 : index
    %c0_2 = arith.constant 0 : index
    %3 = vector.load %arg5[%c0, %c0_1, %c0_2] : memref<1x128x160xf32, #tpu.memory_space<vmem>>, vector<1x128x160xf32>
    %4 = vector.shape_cast %3 : vector<1x128x160xf32> to vector<128x160xf32>
    %c0_3 = arith.constant 0 : index
    %c0_4 = arith.constant 0 : index
    %5 = vector.load %arg6[%c0_3, %c0_4] : memref<160x128xf32, #tpu.memory_space<vmem>>, vector<160x128xf32>
    %cst = arith.constant dense<0.000000e+00> : vector<128x128xf32>
    %6 = tpu.matmul %4, %5, %cst {dimension_numbers = #tpu.dot_dimension_numbers<[1], [0], [0], [1], [0, 0, 1, 1], [], []>} : vector<128x160xf32>, vector<160x128xf32>, vector<128x128xf32> -> vector<128x128xf32>
    %c0_5 = arith.constant 0 : index
    %c0_6 = arith.constant 0 : index
    %7 = vector.load %arg8[%c0_5, %c0_6] : memref<1x128xf32, #tpu.memory_space<vmem>>, vector<1x128xf32>
    %8 = vector.broadcast %7 : vector<1x128xf32> to vector<128x128xf32>
    %9 = arith.addf %6, %8 : vector<128x128xf32>
    %c0_7 = arith.constant 0 : index
    %c0_8 = arith.constant 0 : index
    %10 = vector.load %arg7[%c0_7, %c0_8] : memref<160x128xf32, #tpu.memory_space<vmem>>, vector<160x128xf32>
    %cst_9 = arith.constant dense<0.000000e+00> : vector<128x128xf32>
    %11 = tpu.matmul %4, %10, %cst_9 {dimension_numbers = #tpu.dot_dimension_numbers<[1], [0], [0], [1], [0, 0, 1, 1], [], []>} : vector<128x160xf32>, vector<160x128xf32>, vector<128x128xf32> -> vector<128x128xf32>
    %c0_10 = arith.constant 0 : index
    %c0_11 = arith.constant 0 : index
    %12 = vector.load %arg9[%c0_10, %c0_11] : memref<1x128xf32, #tpu.memory_space<vmem>>, vector<1x128xf32>
    %13 = vector.broadcast %12 : vector<1x128xf32> to vector<128x128xf32>
    %14 = arith.addf %11, %13 : vector<128x128xf32>
    %c0_12 = arith.constant 0 : index
    %c0_13 = arith.constant 0 : index
    %c0_14 = arith.constant 0 : index
    %15 = vector.load %arg4[%c0_12, %c0_13, %c0_14] : memref<1x64x128xf32, #tpu.memory_space<vmem>>, vector<1x64x128xf32>
    %16 = vector.shape_cast %15 : vector<1x64x128xf32> to vector<64x128xf32>
    %cst_15 = arith.constant dense<0.000000e+00> : vector<64x128xf32>
    %17 = tpu.matmul %16, %9, %cst_15 {dimension_numbers = #tpu.dot_dimension_numbers<[1], [1], [0], [0], [0, 0, 1, 0], [], []>} : vector<64x128xf32>, vector<128x128xf32>, vector<64x128xf32> -> vector<64x128xf32>
    %c0_16 = arith.constant 0 : index
    %c0_17 = arith.constant 0 : index
    %18 = vector.load %arg11[%c0_16, %c0_17] : memref<64x1xf32, #tpu.memory_space<vmem>>, vector<64x1xf32>
    %cst_18 = arith.constant dense<0xFF800000> : vector<64xf32>
    %19 = vector.multi_reduction <maximumf>, %17, %cst_18 [1] : vector<64x128xf32> to vector<64xf32>
    %20 = vector.shape_cast %19 : vector<64xf32> to vector<64x1xf32>
    %21 = arith.maximumf %18, %20 : vector<64x1xf32>
    %22 = arith.subf %18, %21 : vector<64x1xf32>
    %23 = math.exp %22 : vector<64x1xf32>
    %24 = vector.broadcast %21 : vector<64x1xf32> to vector<64x128xf32>
    %25 = arith.subf %17, %24 : vector<64x128xf32>
    %26 = math.exp %25 : vector<64x128xf32>
    %c0_19 = arith.constant 0 : index
    %c0_20 = arith.constant 0 : index
    %27 = vector.load %arg12[%c0_19, %c0_20] : memref<64x1xf32, #tpu.memory_space<vmem>>, vector<64x1xf32>
    %28 = arith.mulf %23, %27 : vector<64x1xf32>
    %cst_21 = arith.constant dense<0.000000e+00> : vector<64xf32>
    %29 = vector.multi_reduction <add>, %26, %cst_21 [1] : vector<64x128xf32> to vector<64xf32>
    %30 = vector.shape_cast %29 : vector<64xf32> to vector<64x1xf32>
    %31 = arith.addf %28, %30 : vector<64x1xf32>
    %c0_22 = arith.constant 0 : index
    %c0_23 = arith.constant 0 : index
    %32 = vector.load %arg12[%c0_22, %c0_23] : memref<64x1xf32, #tpu.memory_space<vmem>>, vector<64x1xf32>
    tpu.vector_store %arg12[%c0_22, %c0_23], %31 {strides = array<i32>} : memref<64x1xf32, #tpu.memory_space<vmem>>, vector<64x1xf32>,
    %c0_24 = arith.constant 0 : index
    %c0_25 = arith.constant 0 : index
    %33 = vector.load %arg13[%c0_24, %c0_25] : memref<64x128xf32, #tpu.memory_space<vmem>>, vector<64x128xf32>
    %34 = vector.broadcast %23 : vector<64x1xf32> to vector<64x128xf32>
    %35 = arith.mulf %34, %33 : vector<64x128xf32>
    %cst_26 = arith.constant dense<0.000000e+00> : vector<64x128xf32>
    %36 = tpu.matmul %26, %14, %cst_26 {dimension_numbers = #tpu.dot_dimension_numbers<[1], [0], [0], [1], [0, 0, 1, 1], [], []>} : vector<64x128xf32>, vector<128x128xf32>, vector<64x128xf32> -> vector<64x128xf32>
    %37 = arith.addf %35, %36 : vector<64x128xf32>
    %c0_27 = arith.constant 0 : index
    %c0_28 = arith.constant 0 : index
    %38 = vector.load %arg13[%c0_27, %c0_28] : memref<64x128xf32, #tpu.memory_space<vmem>>, vector<64x128xf32>
    tpu.vector_store %arg13[%c0_27, %c0_28], %37 {strides = array<i32>} : memref<64x128xf32, #tpu.memory_space<vmem>>, vector<64x128xf32>,
    %c0_29 = arith.constant 0 : index
    %c0_30 = arith.constant 0 : index
    %39 = vector.load %arg11[%c0_29, %c0_30] : memref<64x1xf32, #tpu.memory_space<vmem>>, vector<64x1xf32>
    tpu.vector_store %arg11[%c0_29, %c0_30], %21 {strides = array<i32>} : memref<64x1xf32, #tpu.memory_space<vmem>>, vector<64x1xf32>,
    %c2_i32 = arith.constant 2 : i32
    %40 = arith.cmpi eq, %arg3, %c2_i32 : i32
    %41 = arith.extui %40 : i1 to i32
    %c0_i32_31 = arith.constant 0 : i32
    %42 = arith.cmpi ne, %41, %c0_i32_31 : i32
    scf.if %42 {
      %c0_32 = arith.constant 0 : index
      %c0_33 = arith.constant 0 : index
      %43 = vector.load %arg13[%c0_32, %c0_33] : memref<64x128xf32, #tpu.memory_space<vmem>>, vector<64x128xf32>
      %c0_34 = arith.constant 0 : index
      %c0_35 = arith.constant 0 : index
      %44 = vector.load %arg12[%c0_34, %c0_35] : memref<64x1xf32, #tpu.memory_space<vmem>>, vector<64x1xf32>
      %45 = tpu.reciprocal %44 {approx = true} : vector<64x1xf32> -> vector<64x1xf32>
      %46 = vector.broadcast %45 : vector<64x1xf32> to vector<64x128xf32>
      %47 = arith.mulf %43, %46 : vector<64x128xf32>
      %c0_36 = arith.constant 0 : index
      %c0_37 = arith.constant 0 : index
      %c0_38 = arith.constant 0 : index
      %48 = vector.load %arg10[%c0_36, %c0_37, %c0_38] : memref<1x64x128xf32, #tpu.memory_space<vmem>>, vector<1x64x128xf32>
      %49 = vector.shape_cast %48 : vector<1x64x128xf32> to vector<64x128xf32>
      %50 = vector.shape_cast %47 : vector<64x128xf32> to vector<1x64x128xf32>
      tpu.vector_store %arg10[%c0_36, %c0_37, %c0_38], %50 {strides = array<i32>} : memref<1x64x128xf32, #tpu.memory_space<vmem>>, vector<1x64x128xf32>,
    } else {
    }
    return
  }
  func.func @transform_0(%arg0: i32, %arg1: i32, %arg2: i32, %arg3: i32) -> (i32, i32, i32) {
    %c0_i32 = arith.constant 0 : i32
    return %arg0, %arg2, %arg1 : i32, i32, i32
  }
  func.func @transform_1(%arg0: i32, %arg1: i32, %arg2: i32, %arg3: i32) -> (i32, i32, i32) {
    %c0_i32 = arith.constant 0 : i32
    %c0_i32_0 = arith.constant 0 : i32
    return %arg0, %arg3, %c0_i32 : i32, i32, i32
  }
  func.func @transform_2(%arg0: i32, %arg1: i32, %arg2: i32, %arg3: i32) -> (i32, i32) {
    %c0_i32 = arith.constant 0 : i32
    %c0_i32_0 = arith.constant 0 : i32
    return %c0_i32, %arg1 : i32, i32
  }
  func.func @transform_3(%arg0: i32, %arg1: i32, %arg2: i32, %arg3: i32) -> (i32, i32) {
    %c2_i32 = arith.constant 2 : i32
    %0 = arith.addi %c2_i32, %arg1 : i32
    %c0_i32 = arith.constant 0 : i32
    %c0_i32_0 = arith.constant 0 : i32
    return %c0_i32, %0 : i32, i32
  }
  func.func @transform_4(%arg0: i32, %arg1: i32, %arg2: i32, %arg3: i32) -> (i32, i32) {
    %c0_i32 = arith.constant 0 : i32
    %c0_i32_0 = arith.constant 0 : i32
    return %c0_i32, %arg1 : i32, i32
  }
  func.func @transform_5(%arg0: i32, %arg1: i32, %arg2: i32, %arg3: i32) -> (i32, i32) {
    %c2_i32 = arith.constant 2 : i32
    %0 = arith.addi %c2_i32, %arg1 : i32
    %c0_i32 = arith.constant 0 : i32
    %c0_i32_0 = arith.constant 0 : i32
    return %c0_i32, %0 : i32, i32
  }
  func.func @transform_6(%arg0: i32, %arg1: i32, %arg2: i32, %arg3: i32) -> (i32, i32, i32) {
    %c0_i32 = arith.constant 0 : i32
    return %arg0, %arg2, %arg1 : i32, i32, i32
  }
}

module attributes {stable_mosaic.version = 11 : i64} {
  func.func @_flash_kv_attn_kernel(%arg0: i32, %arg1: i32, %arg2: i32, %arg3: i32, %arg4: memref<1x64x128xf32, #tpu.memory_space<vmem>>, %arg5: memref<1x96x192xf32, #tpu.memory_space<vmem>>, %arg6: memref<192x128xf32, #tpu.memory_space<vmem>>, %arg7: memref<192x128xf32, #tpu.memory_space<vmem>>, %arg8: memref<1x128xf32, #tpu.memory_space<vmem>>, %arg9: memref<1x128xf32, #tpu.memory_space<vmem>>, %arg10: memref<1x64x128xf32, #tpu.memory_space<vmem>>, %arg11: memref<64x1xf32, #tpu.memory_space<vmem>>, %arg12: memref<64x1xf32, #tpu.memory_space<vmem>>, %arg13: memref<64x128xf32, #tpu.memory_space<vmem>>) attributes {dimension_semantics = [#tpu.dimension_semantics<parallel>, #tpu.dimension_semantics<parallel>, #tpu.dimension_semantics<parallel>, #tpu.dimension_semantics<arbitrary>], iteration_bounds = array<i64: 2, 2, 1, 1>, scalar_prefetch = 0 : i64, scratch_operands = 3 : i64, tpu.core_type = #tpu.core_type<tc>, window_params = [{transform_indices = @transform_0, window_bounds = array<i64: 1, 64, 128>}, {transform_indices = @transform_1, window_bounds = array<i64: 1, 96, 192>}, {transform_indices = @transform_2, window_bounds = array<i64: 192, 128>}, {transform_indices = @transform_3, window_bounds = array<i64: 192, 128>}, {transform_indices = @transform_4, window_bounds = array<i64: 1, 128>}, {transform_indices = @transform_5, window_bounds = array<i64: 1, 128>}, {transform_indices = @transform_6, window_bounds = array<i64: 1, 64, 128>}]} {
    %c0_i32 = arith.constant 0 : i32
    %0 = arith.cmpi eq, %arg3, %c0_i32 : i32
    %1 = arith.extui %0 : i1 to i32
    %c0_i32_0 = arith.constant 0 : i32
    %2 = arith.cmpi ne, %1, %c0_i32_0 : i32
    scf.if %2 {
      %cst_33 = arith.constant 0xFF800000 : f32
      %43 = vector.broadcast %cst_33 : f32 to vector<64x1xf32>
      %c0_34 = arith.constant 0 : index
      %c0_35 = arith.constant 0 : index
      %44 = vector.load %arg11[%c0_34, %c0_35] : memref<64x1xf32, #tpu.memory_space<vmem>>, vector<64x1xf32>
      tpu.vector_store %arg11[%c0_34, %c0_35], %43 {strides = array<i32>} : memref<64x1xf32, #tpu.memory_space<vmem>>, vector<64x1xf32>,
      %cst_36 = arith.constant 0.000000e+00 : f32
      %45 = vector.broadcast %cst_36 : f32 to vector<64x1xf32>
      %c0_37 = arith.constant 0 : index
      %c0_38 = arith.constant 0 : index
      %46 = vector.load %arg12[%c0_37, %c0_38] : memref<64x1xf32, #tpu.memory_space<vmem>>, vector<64x1xf32>
      tpu.vector_store %arg12[%c0_37, %c0_38], %45 {strides = array<i32>} : memref<64x1xf32, #tpu.memory_space<vmem>>, vector<64x1xf32>,
      %cst_39 = arith.constant 0.000000e+00 : f32
      %47 = vector.broadcast %cst_39 : f32 to vector<64x128xf32>
      %c0_40 = arith.constant 0 : index
      %c0_41 = arith.constant 0 : index
      %48 = vector.load %arg13[%c0_40, %c0_41] : memref<64x128xf32, #tpu.memory_space<vmem>>, vector<64x128xf32>
      tpu.vector_store %arg13[%c0_40, %c0_41], %47 {strides = array<i32>} : memref<64x128xf32, #tpu.memory_space<vmem>>, vector<64x128xf32>,
    } else {
    }
    %c0 = arith.constant 0 : index
    %c0_1 = arith.constant 0 : index
    %c0_2 = arith.constant 0 : index
    %3 = vector.load %arg5[%c0, %c0_1, %c0_2] : memref<1x96x192xf32, #tpu.memory_space<vmem>>, vector<1x96x192xf32>
    %4 = vector.shape_cast %3 : vector<1x96x192xf32> to vector<96x192xf32>
    %c0_3 = arith.constant 0 : index
    %c0_4 = arith.constant 0 : index
    %5 = vector.load %arg6[%c0_3, %c0_4] : memref<192x128xf32, #tpu.memory_space<vmem>>, vector<192x128xf32>
    %cst = arith.constant dense<0.000000e+00> : vector<96x128xf32>
    %6 = tpu.matmul %4, %5, %cst {dimension_numbers = #tpu.dot_dimension_numbers<[1], [0], [0], [1], [0, 0, 1, 1], [], []>} : vector<96x192xf32>, vector<192x128xf32>, vector<96x128xf32> -> vector<96x128xf32>
    %c0_5 = arith.constant 0 : index
    %c0_6 = arith.constant 0 : index
    %7 = vector.load %arg8[%c0_5, %c0_6] : memref<1x128xf32, #tpu.memory_space<vmem>>, vector<1x128xf32>
    %8 = vector.broadcast %7 : vector<1x128xf32> to vector<96x128xf32>
    %9 = arith.addf %6, %8 : vector<96x128xf32>
    %c0_7 = arith.constant 0 : index
    %c0_8 = arith.constant 0 : index
    %10 = vector.load %arg7[%c0_7, %c0_8] : memref<192x128xf32, #tpu.memory_space<vmem>>, vector<192x128xf32>
    %cst_9 = arith.constant dense<0.000000e+00> : vector<96x128xf32>
    %11 = tpu.matmul %4, %10, %cst_9 {dimension_numbers = #tpu.dot_dimension_numbers<[1], [0], [0], [1], [0, 0, 1, 1], [], []>} : vector<96x192xf32>, vector<192x128xf32>, vector<96x128xf32> -> vector<96x128xf32>
    %c0_10 = arith.constant 0 : index
    %c0_11 = arith.constant 0 : index
    %12 = vector.load %arg9[%c0_10, %c0_11] : memref<1x128xf32, #tpu.memory_space<vmem>>, vector<1x128xf32>
    %13 = vector.broadcast %12 : vector<1x128xf32> to vector<96x128xf32>
    %14 = arith.addf %11, %13 : vector<96x128xf32>
    %c0_12 = arith.constant 0 : index
    %c0_13 = arith.constant 0 : index
    %c0_14 = arith.constant 0 : index
    %15 = vector.load %arg4[%c0_12, %c0_13, %c0_14] : memref<1x64x128xf32, #tpu.memory_space<vmem>>, vector<1x64x128xf32>
    %16 = vector.shape_cast %15 : vector<1x64x128xf32> to vector<64x128xf32>
    %cst_15 = arith.constant dense<0.000000e+00> : vector<64x96xf32>
    %17 = tpu.matmul %16, %9, %cst_15 {dimension_numbers = #tpu.dot_dimension_numbers<[1], [1], [0], [0], [0, 0, 1, 0], [], []>} : vector<64x128xf32>, vector<96x128xf32>, vector<64x96xf32> -> vector<64x96xf32>
    %c0_16 = arith.constant 0 : index
    %c0_17 = arith.constant 0 : index
    %18 = vector.load %arg11[%c0_16, %c0_17] : memref<64x1xf32, #tpu.memory_space<vmem>>, vector<64x1xf32>
    %cst_18 = arith.constant dense<0xFF800000> : vector<64xf32>
    %19 = vector.multi_reduction <maximumf>, %17, %cst_18 [1] : vector<64x96xf32> to vector<64xf32>
    %20 = vector.shape_cast %19 : vector<64xf32> to vector<64x1xf32>
    %21 = arith.maximumf %18, %20 : vector<64x1xf32>
    %22 = arith.subf %18, %21 : vector<64x1xf32>
    %23 = math.exp %22 : vector<64x1xf32>
    %24 = vector.broadcast %21 : vector<64x1xf32> to vector<64x96xf32>
    %25 = arith.subf %17, %24 : vector<64x96xf32>
    %26 = math.exp %25 : vector<64x96xf32>
    %c0_19 = arith.constant 0 : index
    %c0_20 = arith.constant 0 : index
    %27 = vector.load %arg12[%c0_19, %c0_20] : memref<64x1xf32, #tpu.memory_space<vmem>>, vector<64x1xf32>
    %28 = arith.mulf %23, %27 : vector<64x1xf32>
    %cst_21 = arith.constant dense<0.000000e+00> : vector<64xf32>
    %29 = vector.multi_reduction <add>, %26, %cst_21 [1] : vector<64x96xf32> to vector<64xf32>
    %30 = vector.shape_cast %29 : vector<64xf32> to vector<64x1xf32>
    %31 = arith.addf %28, %30 : vector<64x1xf32>
    %c0_22 = arith.constant 0 : index
    %c0_23 = arith.constant 0 : index
    %32 = vector.load %arg12[%c0_22, %c0_23] : memref<64x1xf32, #tpu.memory_space<vmem>>, vector<64x1xf32>
    tpu.vector_store %arg12[%c0_22, %c0_23], %31 {strides = array<i32>} : memref<64x1xf32, #tpu.memory_space<vmem>>, vector<64x1xf32>,
    %c0_24 = arith.constant 0 : index
    %c0_25 = arith.constant 0 : index
    %33 = vector.load %arg13[%c0_24, %c0_25] : memref<64x128xf32, #tpu.memory_space<vmem>>, vector<64x128xf32>
    %34 = vector.broadcast %23 : vector<64x1xf32> to vector<64x128xf32>
    %35 = arith.mulf %34, %33 : vector<64x128xf32>
    %cst_26 = arith.constant dense<0.000000e+00> : vector<64x128xf32>
    %36 = tpu.matmul %26, %14, %cst_26 {dimension_numbers = #tpu.dot_dimension_numbers<[1], [0], [0], [1], [0, 0, 1, 1], [], []>} : vector<64x96xf32>, vector<96x128xf32>, vector<64x128xf32> -> vector<64x128xf32>
    %37 = arith.addf %35, %36 : vector<64x128xf32>
    %c0_27 = arith.constant 0 : index
    %c0_28 = arith.constant 0 : index
    %38 = vector.load %arg13[%c0_27, %c0_28] : memref<64x128xf32, #tpu.memory_space<vmem>>, vector<64x128xf32>
    tpu.vector_store %arg13[%c0_27, %c0_28], %37 {strides = array<i32>} : memref<64x128xf32, #tpu.memory_space<vmem>>, vector<64x128xf32>,
    %c0_29 = arith.constant 0 : index
    %c0_30 = arith.constant 0 : index
    %39 = vector.load %arg11[%c0_29, %c0_30] : memref<64x1xf32, #tpu.memory_space<vmem>>, vector<64x1xf32>
    tpu.vector_store %arg11[%c0_29, %c0_30], %21 {strides = array<i32>} : memref<64x1xf32, #tpu.memory_space<vmem>>, vector<64x1xf32>,
    %c0_i32_31 = arith.constant 0 : i32
    %40 = arith.cmpi eq, %arg3, %c0_i32_31 : i32
    %41 = arith.extui %40 : i1 to i32
    %c0_i32_32 = arith.constant 0 : i32
    %42 = arith.cmpi ne, %41, %c0_i32_32 : i32
    scf.if %42 {
      %c0_33 = arith.constant 0 : index
      %c0_34 = arith.constant 0 : index
      %43 = vector.load %arg13[%c0_33, %c0_34] : memref<64x128xf32, #tpu.memory_space<vmem>>, vector<64x128xf32>
      %c0_35 = arith.constant 0 : index
      %c0_36 = arith.constant 0 : index
      %44 = vector.load %arg12[%c0_35, %c0_36] : memref<64x1xf32, #tpu.memory_space<vmem>>, vector<64x1xf32>
      %45 = tpu.reciprocal %44 {approx = true} : vector<64x1xf32> -> vector<64x1xf32>
      %46 = vector.broadcast %45 : vector<64x1xf32> to vector<64x128xf32>
      %47 = arith.mulf %43, %46 : vector<64x128xf32>
      %c0_37 = arith.constant 0 : index
      %c0_38 = arith.constant 0 : index
      %c0_39 = arith.constant 0 : index
      %48 = vector.load %arg10[%c0_37, %c0_38, %c0_39] : memref<1x64x128xf32, #tpu.memory_space<vmem>>, vector<1x64x128xf32>
      %49 = vector.shape_cast %48 : vector<1x64x128xf32> to vector<64x128xf32>
      %50 = vector.shape_cast %47 : vector<64x128xf32> to vector<1x64x128xf32>
      tpu.vector_store %arg10[%c0_37, %c0_38, %c0_39], %50 {strides = array<i32>} : memref<1x64x128xf32, #tpu.memory_space<vmem>>, vector<1x64x128xf32>,
    } else {
    }
    return
  }
  func.func @transform_0(%arg0: i32, %arg1: i32, %arg2: i32, %arg3: i32) -> (i32, i32, i32) {
    %c0_i32 = arith.constant 0 : i32
    return %arg0, %arg2, %arg1 : i32, i32, i32
  }
  func.func @transform_1(%arg0: i32, %arg1: i32, %arg2: i32, %arg3: i32) -> (i32, i32, i32) {
    %c0_i32 = arith.constant 0 : i32
    %c0_i32_0 = arith.constant 0 : i32
    return %arg0, %arg3, %c0_i32 : i32, i32, i32
  }
  func.func @transform_2(%arg0: i32, %arg1: i32, %arg2: i32, %arg3: i32) -> (i32, i32) {
    %c0_i32 = arith.constant 0 : i32
    %c0_i32_0 = arith.constant 0 : i32
    return %c0_i32, %arg1 : i32, i32
  }
  func.func @transform_3(%arg0: i32, %arg1: i32, %arg2: i32, %arg3: i32) -> (i32, i32) {
    %c2_i32 = arith.constant 2 : i32
    %0 = arith.addi %c2_i32, %arg1 : i32
    %c0_i32 = arith.constant 0 : i32
    %c0_i32_0 = arith.constant 0 : i32
    return %c0_i32, %0 : i32, i32
  }
  func.func @transform_4(%arg0: i32, %arg1: i32, %arg2: i32, %arg3: i32) -> (i32, i32) {
    %c0_i32 = arith.constant 0 : i32
    %c0_i32_0 = arith.constant 0 : i32
    return %c0_i32, %arg1 : i32, i32
  }
  func.func @transform_5(%arg0: i32, %arg1: i32, %arg2: i32, %arg3: i32) -> (i32, i32) {
    %c2_i32 = arith.constant 2 : i32
    %0 = arith.addi %c2_i32, %arg1 : i32
    %c0_i32 = arith.constant 0 : i32
    %c0_i32_0 = arith.constant 0 : i32
    return %c0_i32, %0 : i32, i32
  }
  func.func @transform_6(%arg0: i32, %arg1: i32, %arg2: i32, %arg3: i32) -> (i32, i32, i32) {
    %c0_i32 = arith.constant 0 : i32
    return %arg0, %arg2, %arg1 : i32, i32, i32
  }
}

module attributes {stable_mosaic.version = 11 : i64} {
  func.func @kernel(%arg0: i32, %arg1: i32, %arg2: i32, %arg3: memref<64x256xf32, #tpu.memory_space<vmem>>, %arg4: memref<64x256xf32, #tpu.memory_space<vmem>>, %arg5: memref<64x256xf32, #tpu.memory_space<vmem>>, %arg6: memref<256x256xf32, #tpu.memory_space<vmem>>, %arg7: memref<256x256xf32, #tpu.memory_space<vmem>>, %arg8: memref<256x256xf32, #tpu.memory_space<vmem>>, %arg9: memref<1x256xf32, #tpu.memory_space<vmem>>, %arg10: memref<64x256xf32, #tpu.memory_space<vmem>>, %arg11: memref<64x256xf32, #tpu.memory_space<vmem>>) attributes {dimension_semantics = [#tpu.dimension_semantics<parallel>, #tpu.dimension_semantics<parallel>, #tpu.dimension_semantics<arbitrary>], iteration_bounds = array<i64: 2, 1, 1>, scalar_prefetch = 0 : i64, scratch_operands = 1 : i64, tpu.core_type = #tpu.core_type<tc>, window_params = [{transform_indices = @transform_0, window_bounds = array<i64: 64, 256>}, {transform_indices = @transform_1, window_bounds = array<i64: 64, 256>}, {transform_indices = @transform_2, window_bounds = array<i64: 64, 256>}, {transform_indices = @transform_3, window_bounds = array<i64: 256, 256>}, {transform_indices = @transform_4, window_bounds = array<i64: 256, 256>}, {transform_indices = @transform_5, window_bounds = array<i64: 256, 256>}, {transform_indices = @transform_6, window_bounds = array<i64: 1, 256>}, {transform_indices = @transform_7, window_bounds = array<i64: 64, 256>}]} {
    %c0_i32 = arith.constant 0 : i32
    %0 = arith.cmpi eq, %arg2, %c0_i32 : i32
    %1 = arith.extui %0 : i1 to i32
    %c0_i32_0 = arith.constant 0 : i32
    %2 = arith.cmpi ne, %1, %c0_i32_0 : i32
    scf.if %2 {
      %cst_28 = arith.constant 0.000000e+00 : f32
      %24 = vector.broadcast %cst_28 : f32 to vector<64x256xf32>
      %c0_29 = arith.constant 0 : index
      %c0_30 = arith.constant 0 : index
      %25 = vector.load %arg11[%c0_29, %c0_30] : memref<64x256xf32, #tpu.memory_space<vmem>>, vector<64x256xf32>
      tpu.vector_store %arg11[%c0_29, %c0_30], %24 {strides = array<i32>} : memref<64x256xf32, #tpu.memory_space<vmem>>, vector<64x256xf32>,
    } else {
    }
    %c0 = arith.constant 0 : index
    %c0_1 = arith.constant 0 : index
    %3 = vector.load %arg11[%c0, %c0_1] : memref<64x256xf32, #tpu.memory_space<vmem>>, vector<64x256xf32>
    %c0_2 = arith.constant 0 : index
    %c0_3 = arith.constant 0 : index
    %4 = vector.load %arg3[%c0_2, %c0_3] : memref<64x256xf32, #tpu.memory_space<vmem>>, vector<64x256xf32>
    %c0_4 = arith.constant 0 : index
    %c0_5 = arith.constant 0 : index
    %5 = vector.load %arg6[%c0_4, %c0_5] : memref<256x256xf32, #tpu.memory_space<vmem>>, vector<256x256xf32>
    %cst = arith.constant dense<0.000000e+00> : vector<64x256xf32>
    %6 = tpu.matmul %4, %5, %cst {dimension_numbers = #tpu.dot_dimension_numbers<[1], [0], [0], [1], [0, 0, 1, 1], [], []>} : vector<64x256xf32>, vector<256x256xf32>, vector<64x256xf32> -> vector<64x256xf32>
    %7 = arith.addf %3, %6 : vector<64x256xf32>
    %c0_6 = arith.constant 0 : index
    %c0_7 = arith.constant 0 : index
    %8 = vector.load %arg11[%c0_6, %c0_7] : memref<64x256xf32, #tpu.memory_space<vmem>>, vector<64x256xf32>
    tpu.vector_store %arg11[%c0_6, %c0_7], %7 {strides = array<i32>} : memref<64x256xf32, #tpu.memory_space<vmem>>, vector<64x256xf32>,
    %c0_8 = arith.constant 0 : index
    %c0_9 = arith.constant 0 : index
    %9 = vector.load %arg11[%c0_8, %c0_9] : memref<64x256xf32, #tpu.memory_space<vmem>>, vector<64x256xf32>
    %c0_10 = arith.constant 0 : index
    %c0_11 = arith.constant 0 : index
    %10 = vector.load %arg4[%c0_10, %c0_11] : memref<64x256xf32, #tpu.memory_space<vmem>>, vector<64x256xf32>
    %c0_12 = arith.constant 0 : index
    %c0_13 = arith.constant 0 : index
    %11 = vector.load %arg7[%c0_12, %c0_13] : memref<256x256xf32, #tpu.memory_space<vmem>>, vector<256x256xf32>
    %cst_14 = arith.constant dense<0.000000e+00> : vector<64x256xf32>
    %12 = tpu.matmul %10, %11, %cst_14 {dimension_numbers = #tpu.dot_dimension_numbers<[1], [0], [0], [1], [0, 0, 1, 1], [], []>} : vector<64x256xf32>, vector<256x256xf32>, vector<64x256xf32> -> vector<64x256xf32>
    %13 = arith.addf %9, %12 : vector<64x256xf32>
    %c0_15 = arith.constant 0 : index
    %c0_16 = arith.constant 0 : index
    %14 = vector.load %arg11[%c0_15, %c0_16] : memref<64x256xf32, #tpu.memory_space<vmem>>, vector<64x256xf32>
    tpu.vector_store %arg11[%c0_15, %c0_16], %13 {strides = array<i32>} : memref<64x256xf32, #tpu.memory_space<vmem>>, vector<64x256xf32>,
    %c0_17 = arith.constant 0 : index
    %c0_18 = arith.constant 0 : index
    %15 = vector.load %arg11[%c0_17, %c0_18] : memref<64x256xf32, #tpu.memory_space<vmem>>, vector<64x256xf32>
    %c0_19 = arith.constant 0 : index
    %c0_20 = arith.constant 0 : index
    %16 = vector.load %arg5[%c0_19, %c0_20] : memref<64x256xf32, #tpu.memory_space<vmem>>, vector<64x256xf32>
    %c0_21 = arith.constant 0 : index
    %c0_22 = arith.constant 0 : index
    %17 = vector.load %arg8[%c0_21, %c0_22] : memref<256x256xf32, #tpu.memory_space<vmem>>, vector<256x256xf32>
    %cst_23 = arith.constant dense<0.000000e+00> : vector<64x256xf32>
    %18 = tpu.matmul %16, %17, %cst_23 {dimension_numbers = #tpu.dot_dimension_numbers<[1], [0], [0], [1], [0, 0, 1, 1], [], []>} : vector<64x256xf32>, vector<256x256xf32>, vector<64x256xf32> -> vector<64x256xf32>
    %19 = arith.addf %15, %18 : vector<64x256xf32>
    %c0_24 = arith.constant 0 : index
    %c0_25 = arith.constant 0 : index
    %20 = vector.load %arg11[%c0_24, %c0_25] : memref<64x256xf32, #tpu.memory_space<vmem>>, vector<64x256xf32>
    tpu.vector_store %arg11[%c0_24, %c0_25], %19 {strides = array<i32>} : memref<64x256xf32, #tpu.memory_space<vmem>>, vector<64x256xf32>,
    %c0_i32_26 = arith.constant 0 : i32
    %21 = arith.cmpi eq, %arg2, %c0_i32_26 : i32
    %22 = arith.extui %21 : i1 to i32
    %c0_i32_27 = arith.constant 0 : i32
    %23 = arith.cmpi ne, %22, %c0_i32_27 : i32
    scf.if %23 {
      %c0_28 = arith.constant 0 : index
      %c0_29 = arith.constant 0 : index
      %24 = vector.load %arg11[%c0_28, %c0_29] : memref<64x256xf32, #tpu.memory_space<vmem>>, vector<64x256xf32>
      %c0_30 = arith.constant 0 : index
      %c0_31 = arith.constant 0 : index
      %25 = vector.load %arg9[%c0_30, %c0_31] : memref<1x256xf32, #tpu.memory_space<vmem>>, vector<1x256xf32>
      %26 = vector.broadcast %25 : vector<1x256xf32> to vector<64x256xf32>
      %27 = arith.addf %24, %26 : vector<64x256xf32>
      %c0_32 = arith.constant 0 : index
      %c0_33 = arith.constant 0 : index
      %28 = vector.load %arg10[%c0_32, %c0_33] : memref<64x256xf32, #tpu.memory_space<vmem>>, vector<64x256xf32>
      tpu.vector_store %arg10[%c0_32, %c0_33], %27 {strides = array<i32>} : memref<64x256xf32, #tpu.memory_space<vmem>>, vector<64x256xf32>,
    } else {
    }
    return
  }
  func.func @transform_0(%arg0: i32, %arg1: i32, %arg2: i32) -> (i32, i32) {
    %c0_i32 = arith.constant 0 : i32
    return %arg0, %arg2 : i32, i32
  }
  func.func @transform_1(%arg0: i32, %arg1: i32, %arg2: i32) -> (i32, i32) {
    %c0_i32 = arith.constant 0 : i32
    return %arg0, %arg2 : i32, i32
  }
  func.func @transform_2(%arg0: i32, %arg1: i32, %arg2: i32) -> (i32, i32) {
    %c0_i32 = arith.constant 0 : i32
    return %arg0, %arg2 : i32, i32
  }
  func.func @transform_3(%arg0: i32, %arg1: i32, %arg2: i32) -> (i32, i32) {
    %c0_i32 = arith.constant 0 : i32
    %0 = arith.addi %c0_i32, %arg2 : i32
    %c0_i32_0 = arith.constant 0 : i32
    return %0, %arg1 : i32, i32
  }
  func.func @transform_4(%arg0: i32, %arg1: i32, %arg2: i32) -> (i32, i32) {
    %c1_i32 = arith.constant 1 : i32
    %0 = arith.addi %c1_i32, %arg2 : i32
    %c0_i32 = arith.constant 0 : i32
    return %0, %arg1 : i32, i32
  }
  func.func @transform_5(%arg0: i32, %arg1: i32, %arg2: i32) -> (i32, i32) {
    %c2_i32 = arith.constant 2 : i32
    %0 = arith.addi %c2_i32, %arg2 : i32
    %c0_i32 = arith.constant 0 : i32
    return %0, %arg1 : i32, i32
  }
  func.func @transform_6(%arg0: i32, %arg1: i32, %arg2: i32) -> (i32, i32) {
    %c0_i32 = arith.constant 0 : i32
    %c0_i32_0 = arith.constant 0 : i32
    return %c0_i32, %arg1 : i32, i32
  }
  func.func @transform_7(%arg0: i32, %arg1: i32, %arg2: i32) -> (i32, i32) {
    %c0_i32 = arith.constant 0 : i32
    return %arg0, %arg1 : i32, i32
  }
}

</mosaic_0001>

<bundles_post_ra>
// kernel: cca2_forward.4
= control target key start
LH: loop header
LB: loop body
LE: loop exit
PB: predicated region body
PF: predicated region fallthrough
CT: control target
= control target key end

     0   :  { %s884_s12 = smov 0   ;;  %s886_s13 = smov 0   ;;  %s1158_s0 = inlined_call_operand.vmem [shape: f32[128,256], index: 0, kind: input, shape index: {}]   ;;  %s1159_s1 = inlined_call_operand.vmem [shape: f32[256,256], index: 1, kind: input, shape index: {}]   ;;  %s1160_s2 = inlined_call_operand.vmem [shape: f32[1,256], index: 2, kind: input, shape index: {}]   ;;  %s1161_s3 = inlined_call_operand.vmem [shape: f32[128,256], index: 3, kind: output, shape index: {}]  }
   0x1   :  { %s888_s14 = smov 0  }
   0x2 LB: > { %s32_s15 = sadd.s32 1, %s858_s13  ;;  %p741_p0 = scmp.ge.s32.totalorder %s862_s14, 1  ;;  %s862_s14 = sphi %s888_s14, %s13_s14   ;;  %s858_s13 = sphi %s886_s13, %s1163_s13   ;;  %s854_s12 = sphi %s884_s12, %s1162_s12  }
   0x3   : > { %p34_p1 = scmp.ge.s32.totalorder %s32_s15, 2  ;;  %p196_p2 = scmp.lt.s32.totalorder %s862_s14, 3 }
   0x5   : > { %s1165_s15 = smov (%p34_p1, %s32_s15), 0  ;;  %p197_p3 = pnand %p741_p0, %p196_p2 }
   0x6   : > { %s742_s20 = sshll.u32 (!%p197_p3), %s854_s12, 3 }
   0x7   : > { %200 = sbr.rel (%p197_p3) target bundleno = 288 (0x120), region = 32  ;;  %p246_p4 = scmp.lt.s32.totalorder (!%p197_p3), %s742_s20, 15 }
   0xc   : > { %v368_v0 = vld [vmem:[%s1159_s1 + $0xf8] sm:$0xff]  ;;  %v367_v1 = vld [vmem:[%s1159_s1 + $0xf0] sm:$0xff]  ;;  %v366_v2 = vld [vmem:[%s1159_s1 + $0xe8] sm:$0xff]  ;;  %s1167_s20 = smov (!%p246_p4, %s742_s20), 15 }
   0xd   : > { %401 = vmatprep.subr.mxu0 %v368_v0  ;;  %752 = vmatprep.subr.mxu1 %v368_v0  ;;  %v365_v3 = vld [vmem:[%s1159_s1 + $0xe0] sm:$0xff]  ;;  %v364_v4 = vld [vmem:[%s1159_s1 + $0xd8] sm:$0xff]  ;;  %v363_v5 = vld [vmem:[%s1159_s1 + $0xd0] sm:$0xff]  ;;  %s750_s19 = sshll.u32 %s1167_s20, 4 }
   0xe   : > { %402 = vmatpush1.msra.mxu0 %v367_v1  ;;  %784 = vmatpush1.msra.mxu1 %v367_v1  ;;  %v362_v6 = vld [vmem:[%s1159_s1 + $0xc8] sm:$0xff]  ;;  %v361_v7 = vld [vmem:[%s1159_s1 + $0xc0] sm:$0xff]  ;;  %v360_v8 = vld [vmem:[%s1159_s1 + $0xb8] sm:$0xff]  ;;  %s1099_s28 = scalar_lea.vmem %s1158_s0, %s750_s19  ;;  %s1131_s10 = scalar_lea.vmem %s1161_s3, %s750_s19 }
   0xf   : > { %403 = vmatprep.subr.mxu0 %v366_v2  ;;  %753 = vmatprep.subr.mxu1 %v366_v2  ;;  %v359_v9 = vld [vmem:[%s1159_s1 + $0xb0] sm:$0xff]  ;;  %v358_v10 = vld [vmem:[%s1159_s1 + $0xa8] sm:$0xff]  ;;  %v357_v11 = vld [vmem:[%s1159_s1 + $0xa0] sm:$0xff] }
  0x10   : > { %404 = vmatpush1.msra.mxu0 %v365_v3  ;;  %785 = vmatpush1.msra.mxu1 %v365_v3  ;;  %v356_v12 = vld [vmem:[%s1159_s1 + $0x98] sm:$0xff]  ;;  %v355_v13 = vld [vmem:[%s1159_s1 + $0x90] sm:$0xff]  ;;  %v354_v14 = vld [vmem:[%s1159_s1 + $0x88] sm:$0xff] }
  0x11   : > { %405 = vmatprep.subr.mxu0 %v364_v4  ;;  %754 = vmatprep.subr.mxu1 %v364_v4  ;;  %v353_v15 = vld [vmem:[%s1159_s1 + $0x80] sm:$0xff]  ;;  %v352_v16 = vld [vmem:[%s1159_s1 + $0x78] sm:$0xff]  ;;  %v351_v17 = vld [vmem:[%s1159_s1 + $0x70] sm:$0xff] }
  0x12   : > { %406 = vmatpush1.msra.mxu0 %v363_v5  ;;  %786 = vmatpush1.msra.mxu1 %v363_v5  ;;  %v350_v18 = vld [vmem:[%s1159_s1 + $0x68] sm:$0xff]  ;;  %v349_v19 = vld [vmem:[%s1159_s1 + $0x60] sm:$0xff]  ;;  %v348_v20 = vld [vmem:[%s1159_s1 + $0x58] sm:$0xff] }
  0x13   : > { %407 = vmatprep.subr.mxu0 %v362_v6  ;;  %755 = vmatprep.subr.mxu1 %v362_v6  ;;  %v347_v21 = vld [vmem:[%s1159_s1 + $0x50] sm:$0xff]  ;;  %v346_v22 = vld [vmem:[%s1159_s1 + $0x48] sm:$0xff]  ;;  %v345_v23 = vld [vmem:[%s1159_s1 + $0x40] sm:$0xff] }
  0x14   : > { %408 = vmatpush1.msra.mxu0 %v361_v7  ;;  %787 = vmatpush1.msra.mxu1 %v361_v7  ;;  %v344_v24 = vld [vmem:[%s1159_s1 + $0x38] sm:$0xff]  ;;  %v343_v25 = vld [vmem:[%s1159_s1 + $0x30] sm:$0xff]  ;;  %v342_v26 = vld [vmem:[%s1159_s1 + $0x28] sm:$0xff] }
  0x15   : > { %409 = vmatprep.subr.mxu0 %v360_v8  ;;  %756 = vmatprep.subr.mxu1 %v360_v8  ;;  %v341_v27 = vld [vmem:[%s1159_s1 + $0x20] sm:$0xff]  ;;  %v340_v28 = vld [vmem:[%s1159_s1 + $0x18] sm:$0xff]  ;;  %v339_v29 = vld [vmem:[%s1159_s1 + $0x10] sm:$0xff] }
  0x16   : > { %410 = vmatpush1.msra.mxu0 %v359_v9  ;;  %788 = vmatpush1.msra.mxu1 %v359_v9  ;;  %v338_v30 = vld [vmem:[%s1159_s1 + $0x8] sm:$0xff]  ;;  %v337_v31 = vld [vmem:[%s1159_s1] sm:$0xff]  ;;  %v400_v32 = vld [vmem:[%s1159_s1 + $0x1f8] sm:$0xff] }
  0x17   : > { %411 = vmatprep.subr.mxu0 %v358_v10  ;;  %757 = vmatprep.subr.mxu1 %v358_v10  ;;  %v399_v33 = vld [vmem:[%s1159_s1 + $0x1f0] sm:$0xff]  ;;  %v398_v34 = vld [vmem:[%s1159_s1 + $0x1e8] sm:$0xff]  ;;  %v397_v35 = vld [vmem:[%s1159_s1 + $0x1e0] sm:$0xff] }
  0x18   : > { %412 = vmatpush1.msra.mxu0 %v357_v11  ;;  %789 = vmatpush1.msra.mxu1 %v357_v11  ;;  %v396_v36 = vld [vmem:[%s1159_s1 + $0x1d8] sm:$0xff]  ;;  %v395_v37 = vld [vmem:[%s1159_s1 + $0x1d0] sm:$0xff]  ;;  %v394_v38 = vld [vmem:[%s1159_s1 + $0x1c8] sm:$0xff] }
  0x19   : > { %413 = vmatprep.subr.mxu0 %v356_v12  ;;  %758 = vmatprep.subr.mxu1 %v356_v12  ;;  %v393_v39 = vld [vmem:[%s1159_s1 + $0x1c0] sm:$0xff]  ;;  %v392_v40 = vld [vmem:[%s1159_s1 + $0x1b8] sm:$0xff]  ;;  %v391_v41 = vld [vmem:[%s1159_s1 + $0x1b0] sm:$0xff] }
  0x1a   : > { %414 = vmatpush1.msra.mxu0 %v355_v13  ;;  %790 = vmatpush1.msra.mxu1 %v355_v13  ;;  %v390_v42 = vld [vmem:[%s1159_s1 + $0x1a8] sm:$0xff]  ;;  %v389_v43 = vld [vmem:[%s1159_s1 + $0x1a0] sm:$0xff]  ;;  %v388_v44 = vld [vmem:[%s1159_s1 + $0x198] sm:$0xff] }
  0x1b   : > { %415 = vmatprep.subr.mxu0 %v354_v14  ;;  %759 = vmatprep.subr.mxu1 %v354_v14  ;;  %v387_v45 = vld [vmem:[%s1159_s1 + $0x190] sm:$0xff]  ;;  %v386_v46 = vld [vmem:[%s1159_s1 + $0x188] sm:$0xff]  ;;  %v385_v47 = vld [vmem:[%s1159_s1 + $0x180] sm:$0xff] }
  0x1c   : > { %416 = vmatpush1.msra.mxu0 %v353_v15  ;;  %791 = vmatpush1.msra.mxu1 %v353_v15  ;;  %v384_v48 = vld [vmem:[%s1159_s1 + $0x178] sm:$0xff]  ;;  %v383_v49 = vld [vmem:[%s1159_s1 + $0x170] sm:$0xff]  ;;  %v382_v50 = vld [vmem:[%s1159_s1 + $0x168] sm:$0xff] }
  0x1d   : > { %417 = vmatprep.subr.mxu0 %v352_v16  ;;  %760 = vmatprep.subr.mxu1 %v352_v16  ;;  %v381_v51 = vld [vmem:[%s1159_s1 + $0x160] sm:$0xff]  ;;  %v380_v52 = vld [vmem:[%s1159_s1 + $0x158] sm:$0xff]  ;;  %v379_v53 = vld [vmem:[%s1159_s1 + $0x150] sm:$0xff]  ;;  %v567_v16 = vlaneseq }
  0x1e   : > { %418 = vmatpush1.msra.mxu0 %v351_v17  ;;  %792 = vmatpush1.msra.mxu1 %v351_v17  ;;  %v378_v54 = vld [vmem:[%s1159_s1 + $0x148] sm:$0xff]  ;;  %v377_v55 = vld [vmem:[%s1159_s1 + $0x140] sm:$0xff]  ;;  %v376_v56 = vld [vmem:[%s1159_s1 + $0x138] sm:$0xff] }
  0x1f   : > { %419 = vmatprep.subr.mxu0 %v350_v18  ;;  %761 = vmatprep.subr.mxu1 %v350_v18  ;;  %v375_v57 = vld [vmem:[%s1159_s1 + $0x130] sm:$0xff]  ;;  %v374_v58 = vld [vmem:[%s1159_s1 + $0x128] sm:$0xff]  ;;  %v373_v59 = vld [vmem:[%s1159_s1 + $0x120] sm:$0xff]  ;;  %v568_v17 = vshrl.u32 %v567_v16, 7 }
  0x20   : > { %420 = vmatpush1.msra.mxu0 %v349_v19  ;;  %793 = vmatpush1.msra.mxu1 %v349_v19  ;;  %v372_v60 = vld [vmem:[%s1159_s1 + $0x118] sm:$0xff]  ;;  %v371_v61 = vld [vmem:[%s1159_s1 + $0x110] sm:$0xff]  ;;  %v370_v62 = vld [vmem:[%s1159_s1 + $0x108] sm:$0xff] }
  0x21   : > { %421 = vmatprep.subr.mxu0 %v348_v20  ;;  %762 = vmatprep.subr.mxu1 %v348_v20  ;;  %v369_v63 = vld [vmem:[%s1159_s1 + $0x100] sm:$0xff]  ;;  %v322_v0 = vld [vmem:[%s1099_s28 + $0x8] sm:$0xff]  ;;  %v324_v4 = vld [vmem:[%s1099_s28 + $0x18] sm:$0xff]  ;;  %v569_v18 = vsub.s32 0, %v568_v17  ;;  %v573_v20 = vsub.s32 1, %v568_v17 }
  0x22   : > { %422 = vmatpush1.msra.mxu0 %v347_v21  ;;  %794 = vmatpush1.msra.mxu1 %v347_v21  ;;  %v330_v1 = vld [vmem:[%s1099_s28 + $0x48] sm:$0xff]  ;;  %v321_v2 = vld [vmem:[%s1099_s28] sm:$0xff]  ;;  %v332_v5 = vld [vmem:[%s1099_s28 + $0x58] sm:$0xff] }
  0x23   : > { %423 = vmatprep.subr.mxu0 %v346_v22  ;;  %763 = vmatprep.subr.mxu1 %v346_v22  ;;  %v329_v3 = vld [vmem:[%s1099_s28 + $0x40] sm:$0xff]  ;;  %v323_v6 = vld [vmem:[%s1099_s28 + $0x10] sm:$0xff]  ;;  %v326_v8 = vld [vmem:[%s1099_s28 + $0x28] sm:$0xff] }
  0x24   : > { %424 = vmatpush1.msra.mxu0 %v345_v23  ;;  %795 = vmatpush1.msra.mxu1 %v345_v23  ;;  %v331_v7 = vld [vmem:[%s1099_s28 + $0x50] sm:$0xff]  ;;  %v334_v9 = vld [vmem:[%s1099_s28 + $0x68] sm:$0xff]  ;;  %v325_v10 = vld [vmem:[%s1099_s28 + $0x20] sm:$0xff] }
  0x25   : > { %425 = vmatprep.subr.mxu0 %v344_v24  ;;  %764 = vmatprep.subr.mxu1 %v344_v24  ;;  %v333_v11 = vld [vmem:[%s1099_s28 + $0x60] sm:$0xff]  ;;  %v328_v12 = vld [vmem:[%s1099_s28 + $0x38] sm:$0xff]  ;;  %v327_v14 = vld [vmem:[%s1099_s28 + $0x30] sm:$0xff] }
  0x26   : > { %426 = vmatpush1.msra.mxu0 %v343_v25  ;;  %796 = vmatpush1.msra.mxu1 %v343_v25  ;;  %v336_v13 = vld [vmem:[%s1099_s28 + $0x78] sm:$0xff]  ;;  %v335_v15 = vld [vmem:[%s1099_s28 + $0x70] sm:$0xff]  ;;  %v565_v19 = vld [vmem:[%s1160_s2] sm:$0x3] }
  0x27   : > { %427 = vmatprep.subr.mxu0 %v342_v26  ;;  %765 = vmatprep.subr.mxu1 %v342_v26  ;;  %v570_v21 = vrot.slane %v565_v19, %v569_v18  ;;  %v574_v22 = vrot.slane %v565_v19, %v573_v20 }
  0x28   : > { %428 = vmatpush1.msra.mxu0 %v341_v27  ;;  %797 = vmatpush1.msra.mxu1 %v341_v27 }
  0x29   : > { %429 = vmatprep.subr.mxu0 %v340_v28  ;;  %766 = vmatprep.subr.mxu1 %v340_v28 }
  0x2a   : > { %430 = vmatpush1.msra.mxu0 %v339_v29  ;;  %798 = vmatpush1.msra.mxu1 %v339_v29 }
  0x2b   : > { %431 = vmatprep.subr.mxu0 %v338_v30  ;;  %767 = vmatprep.subr.mxu1 %v338_v30 }
  0x2c   : > { %432 = vmatpush1.msra.mxu0 %v337_v31  ;;  %799 = vmatpush1.msra.mxu1 %v337_v31 }
  0x2d   : > { %433 = vmatprep.subr.mxu0 %v400_v32  ;;  %768 = vmatprep.subr.mxu1 %v400_v32 }
  0x2e   : > { %434 = vmatpush2.msra.mxu0 %v399_v33  ;;  %800 = vmatpush2.msra.mxu1 %v399_v33 }
  0x2f   : > { %435 = vmatprep.subr.mxu0 %v398_v34  ;;  %769 = vmatprep.subr.mxu1 %v398_v34 }
  0x30   : > { %436 = vmatpush2.msra.mxu0 %v397_v35  ;;  %801 = vmatpush2.msra.mxu1 %v397_v35 }
  0x31   : > { %437 = vmatprep.subr.mxu0 %v396_v36  ;;  %770 = vmatprep.subr.mxu1 %v396_v36 }
  0x32   : > { %438 = vmatpush2.msra.mxu0 %v395_v37  ;;  %802 = vmatpush2.msra.mxu1 %v395_v37 }
  0x33   : > { %439 = vmatprep.subr.mxu0 %v394_v38  ;;  %771 = vmatprep.subr.mxu1 %v394_v38 }
  0x34   : > { %440 = vmatpush2.msra.mxu0 %v393_v39  ;;  %803 = vmatpush2.msra.mxu1 %v393_v39 }
  0x35   : > { %441 = vmatprep.subr.mxu0 %v392_v40  ;;  %772 = vmatprep.subr.mxu1 %v392_v40 }
  0x36   : > { %442 = vmatpush2.msra.mxu0 %v391_v41  ;;  %804 = vmatpush2.msra.mxu1 %v391_v41 }
  0x37   : > { %443 = vmatprep.subr.mxu0 %v390_v42  ;;  %773 = vmatprep.subr.mxu1 %v390_v42 }
  0x38   : > { %444 = vmatpush2.msra.mxu0 %v389_v43  ;;  %805 = vmatpush2.msra.mxu1 %v389_v43 }
  0x39   : > { %445 = vmatprep.subr.mxu0 %v388_v44  ;;  %774 = vmatprep.subr.mxu1 %v388_v44 }
  0x3a   : > { %446 = vmatpush2.msra.mxu0 %v387_v45  ;;  %806 = vmatpush2.msra.mxu1 %v387_v45 }
  0x3b   : > { %447 = vmatprep.subr.mxu0 %v386_v46  ;;  %775 = vmatprep.subr.mxu1 %v386_v46 }
  0x3c   : > { %448 = vmatpush2.msra.mxu0 %v385_v47  ;;  %807 = vmatpush2.msra.mxu1 %v385_v47 }
  0x3d   : > { %449 = vmatprep.subr.mxu0 %v384_v48  ;;  %776 = vmatprep.subr.mxu1 %v384_v48 }
  0x3e   : > { %450 = vmatpush2.msra.mxu0 %v383_v49  ;;  %808 = vmatpush2.msra.mxu1 %v383_v49 }
  0x3f   : > { %451 = vmatprep.subr.mxu0 %v382_v50  ;;  %777 = vmatprep.subr.mxu1 %v382_v50 }
  0x40   : > { %452 = vmatpush2.msra.mxu0 %v381_v51  ;;  %809 = vmatpush2.msra.mxu1 %v381_v51 }
  0x41   : > { %453 = vmatprep.subr.mxu0 %v380_v52  ;;  %778 = vmatprep.subr.mxu1 %v380_v52 }
  0x42   : > { %454 = vmatpush2.msra.mxu0 %v379_v53  ;;  %810 = vmatpush2.msra.mxu1 %v379_v53 }
  0x43   : > { %455 = vmatprep.subr.mxu0 %v378_v54  ;;  %779 = vmatprep.subr.mxu1 %v378_v54 }
  0x44   : > { %456 = vmatpush2.msra.mxu0 %v377_v55  ;;  %811 = vmatpush2.msra.mxu1 %v377_v55 }
  0x45   : > { %457 = vmatprep.subr.mxu0 %v376_v56  ;;  %780 = vmatprep.subr.mxu1 %v376_v56 }
  0x46   : > { %458 = vmatpush2.msra.mxu0 %v375_v57  ;;  %812 = vmatpush2.msra.mxu1 %v375_v57 }
  0x47   : > { %459 = vmatprep.subr.mxu0 %v374_v58  ;;  %781 = vmatprep.subr.mxu1 %v374_v58 }
  0x48   : > { %460 = vmatpush2.msra.mxu0 %v373_v59  ;;  %813 = vmatpush2.msra.mxu1 %v373_v59 }
  0x49   : > { %461 = vmatprep.subr.mxu0 %v372_v60  ;;  %782 = vmatprep.subr.mxu1 %v372_v60 }
  0x4a   : > { %462 = vmatpush2.msra.mxu0 %v371_v61  ;;  %814 = vmatpush2.msra.mxu1 %v371_v61 }
  0x4b   : > { %463 = vmatprep.subr.mxu0 %v370_v62  ;;  %783 = vmatprep.subr.mxu1 %v370_v62 }
  0x4c   : > { %464 = vmatpush2.msra.mxu0 %v369_v63  ;;  %815 = vmatpush2.msra.mxu1 %v369_v63 }
  0x4d   : > { %465 = vmatprep.mubr.f32.mxu0 %v322_v0  ;;  %489 = vmatprep.mubr.f32.mxu1 %v330_v1 }
  0x4e   : > { %466 = vmatmul.mubr.f32.vlgmr.msra.gmra.mxu0 %v321_v2  ;;  %490 = vmatmul.mubr.f32.vlgmr.msra.gmra.mxu1 %v329_v3 }
  0x4f   : > { %471 = vmatprep.mubr.f32.mxu0 %v324_v4  ;;  %495 = vmatprep.mubr.f32.mxu1 %v332_v5 }
  0x52   : > { %472 = vmatmul.mubr.f32.gmra.mxu0 %v323_v6  ;;  %496 = vmatmul.mubr.f32.gmra.mxu1 %v331_v7 }
  0x53   : > { %477 = vmatprep.mubr.f32.mxu0 %v326_v8  ;;  %501 = vmatprep.mubr.f32.mxu1 %v334_v9 }
  0x56   : > { %478 = vmatmul.mubr.f32.gmra.mxu0 %v325_v10  ;;  %502 = vmatmul.mubr.f32.gmra.mxu1 %v333_v11 }
  0x57   : > { %483 = vmatprep.mubr.f32.mxu0 %v328_v12  ;;  %507 = vmatprep.mubr.f32.mxu1 %v336_v13 }
  0x5a   : > { %484 = vmatmul.mubr.f32.gmra.mxu0 %v327_v14  ;;  %508 = vmatmul.mubr.f32.gmra.mxu1 %v335_v15 }
 0x10e   : > { %v467_v23 = vpop.f32.mrf.mxu0  ;;  %v491_v24 = vpop.f32.mrf.mxu1 }
 0x10f   : > { %v577_v25 = vadd.f32 %v570_v21, %v467_v23  ;;  %v585_v26 = vadd.f32 %v570_v21, %v491_v24 }
 0x110   : > { %v469_v27 = vpop.f32.mrf.mxu0  ;;  %v493_v28 = vpop.f32.mrf.mxu1 }
 0x111   : > { %593 = vst [vmem:[%s1131_s10] sm:$0xff] %v577_v25  ;;  %601 = vst [vmem:[%s1131_s10 + $0x40] sm:$0xff] %v585_v26  ;;  %v578_v29 = vadd.f32 %v574_v22, %v469_v27  ;;  %v586_v30 = vadd.f32 %v574_v22, %v493_v28 }
 0x112   : > { %v473_v31 = vpop.f32.mrf.mxu0  ;;  %v497_v32 = vpop.f32.mrf.mxu1 }
 0x113   : > { %594 = vst [vmem:[%s1131_s10 + $0x8] sm:$0xff] %v578_v29  ;;  %602 = vst [vmem:[%s1131_s10 + $0x48] sm:$0xff] %v586_v30  ;;  %v579_v33 = vadd.f32 %v570_v21, %v473_v31  ;;  %v587_v34 = vadd.f32 %v570_v21, %v497_v32 }
 0x114   : > { %v475_v35 = vpop.f32.mrf.mxu0  ;;  %v499_v36 = vpop.f32.mrf.mxu1 }
 0x115   : > { %595 = vst [vmem:[%s1131_s10 + $0x10] sm:$0xff] %v579_v33  ;;  %603 = vst [vmem:[%s1131_s10 + $0x50] sm:$0xff] %v587_v34  ;;  %v580_v37 = vadd.f32 %v574_v22, %v475_v35  ;;  %v588_v38 = vadd.f32 %v574_v22, %v499_v36 }
 0x116   : > { %v479_v39 = vpop.f32.mrf.mxu0  ;;  %v503_v40 = vpop.f32.mrf.mxu1 }
 0x117   : > { %596 = vst [vmem:[%s1131_s10 + $0x18] sm:$0xff] %v580_v37  ;;  %604 = vst [vmem:[%s1131_s10 + $0x58] sm:$0xff] %v588_v38  ;;  %v581_v41 = vadd.f32 %v570_v21, %v479_v39  ;;  %v589_v42 = vadd.f32 %v570_v21, %v503_v40 }
 0x118   : > { %v481_v43 = vpop.f32.mrf.mxu0  ;;  %v505_v44 = vpop.f32.mrf.mxu1 }
 0x119   : > { %597 = vst [vmem:[%s1131_s10 + $0x20] sm:$0xff] %v581_v41  ;;  %605 = vst [vmem:[%s1131_s10 + $0x60] sm:$0xff] %v589_v42  ;;  %v582_v45 = vadd.f32 %v574_v22, %v481_v43  ;;  %v590_v46 = vadd.f32 %v574_v22, %v505_v44 }
 0x11a   : > { %v485_v47 = vpop.f32.mrf.mxu0  ;;  %v509_v48 = vpop.f32.mrf.mxu1 }
 0x11b   : > { %598 = vst [vmem:[%s1131_s10 + $0x28] sm:$0xff] %v582_v45  ;;  %606 = vst [vmem:[%s1131_s10 + $0x68] sm:$0xff] %v590_v46  ;;  %v583_v49 = vadd.f32 %v570_v21, %v485_v47  ;;  %v591_v50 = vadd.f32 %v570_v21, %v509_v48 }
 0x11c   : > { %v487_v51 = vpop.f32.mrf.mxu0  ;;  %v511_v52 = vpop.f32.mrf.mxu1 }
 0x11d   : > { %599 = vst [vmem:[%s1131_s10 + $0x30] sm:$0xff] %v583_v49  ;;  %607 = vst [vmem:[%s1131_s10 + $0x70] sm:$0xff] %v591_v50  ;;  %v584_v53 = vadd.f32 %v574_v22, %v487_v51  ;;  %v592_v54 = vadd.f32 %v574_v22, %v511_v52 }
 0x11f   : > { %600 = vst [vmem:[%s1131_s10 + $0x38] sm:$0xff] %v584_v53  ;;  %608 = vst [vmem:[%s1131_s10 + $0x78] sm:$0xff] %v592_v54 }
 0x120 PF: > { %s13_s14 = sadd.s32 1, %s862_s14   ;;  %s1162_s12 = smov %s858_s13 }
 0x121   : > { %p10_p5 = scmp.ge.s32.totalorder %s13_s14, 4   ;;  %s1163_s13 = smov %s1165_s15 }
 0x123   :  { %12 = sbr.rel (!%p10_p5) target bundleno = 2 (0x2), region = 76 }

// kernel: cca2_forward.5
= control target key start
LH: loop header
LB: loop body
LE: loop exit
PB: predicated region body
PF: predicated region fallthrough
CT: control target
= control target key end

     0   :  { %s3272_s0 = inlined_call_operand.vmem [shape: f32[2,64,256], index: 0, kind: input, shape index: {}]   ;;  %s3273_s1 = inlined_call_operand.vmem [shape: f32[2,384,160], index: 1, kind: input, shape index: {}]   ;;  %s3274_s2 = inlined_call_operand.vmem [shape: f32[160,512], index: 2, kind: input, shape index: {}, may-alias: {2,3}]   ;;  %s3275_s3 = inlined_call_operand.vmem [shape: f32[160,512], index: 3, kind: input, shape index: {}, may-alias: {2,3}]   ;;  %s3276_s4 = inlined_call_operand.vmem [shape: f32[1,512], index: 4, kind: input, shape index: {}, may-alias: {4,5}]   ;;  %s3277_s5 = inlined_call_operand.vmem [shape: f32[1,512], index: 5, kind: input, shape index: {}, may-alias: {4,5}]   ;;  %s3278_s6 = inlined_call_operand.vmem [shape: f32[2,64,256], index: 6, kind: output, shape index: {}]  }
   0x1   :  { %3284 = sst [smem:[#allocation15_spill]] %s3272_s0 }
   0x2   :  { %3285 = sst [smem:[#allocation16_spill]] %s3273_s1 }
   0x3   :  { %3286 = sst [smem:[#allocation17_spill]] %s3274_s2 }
   0x4   :  { %3287 = sst [smem:[#allocation18_spill]] %s3275_s3 }
   0x5   :  { %3288 = sst [smem:[#allocation19_spill]] %s3276_s4 }
   0x6   :  { %3289 = sst [smem:[#allocation20_spill]] %s3277_s5 }
   0x7   :  { %3290 = sst [smem:[#allocation21_spill]] %s3278_s6 }
   0x8   :  { %s2453_s21 = smov 0   ;;  %s2455_s22 = smov 0  }
   0x9   :  { %s2457_s23 = smov 0   ;;  %s2459_s24 = smov 0  }
   0xa   :  { %s2461_s25 = smov 0   ;;  %s2463_s26 = smov 0  }
   0xb   :  { %s2465_s27 = smov 0   ;;  %s2467_s28 = smov 0  }
   0xc   :  { %s2469_s29 = smov 0   ;;  %s2471_s30 = smov 0  }
   0xd   :  { %s2473_s7 = smov 0   ;;  %s2475_s8 = smov 0  }
   0xe   :  { %s2477_s9 = smov 0  }
   0xf LB: > { %3291 = sst [smem:[#allocation9_spill]] %s2391_s28  ;;  %s31_s11 = sadd.s32 1, %s2399_s30  ;;  %s2411_s9 = sphi %s2477_s9, %s16_s9   ;;  %s2407_s8 = sphi %s2475_s8, %s3318_s8   ;;  %s2403_s7 = sphi %s2473_s7, %s3328_s7   ;;  %s2399_s30 = sphi %s2471_s30, %s3316_s30   ;;  %s2395_s29 = sphi %s2469_s29, %s3327_s29   ;;  %s2391_s28 = sphi %s2467_s28, %s3326_s28   ;;  %s2387_s27 = sphi %s2465_s27, %s3314_s27   ;;  %s2383_s26 = sphi %s2463_s26, %s3325_s26   ;;  %s2379_s25 = sphi %s2461_s25, %s3324_s25   ;;  %s2375_s24 = sphi %s2459_s24, %s3323_s24   ;;  %s2371_s23 = sphi %s2457_s23, %s3322_s23   ;;  %s2367_s22 = sphi %s2455_s22, %s3321_s22   ;;  %s2363_s21 = sphi %s2453_s21, %s3320_s21  }
  0x10   : > { %3292 = sst [smem:[#allocation10_spill]] %s2399_s30  ;;  %p32_p0 = scmp.ge.s32.totalorder %s31_s11, 3 }
  0x11   : > { %3293 = sst [smem:[#allocation11_spill]] %s2407_s8  ;;  %s38_s12 = sadd.s32 1, %s2403_s7 }
  0x12   : > { %s42_s13 = sadd.s32 1, %s2407_s8  ;;  %s53_s14 = sadd.s32 1, %s2383_s26 }
  0x13   : > { %s3330_s11 = smov (%p32_p0, %s31_s11), 0  ;;  %s3332_s12 = smov (!%p32_p0, %s38_s12), %s2403_s7 }
  0x14   : > { %3294 = sst [smem:[#allocation12_spill]] %s3330_s11  ;;  %p60_p1 = scmp.ne.s32.totalorder %s2383_s26, %s2379_s25 }
  0x15   : > { %p61_p2 = scmp.eq.s32.totalorder %s2411_s9, 0  ;;  %p40_p3 = scmp.ge.s32.totalorder %s3332_s12, 2 }
  0x16   : > { %s107_s15 = sadd.s32 1, %s2375_s24  ;;  %p114_p5 = scmp.ne.s32.totalorder %s2375_s24, %s2371_s23 }
  0x17   : > { %p2535_p4 = por %p61_p2, %p60_p1  ;;  %s3334_s12 = smov (%p40_p3, %s3332_s12), 0 }
  0x18   : > { %3296 = sst [smem:[#allocation13_spill]] %s3334_s12  ;;  %s3336_s13 = smov (!%p40_p3, %s42_s13), %s2407_s8 }
  0x19   : > { %s49_s17 = ssub.s32 %s2403_s7, %s3334_s12  ;;  %p2548_p6 = por %p114_p5, %p61_p2 }
  0x1a   : > { %p44_p7 = scmp.ge.s32.totalorder %s3336_s13, 2  ;;  %p105_p8 = scmp.eq.s32.totalorder %s49_s17, 0 }
  0x1b   : > { %s130_s19 = sadd.s32 2, %s2403_s7  ;;  %s131_s20 = sadd.s32 2, %s3334_s12 }
  0x1c   : > { %s3338_s13 = smov (%p44_p7, %s3336_s13), 0  ;;  %s132_s30 = ssub.s32 %s130_s19, %s131_s20 }
  0x1d   : > { %3298 = sst [smem:[#allocation14_spill]] %s3338_s13  ;;  %s46_s11 = ssub.s32 %s2407_s8, %s3338_s13 }
  0x1e   : > { %s2557_s10 = scalar_select %p105_p8, %s2375_s24, %s107_s15  }
  0x1f   : > { %s50_s6 = sor.u32 %s49_s17, %s46_s11  ;;  %p133_p9 = scmp.eq.s32.totalorder %s132_s30, 0 }
  0x20   : > { %p51_p10 = scmp.eq.s32.totalorder %s50_s6, 0  ;;  %s135_s5 = sadd.s32 1, %s2367_s22 }
  0x21   : > { %s2563_s4 = scalar_select %p133_p9, %s2367_s22, %s135_s5  }
  0x22   : > { %s2566_s1 = scalar_select %p51_p10, %s2383_s26, %s53_s14  }
  0x23   : > { %p142_p11 = scmp.ne.s32.totalorder %s2367_s22, %s2363_s21  ;;  %s3299_s28 = sadd.s32 4294967295, %s2411_s9  }
  0x24   : > { %p230_p12 = scmp.eq.s32.totalorder %s3299_s28, 11  ;;  %p1934_p3 = scmp.ge.s32.totalorder %s2411_s9, 12 }
  0x25   : > { %p2574_p13 = por %p142_p11, %p61_p2 }
  0x26   : > { %p2581_p0 = por %p230_p12, %p60_p1  ;;  %252 = sbr.rel (%p1934_p3) target bundleno = 117 (0x75), region = 16 }
  0x2b   : > { %255 = sbr.rel (!%p2535_p4) target bundleno = 57 (0x39), region = 20  ;;  %s257_s5 = sand.u32 (%p2535_p4), 1, %s2383_s26  }
  0x2c   : > { %s1936_s6 = sshll.u32 (%p2535_p4), %s2407_s8, 4  ;;  %s1935_s28 = sshll.u32 (%p2535_p4), %s257_s5, 6 }
  0x2d   : > { %s264_s30 = sadd.s32 (%p2535_p4), %s2403_s7, %s1936_s6  ;;  %s3302_s0 = sld [smem:[#allocation15_spill]] (%p2535_p4) }
  0x2e   : > { %s1937_s11 = sshll.u32 (%p2535_p4), %s264_s30, 3  ;;  %s259_s20 = scalar_lea.vmem (%p2535_p4), [#allocation5], %s1935_s28 }
  0x33   : > { %s266_s19 = scalar_lea.vmem %s3302_s0, %s1937_s11 }
  0x34   : > { %v309_v0 = vld [vmem:[%s266_s19] sm:$0xff]  ;;  %v311_v1 = vld [vmem:[%s266_s19 + $0x10] sm:$0xff] }
  0x35   : > { %v313_v2 = vld [vmem:[%s266_s19 + $0x20] sm:$0xff]  ;;  %310 = vst [vmem:[%s259_s20] sm:$0xff] %v309_v0  ;;  %312 = vst [vmem:[%s259_s20 + $0x8] sm:$0xff] %v311_v1  ;;  %v315_v3 = vld [vmem:[%s266_s19 + $0x30] sm:$0xff] }
  0x36   : > { %314 = vst [vmem:[%s259_s20 + $0x10] sm:$0xff] %v313_v2  ;;  %v317_v4 = vld [vmem:[%s266_s19 + $0x40] sm:$0xff]  ;;  %v319_v5 = vld [vmem:[%s266_s19 + $0x50] sm:$0xff]  ;;  %316 = vst [vmem:[%s259_s20 + $0x18] sm:$0xff] %v315_v3 }
  0x37   : > { %318 = vst [vmem:[%s259_s20 + $0x20] sm:$0xff] %v317_v4  ;;  %320 = vst [vmem:[%s259_s20 + $0x28] sm:$0xff] %v319_v5  ;;  %v321_v6 = vld [vmem:[%s266_s19 + $0x60] sm:$0xff]  ;;  %v323_v7 = vld [vmem:[%s266_s19 + $0x70] sm:$0xff] }
  0x38   : > { %322 = vst [vmem:[%s259_s20 + $0x30] sm:$0xff] %v321_v6  ;;  %324 = vst [vmem:[%s259_s20 + $0x38] sm:$0xff] %v323_v7 }
  0x39 PF: > { %344 = sbr.rel (!%p2548_p6) target bundleno = 87 (0x57), region = 62  ;;  %s346_s16 = sand.u32 (%p2548_p6), 1, %s2375_s24  }
  0x3a   : > { %s1938_s5 = sshll.u32 (%p2548_p6), %s2403_s7, 3  ;;  %s2143_s6 = smul.u32 (%p2548_p6), 160, %s346_s16 }
  0x3b   : > { %s3303_s2 = sld [smem:[#allocation17_spill]] (%p2548_p6) }
  0x3c   : > { %s2609_s18 = scalar_lea.vmem (%p2548_p6), [#allocation6], %s2143_s6 }
  0x41   : > { %s2601_s11 = scalar_lea.vmem %s3303_s2, %s1938_s5 }
  0x42   : > { %v417_v8 = vld [vmem:[%s2601_s11] sm:$0xff] }
  0x43   : > { %v419_v9 = vld [vmem:[%s2601_s11 + $0x20] sm:$0xff]  ;;  %418 = vst [vmem:[%s2609_s18] sm:$0xff] %v417_v8 }
  0x44   : > { %v421_v10 = vld [vmem:[%s2601_s11 + $0x40] sm:$0xff]  ;;  %420 = vst [vmem:[%s2609_s18 + $0x8] sm:$0xff] %v419_v9 }
  0x45   : > { %v423_v11 = vld [vmem:[%s2601_s11 + $0x60] sm:$0xff]  ;;  %422 = vst [vmem:[%s2609_s18 + $0x10] sm:$0xff] %v421_v10 }
  0x46   : > { %v425_v12 = vld [vmem:[%s2601_s11 + $0x80] sm:$0xff]  ;;  %424 = vst [vmem:[%s2609_s18 + $0x18] sm:$0xff] %v423_v11 }
  0x47   : > { %v427_v13 = vld [vmem:[%s2601_s11 + $0xa0] sm:$0xff]  ;;  %426 = vst [vmem:[%s2609_s18 + $0x20] sm:$0xff] %v425_v12 }
  0x48   : > { %428 = vst [vmem:[%s2609_s18 + $0x28] sm:$0xff] %v427_v13  ;;  %v429_v14 = vld [vmem:[%s2601_s11 + $0xc0] sm:$0xff] }
  0x49   : > { %v431_v15 = vld [vmem:[%s2601_s11 + $0xe0] sm:$0xff]  ;;  %430 = vst [vmem:[%s2609_s18 + $0x30] sm:$0xff] %v429_v14 }
  0x4a   : > { %v433_v16 = vld [vmem:[%s2601_s11 + $0x100] sm:$0xff]  ;;  %432 = vst [vmem:[%s2609_s18 + $0x38] sm:$0xff] %v431_v15 }
  0x4b   : > { %434 = vst [vmem:[%s2609_s18 + $0x40] sm:$0xff] %v433_v16  ;;  %v435_v17 = vld [vmem:[%s2601_s11 + $0x120] sm:$0xff] }
  0x4c   : > { %v437_v18 = vld [vmem:[%s2601_s11 + $0x140] sm:$0xff]  ;;  %436 = vst [vmem:[%s2609_s18 + $0x48] sm:$0xff] %v435_v17 }
  0x4d   : > { %v439_v19 = vld [vmem:[%s2601_s11 + $0x160] sm:$0xff]  ;;  %438 = vst [vmem:[%s2609_s18 + $0x50] sm:$0xff] %v437_v18 }
  0x4e   : > { %440 = vst [vmem:[%s2609_s18 + $0x58] sm:$0xff] %v439_v19  ;;  %v441_v20 = vld [vmem:[%s2601_s11 + $0x180] sm:$0xff] }
  0x4f   : > { %v443_v21 = vld [vmem:[%s2601_s11 + $0x1a0] sm:$0xff]  ;;  %442 = vst [vmem:[%s2609_s18 + $0x60] sm:$0xff] %v441_v20 }
  0x50   : > { %v445_v22 = vld [vmem:[%s2601_s11 + $0x1c0] sm:$0xff]  ;;  %444 = vst [vmem:[%s2609_s18 + $0x68] sm:$0xff] %v443_v21 }
  0x51   : > { %446 = vst [vmem:[%s2609_s18 + $0x70] sm:$0xff] %v445_v22  ;;  %v447_v23 = vld [vmem:[%s2601_s11 + $0x1e0] sm:$0xff] }
  0x52   : > { %v449_v24 = vld [vmem:[%s2601_s11 + $0x200] sm:$0xff]  ;;  %448 = vst [vmem:[%s2609_s18 + $0x78] sm:$0xff] %v447_v23 }
  0x53   : > { %v451_v25 = vld [vmem:[%s2601_s11 + $0x220] sm:$0xff]  ;;  %450 = vst [vmem:[%s2609_s18 + $0x80] sm:$0xff] %v449_v24 }
  0x54   : > { %452 = vst [vmem:[%s2609_s18 + $0x88] sm:$0xff] %v451_v25  ;;  %v453_v26 = vld [vmem:[%s2601_s11 + $0x240] sm:$0xff] }
  0x55   : > { %v455_v27 = vld [vmem:[%s2601_s11 + $0x260] sm:$0xff]  ;;  %454 = vst [vmem:[%s2609_s18 + $0x90] sm:$0xff] %v453_v26 }
  0x56   : > { %456 = vst [vmem:[%s2609_s18 + $0x98] sm:$0xff] %v455_v27 }
  0x57 PF: > { %462 = sbr.rel (!%p2574_p13) target bundleno = 117 (0x75), region = 100  ;;  %s464_s14 = sand.u32 (%p2574_p13), 1, %s2367_s22  }
  0x58   : > { %s1939_s17 = sshll.u32 (%p2574_p13), %s2403_s7, 3  ;;  %s2144_s19 = smul.u32 (%p2574_p13), 160, %s464_s14 }
  0x59   : > { %s3304_s3 = sld [smem:[#allocation18_spill]] (%p2574_p13) }
  0x5a   : > { %s2660_s12 = scalar_lea.vmem (%p2574_p13), [#allocation7], %s2144_s19 }
  0x5f   : > { %s2652_s5 = scalar_lea.vmem %s3304_s3, %s1939_s17 }
  0x60   : > { %v1940_v28 = vld [vmem:[%s2652_s5 + $0x10] sm:$0xff] }
  0x61   : > { %v1941_v29 = vld [vmem:[%s2652_s5 + $0x30] sm:$0xff]  ;;  %537 = vst [vmem:[%s2660_s12] sm:$0xff] %v1940_v28 }
  0x62   : > { %v1942_v30 = vld [vmem:[%s2652_s5 + $0x50] sm:$0xff]  ;;  %539 = vst [vmem:[%s2660_s12 + $0x8] sm:$0xff] %v1941_v29 }
  0x63   : > { %v1943_v31 = vld [vmem:[%s2652_s5 + $0x70] sm:$0xff]  ;;  %541 = vst [vmem:[%s2660_s12 + $0x10] sm:$0xff] %v1942_v30 }
  0x64   : > { %v1944_v32 = vld [vmem:[%s2652_s5 + $0x90] sm:$0xff]  ;;  %543 = vst [vmem:[%s2660_s12 + $0x18] sm:$0xff] %v1943_v31 }
  0x65   : > { %v1945_v33 = vld [vmem:[%s2652_s5 + $0xb0] sm:$0xff]  ;;  %545 = vst [vmem:[%s2660_s12 + $0x20] sm:$0xff] %v1944_v32 }
  0x66   : > { %547 = vst [vmem:[%s2660_s12 + $0x28] sm:$0xff] %v1945_v33  ;;  %v1946_v34 = vld [vmem:[%s2652_s5 + $0xd0] sm:$0xff] }
  0x67   : > { %v1947_v35 = vld [vmem:[%s2652_s5 + $0xf0] sm:$0xff]  ;;  %549 = vst [vmem:[%s2660_s12 + $0x30] sm:$0xff] %v1946_v34 }
  0x68   : > { %v1948_v36 = vld [vmem:[%s2652_s5 + $0x110] sm:$0xff]  ;;  %551 = vst [vmem:[%s2660_s12 + $0x38] sm:$0xff] %v1947_v35 }
  0x69   : > { %553 = vst [vmem:[%s2660_s12 + $0x40] sm:$0xff] %v1948_v36  ;;  %v1949_v37 = vld [vmem:[%s2652_s5 + $0x130] sm:$0xff] }
  0x6a   : > { %v1950_v38 = vld [vmem:[%s2652_s5 + $0x150] sm:$0xff]  ;;  %555 = vst [vmem:[%s2660_s12 + $0x48] sm:$0xff] %v1949_v37 }
  0x6b   : > { %v1951_v39 = vld [vmem:[%s2652_s5 + $0x170] sm:$0xff]  ;;  %557 = vst [vmem:[%s2660_s12 + $0x50] sm:$0xff] %v1950_v38 }
  0x6c   : > { %559 = vst [vmem:[%s2660_s12 + $0x58] sm:$0xff] %v1951_v39  ;;  %v1952_v40 = vld [vmem:[%s2652_s5 + $0x190] sm:$0xff] }
  0x6d   : > { %v1953_v41 = vld [vmem:[%s2652_s5 + $0x1b0] sm:$0xff]  ;;  %561 = vst [vmem:[%s2660_s12 + $0x60] sm:$0xff] %v1952_v40 }
  0x6e   : > { %v1954_v42 = vld [vmem:[%s2652_s5 + $0x1d0] sm:$0xff]  ;;  %563 = vst [vmem:[%s2660_s12 + $0x68] sm:$0xff] %v1953_v41 }
  0x6f   : > { %565 = vst [vmem:[%s2660_s12 + $0x70] sm:$0xff] %v1954_v42  ;;  %v1955_v43 = vld [vmem:[%s2652_s5 + $0x1f0] sm:$0xff] }
  0x70   : > { %v1956_v44 = vld [vmem:[%s2652_s5 + $0x210] sm:$0xff]  ;;  %567 = vst [vmem:[%s2660_s12 + $0x78] sm:$0xff] %v1955_v43 }
  0x71   : > { %v1957_v45 = vld [vmem:[%s2652_s5 + $0x230] sm:$0xff]  ;;  %569 = vst [vmem:[%s2660_s12 + $0x80] sm:$0xff] %v1956_v44 }
  0x72   : > { %571 = vst [vmem:[%s2660_s12 + $0x88] sm:$0xff] %v1957_v45  ;;  %v1958_v46 = vld [vmem:[%s2652_s5 + $0x250] sm:$0xff] }
  0x73   : > { %v1959_v47 = vld [vmem:[%s2652_s5 + $0x270] sm:$0xff]  ;;  %573 = vst [vmem:[%s2660_s12 + $0x90] sm:$0xff] %v1958_v46 }
  0x74   : > { %575 = vst [vmem:[%s2660_s12 + $0x98] sm:$0xff] %v1959_v47 }
  0x75 PF: > { %p1960_p1 = scmp.ge.s32.totalorder %s2411_s9, 1  ;;  %p594_p2 = scmp.lt.s32.totalorder %s2411_s9, 13 }
  0x77   : > { %p595_p4 = pnand %p1960_p1, %p594_p2 }
  0x78   : > { %s3305_s6 = sld [smem:[#allocation9_spill]] (!%p595_p4)  ;;  %s601_s28 = sand.u32 (!%p595_p4), 1, %s2379_s25  }
  0x79   : > { %598 = sbr.rel (%p595_p4) target bundleno = 1386 (0x56a), region = 146  ;;  %s608_s30 = sand.u32 (!%p595_p4), 1, %s2371_s23  }
  0x7a   : > { %s1961_s11 = sshll.u32 (!%p595_p4), %s601_s28, 6  ;;  %s2145_s18 = smul.u32 (!%p595_p4), 160, %s608_s30 }
  0x7b   : > { %s615_s14 = sand.u32 (!%p595_p4), 1, %s2363_s21   ;;  %s1963_s19 = sshll.u32 (!%p595_p4), %s2387_s27, 4 }
  0x7c   : > { %s2146_s17 = smul.u32 (!%p595_p4), 160, %s615_s14  ;;  %p670_p5 = scmp.lt.s32.totalorder (!%p595_p4), %s2395_s29, 1 }
  0x7d   : > { %p672_p6 = scmp.lt.s32.totalorder (!%p595_p4), %s1963_s19, 47  ;;  %s3306_s23 = sld [smem:[#allocation16_spill]] (!%p595_p4) }
  0x7e   : > { %s671_s20 = scalar_select %p670_p5, %s2395_s29, 1 }
  0x7f   : > { %s3340_s19 = smov (!%p672_p6, %s1963_s19), 47  ;;  %s684_s5 = sadd.s32 2, %s3305_s6 }
  0x80   : > { %s2147_s16 = smul.u32 96, %s671_s20  ;;  %s1964_s12 = sshll.u32 %s3340_s19, 1 }
  0x81   : > { %p681_p7 = scmp.lt.s32.totalorder %s3305_s6, 3  ;;  %p685_p8 = scmp.lt.s32.totalorder %s684_s5, 3 }
  0x82   : > { %s676_s0 = sadd.s32 %s2147_s16, %s1964_s12  ;;  %s3307_s14 = sld [smem:[#allocation19_spill]] }
  0x83   : > { %s1965_s2 = sshll.u32 %s676_s0, 3  ;;  %s3342_s6 = smov (!%p681_p7, %s3305_s6), 3 }
  0x84   : > { %s2709_s28 = scalar_lea.vmem %s3306_s23, %s1965_s2  ;;  %s3344_s5 = smov (!%p685_p8, %s684_s5), 3 }
  0x85   : > { %s3308_s16 = sld [smem:[#allocation20_spill]]  ;;  %s2724_s0 = scalar_lea.vmem [#allocation5], %s1961_s11 }
  0x86   : > { %s2726_s8 = scalar_lea.vmem [#allocation6], %s2145_s18  ;;  %s2728_s2 = scalar_lea.vmem [#allocation7], %s2146_s17 }
  0x87   : > { %s2730_s3 = scalar_lea.vmem [#allocation8], %s1961_s11  ;;  %p1966_p9 = scmp.ne.s32.totalorder %s2387_s27, 0 }
  0x88   : > { %s683_s20 = scalar_lea.vmem %s3307_s14, %s3342_s6 }
  0x89   : > { %693 = sbr.rel (%p1966_p9) target bundleno = 155 (0x9b), region = 162 }
  0x8b   : > { %s687_s12 = scalar_lea.vmem %s3308_s16, %s3344_s5 }
  0x8e   : > { %vm694_vm0 = vcmask 7168   ;;  %v2413_v48 = vmov -inf   ;;  %v2414_v49 = vmov 0.0  }
  0x8f   : > { %695 = vst.msk [vmem:[#allocation2] sm:$0xff] %vm694_vm0, %v2413_v48  ;;  %696 = vst.msk [vmem:[#allocation2 + $0x8] sm:$0xff] %vm694_vm0, %v2413_v48 }
  0x90   : > { %697 = vst.msk [vmem:[#allocation2 + $0x10] sm:$0xff] %vm694_vm0, %v2413_v48  ;;  %698 = vst.msk [vmem:[#allocation2 + $0x18] sm:$0xff] %vm694_vm0, %v2413_v48 }
  0x91   : > { %699 = vst.msk [vmem:[#allocation2 + $0x20] sm:$0xff] %vm694_vm0, %v2413_v48  ;;  %700 = vst.msk [vmem:[#allocation2 + $0x28] sm:$0xff] %vm694_vm0, %v2413_v48 }
  0x92   : > { %701 = vst.msk [vmem:[#allocation2 + $0x30] sm:$0xff] %vm694_vm0, %v2413_v48  ;;  %702 = vst.msk [vmem:[#allocation2 + $0x38] sm:$0xff] %vm694_vm0, %v2413_v48 }
  0x93   : > { %703 = vst.msk [vmem:[#allocation3] sm:$0xff] %vm694_vm0, %v2414_v49  ;;  %704 = vst.msk [vmem:[#allocation3 + $0x8] sm:$0xff] %vm694_vm0, %v2414_v49 }
  0x94   : > { %705 = vst.msk [vmem:[#allocation3 + $0x10] sm:$0xff] %vm694_vm0, %v2414_v49  ;;  %706 = vst.msk [vmem:[#allocation3 + $0x18] sm:$0xff] %vm694_vm0, %v2414_v49 }
  0x95   : > { %707 = vst.msk [vmem:[#allocation3 + $0x20] sm:$0xff] %vm694_vm0, %v2414_v49  ;;  %708 = vst.msk [vmem:[#allocation3 + $0x28] sm:$0xff] %vm694_vm0, %v2414_v49 }
  0x96   : > { %709 = vst.msk [vmem:[#allocation3 + $0x30] sm:$0xff] %vm694_vm0, %v2414_v49  ;;  %710 = vst.msk [vmem:[#allocation3 + $0x38] sm:$0xff] %vm694_vm0, %v2414_v49 }
  0x97   : > { %711 = vst [vmem:[#allocation4 + $0x30] sm:$0xff] %v2414_v49  ;;  %712 = vst [vmem:[#allocation4] sm:$0xff] %v2414_v49 }
  0x98   : > { %713 = vst [vmem:[#allocation4 + $0x18] sm:$0xff] %v2414_v49  ;;  %714 = vst [vmem:[#allocation4 + $0x10] sm:$0xff] %v2414_v49 }
  0x99   : > { %715 = vst [vmem:[#allocation4 + $0x8] sm:$0xff] %v2414_v49  ;;  %716 = vst [vmem:[#allocation4 + $0x20] sm:$0xff] %v2414_v49 }
  0x9a   : > { %717 = vst [vmem:[#allocation4 + $0x28] sm:$0xff] %v2414_v49  ;;  %718 = vst [vmem:[#allocation4 + $0x38] sm:$0xff] %v2414_v49 }
  0x9b PF: > { %v766_v50 = vld [vmem:[%s2726_s8 + $0x78] sm:$0xff]  ;;  %v2415_v51 = vmov 0.0   ;;  %v765_v52 = vld [vmem:[%s2726_s8 + $0x70] sm:$0xff]  ;;  %v764_v53 = vld [vmem:[%s2726_s8 + $0x68] sm:$0xff]  ;;  %vm778_vm1 = vcmask 261120   ;;  %vm1417_vm2 = vcmask 7168  }
  0x9c   : > { %827 = vmatprep.subr.mxu0 %v2415_v51  ;;  %999 = vmatprep.subr.mxu1 %v2415_v51  ;;  %v763_v54 = vld [vmem:[%s2726_s8 + $0x60] sm:$0xff]  ;;  %v720_v55 = vld [vmem:[%s2709_s28 + $0x8] sm:$0xff]  ;;  %v762_v56 = vld [vmem:[%s2726_s8 + $0x58] sm:$0xff]  ;;  %p2001_p10 = scmp.ne.s32.totalorder %s2387_s27, 2 }
  0x9d   : > { %828 = vmatpush1.msra.mxu0 %v766_v50  ;;  %1968 = vmatprep.mubr.msk.f32.mxu0 %vm778_vm1, %v720_v55  ;;  %v761_v57 = vld [vmem:[%s2726_s8 + $0x50] sm:$0xff]  ;;  %v760_v58 = vld [vmem:[%s2726_s8 + $0x48] sm:$0xff]  ;;  %v759_v59 = vld [vmem:[%s2726_s8 + $0x40] sm:$0xff] }
  0x9e   : > { %829 = vmatprep.subr.mxu0 %v2415_v51  ;;  %1985 = vmatprep.mubr.msk.f32.mxu1 %vm778_vm1, %v720_v55  ;;  %v758_v60 = vld [vmem:[%s2726_s8 + $0x38] sm:$0xff]  ;;  %v757_v61 = vld [vmem:[%s2726_s8 + $0x30] sm:$0xff]  ;;  %v756_v62 = vld [vmem:[%s2726_s8 + $0x28] sm:$0xff] }
  0x9f   : > { %830 = vmatpush1.msra.mxu0 %v765_v52  ;;  %v755_v63 = vld [vmem:[%s2726_s8 + $0x20] sm:$0xff]  ;;  %v754_v0 = vld [vmem:[%s2726_s8 + $0x18] sm:$0xff]  ;;  %v753_v1 = vld [vmem:[%s2726_s8 + $0x10] sm:$0xff] }
  0xa0   : > { %831 = vmatprep.subr.mxu0 %v2415_v51  ;;  %v752_v2 = vld [vmem:[%s2726_s8 + $0x8] sm:$0xff]  ;;  %v751_v3 = vld [vmem:[%s2726_s8] sm:$0xff]  ;;  %v770_v4 = vld [vmem:[%s2726_s8 + $0x98] sm:$0xff] }
  0xa1   : > { %832 = vmatpush1.msra.mxu0 %v764_v53  ;;  %v769_v5 = vld [vmem:[%s2726_s8 + $0x90] sm:$0xff]  ;;  %v768_v6 = vld [vmem:[%s2726_s8 + $0x88] sm:$0xff]  ;;  %v767_v7 = vld [vmem:[%s2726_s8 + $0x80] sm:$0xff] }
  0xa2   : > { %833 = vmatprep.subr.mxu0 %v2415_v51  ;;  %v2793_v8 = vld [vmem:[%s2709_s28] sm:$0xff]  ;;  %v2797_v9 = vld [vmem:[%s2709_s28 + $0x18] sm:$0xff]  ;;  %v2803_v10 = vld [vmem:[%s2709_s28 + $0x10] sm:$0xff] }
  0xa3   : > { %834 = vmatpush1.msra.mxu0 %v763_v54  ;;  %v2806_v11 = vld [vmem:[%s2709_s28 + $0x28] sm:$0xff]  ;;  %v2812_v12 = vld [vmem:[%s2709_s28 + $0x20] sm:$0xff]  ;;  %v2815_v13 = vld [vmem:[%s2709_s28 + $0x38] sm:$0xff] }
  0xa4   : > { %835 = vmatprep.subr.mxu0 %v2415_v51  ;;  %v2821_v14 = vld [vmem:[%s2709_s28 + $0x30] sm:$0xff]  ;;  %v2824_v15 = vld [vmem:[%s2709_s28 + $0x48] sm:$0xff]  ;;  %v2830_v16 = vld [vmem:[%s2709_s28 + $0x40] sm:$0xff] }
  0xa5   : > { %836 = vmatpush1.msra.mxu0 %v762_v56  ;;  %v2833_v17 = vld [vmem:[%s2709_s28 + $0x58] sm:$0xff]  ;;  %v2839_v18 = vld [vmem:[%s2709_s28 + $0x50] sm:$0xff]  ;;  %v2842_v19 = vld [vmem:[%s2709_s28 + $0x68] sm:$0xff] }
  0xa6   : > { %837 = vmatprep.subr.mxu0 %v2415_v51  ;;  %v2848_v20 = vld [vmem:[%s2709_s28 + $0x60] sm:$0xff]  ;;  %v2851_v21 = vld [vmem:[%s2709_s28 + $0x78] sm:$0xff]  ;;  %v2857_v22 = vld [vmem:[%s2709_s28 + $0x70] sm:$0xff] }
  0xa7   : > { %838 = vmatpush1.msra.mxu0 %v761_v57  ;;  %v2860_v23 = vld [vmem:[%s2709_s28 + $0x88] sm:$0xff]  ;;  %v2866_v24 = vld [vmem:[%s2709_s28 + $0x80] sm:$0xff]  ;;  %v2869_v25 = vld [vmem:[%s2709_s28 + $0x98] sm:$0xff] }
  0xa8   : > { %839 = vmatprep.subr.mxu0 %v2415_v51  ;;  %v2875_v26 = vld [vmem:[%s2709_s28 + $0x90] sm:$0xff]  ;;  %v2878_v27 = vld [vmem:[%s2709_s28 + $0xa8] sm:$0xff]  ;;  %v2884_v28 = vld [vmem:[%s2709_s28 + $0xa0] sm:$0xff] }
  0xa9   : > { %840 = vmatpush1.msra.mxu0 %v760_v58  ;;  %v2887_v29 = vld [vmem:[%s2709_s28 + $0xb8] sm:$0xff]  ;;  %v2893_v30 = vld [vmem:[%s2709_s28 + $0xb0] sm:$0xff]  ;;  %v2896_v31 = vld [vmem:[%s2709_s28 + $0xc8] sm:$0xff] }
  0xaa   : > { %841 = vmatprep.subr.mxu0 %v2415_v51  ;;  %v2902_v32 = vld [vmem:[%s2709_s28 + $0xc0] sm:$0xff]  ;;  %v2905_v33 = vld [vmem:[%s2709_s28 + $0xd8] sm:$0xff]  ;;  %v2911_v34 = vld [vmem:[%s2709_s28 + $0xd0] sm:$0xff] }
  0xab   : > { %842 = vmatpush1.msra.mxu0 %v759_v59  ;;  %v2914_v35 = vld [vmem:[%s2709_s28 + $0xe8] sm:$0xff]  ;;  %v2920_v36 = vld [vmem:[%s2709_s28 + $0xe0] sm:$0xff]  ;;  %v2923_v37 = vld [vmem:[%s2709_s28 + $0xf8] sm:$0xff] }
  0xac   : > { %843 = vmatprep.subr.mxu0 %v2415_v51  ;;  %v2929_v38 = vld [vmem:[%s2709_s28 + $0xf0] sm:$0xff]  ;;  %v1144_v39 = vld [vmem:[%s2724_s0] sm:$0xff]  ;;  %v987_v46 = vld [vmem:[%s2728_s2 + $0x78] sm:$0xff] }
  0xad   : > { %844 = vmatpush1.msra.mxu0 %v758_v60  ;;  %v986_v47 = vld [vmem:[%s2728_s2 + $0x70] sm:$0xff]  ;;  %1000 = vmatpush1.msra.mxu1 %v987_v46  ;;  %v985_v49 = vld [vmem:[%s2728_s2 + $0x68] sm:$0xff]  ;;  %v984_v52 = vld [vmem:[%s2728_s2 + $0x60] sm:$0xff] }
  0xae   : > { %845 = vmatprep.subr.mxu0 %v2415_v51  ;;  %1001 = vmatprep.subr.mxu1 %v2415_v51  ;;  %v983_v54 = vld [vmem:[%s2728_s2 + $0x58] sm:$0xff]  ;;  %v982_v56 = vld [vmem:[%s2728_s2 + $0x50] sm:$0xff]  ;;  %v981_v58 = vld [vmem:[%s2728_s2 + $0x48] sm:$0xff] }
  0xaf   : > { %846 = vmatpush1.msra.mxu0 %v757_v61  ;;  %1002 = vmatpush1.msra.mxu1 %v986_v47  ;;  %v980_v60 = vld [vmem:[%s2728_s2 + $0x40] sm:$0xff] }
  0xb0   : > { %847 = vmatprep.subr.mxu0 %v2415_v51  ;;  %1003 = vmatprep.subr.mxu1 %v2415_v51  ;;  %v972_v46 = vld [vmem:[%s2728_s2] sm:$0xff] }
  0xb1   : > { %848 = vmatpush1.msra.mxu0 %v756_v62  ;;  %1004 = vmatpush1.msra.mxu1 %v985_v49  ;;  %v979_v62 = vld [vmem:[%s2728_s2 + $0x38] sm:$0xff] }
  0xb2   : > { %849 = vmatprep.subr.mxu0 %v2415_v51  ;;  %1005 = vmatprep.subr.mxu1 %v2415_v51  ;;  %v991_v49 = vld [vmem:[%s2728_s2 + $0x98] sm:$0xff] }
  0xb3   : > { %850 = vmatpush1.msra.mxu0 %v755_v63  ;;  %1006 = vmatpush1.msra.mxu1 %v984_v52  ;;  %v990_v52 = vld [vmem:[%s2728_s2 + $0x90] sm:$0xff] }
  0xb4   : > { %851 = vmatprep.subr.mxu0 %v2415_v51  ;;  %1007 = vmatprep.subr.mxu1 %v2415_v51 }
  0xb5   : > { %852 = vmatpush1.msra.mxu0 %v754_v0  ;;  %1008 = vmatpush1.msra.mxu1 %v983_v54  ;;  %v978_v0 = vld [vmem:[%s2728_s2 + $0x30] sm:$0xff] }
  0xb6   : > { %853 = vmatprep.subr.mxu0 %v2415_v51  ;;  %1009 = vmatprep.subr.mxu1 %v2415_v51 }
  0xb7   : > { %854 = vmatpush1.msra.mxu0 %v753_v1  ;;  %1010 = vmatpush1.msra.mxu1 %v982_v56 }
  0xb8   : > { %855 = vmatprep.subr.mxu0 %v2415_v51  ;;  %1011 = vmatprep.subr.mxu1 %v2415_v51 }
  0xb9   : > { %856 = vmatpush1.msra.mxu0 %v752_v2  ;;  %1012 = vmatpush1.msra.mxu1 %v981_v58  ;;  %v977_v2 = vld [vmem:[%s2728_s2 + $0x28] sm:$0xff]  ;;  %v988_v58 = vld [vmem:[%s2728_s2 + $0x80] sm:$0xff] }
  0xba   : > { %857 = vmatprep.subr.mxu0 %v2415_v51  ;;  %1013 = vmatprep.subr.mxu1 %v2415_v51 }
  0xbb   : > { %858 = vmatpush1.msra.mxu0 %v751_v3  ;;  %1014 = vmatpush1.msra.mxu1 %v980_v60 }
  0xbc   : > { %883 = vmatprep.subr.mxu0 %v2415_v51  ;;  %1015 = vmatprep.subr.mxu1 %v2415_v51 }
  0xbd   : > { %884 = vmatpush2.msra.mxu0 %v770_v4  ;;  %1016 = vmatpush1.msra.mxu1 %v979_v62  ;;  %v976_v4 = vld [vmem:[%s2728_s2 + $0x20] sm:$0xff] }
  0xbe   : > { %885 = vmatprep.subr.mxu0 %v2415_v51  ;;  %1017 = vmatprep.subr.mxu1 %v2415_v51 }
  0xbf   : > { %886 = vmatpush2.msra.mxu0 %v769_v5  ;;  %1018 = vmatpush1.msra.mxu1 %v978_v0 }
  0xc0   : > { %887 = vmatprep.subr.mxu0 %v2415_v51  ;;  %1019 = vmatprep.subr.mxu1 %v2415_v51 }
  0xc1   : > { %888 = vmatpush2.msra.mxu0 %v768_v6  ;;  %1020 = vmatpush1.msra.mxu1 %v977_v2  ;;  %v975_v6 = vld [vmem:[%s2728_s2 + $0x18] sm:$0xff] }
  0xc2   : > { %889 = vmatprep.subr.mxu0 %v2415_v51  ;;  %1021 = vmatprep.subr.mxu1 %v2415_v51 }
  0xc3   : > { %890 = vmatpush2.msra.mxu0 %v767_v7  ;;  %1022 = vmatpush1.msra.mxu1 %v976_v4 }
  0xc4   : > { %892 = vmatmul.mubr.f32.vlgmr.msra.gmra.mxu0 %v2793_v8  ;;  %1023 = vmatprep.subr.mxu1 %v2415_v51 }
  0xc5   : > { %1969 = vmatprep.mubr.msk.f32.mxu0 %vm778_vm1, %v2797_v9  ;;  %1024 = vmatpush1.msra.mxu1 %v975_v6 }
  0xc6   : > { %1025 = vmatprep.subr.mxu1 %v2415_v51 }
  0xc8   : > { %897 = vmatmul.mubr.f32.gmra.mxu0 %v2803_v10 }
  0xc9   : > { %1970 = vmatprep.mubr.msk.f32.mxu0 %vm778_vm1, %v2806_v11 }
  0xcc   : > { %902 = vmatmul.mubr.f32.gmra.mxu0 %v2812_v12 }
  0xcd   : > { %1971 = vmatprep.mubr.msk.f32.mxu0 %vm778_vm1, %v2815_v13 }
  0xd0   : > { %907 = vmatmul.mubr.f32.gmra.mxu0 %v2821_v14 }
  0xd1   : > { %1972 = vmatprep.mubr.msk.f32.mxu0 %vm778_vm1, %v2824_v15 }
  0xd4   : > { %912 = vmatmul.mubr.f32.gmra.mxu0 %v2830_v16 }
  0xd5   : > { %1973 = vmatprep.mubr.msk.f32.mxu0 %vm778_vm1, %v2833_v17 }
  0xd8   : > { %917 = vmatmul.mubr.f32.gmra.mxu0 %v2839_v18 }
  0xd9   : > { %1974 = vmatprep.mubr.msk.f32.mxu0 %vm778_vm1, %v2842_v19 }
  0xdc   : > { %922 = vmatmul.mubr.f32.gmra.mxu0 %v2848_v20 }
  0xdd   : > { %1975 = vmatprep.mubr.msk.f32.mxu0 %vm778_vm1, %v2851_v21 }
  0xe0   : > { %927 = vmatmul.mubr.f32.gmra.mxu0 %v2857_v22 }
  0xe1   : > { %1976 = vmatprep.mubr.msk.f32.mxu0 %vm778_vm1, %v2860_v23 }
  0xe4   : > { %932 = vmatmul.mubr.f32.gmra.mxu0 %v2866_v24 }
  0xe5   : > { %1977 = vmatprep.mubr.msk.f32.mxu0 %vm778_vm1, %v2869_v25 }
  0xe8   : > { %937 = vmatmul.mubr.f32.gmra.mxu0 %v2875_v26 }
  0xe9   : > { %1978 = vmatprep.mubr.msk.f32.mxu0 %vm778_vm1, %v2878_v27 }
  0xec   : > { %942 = vmatmul.mubr.f32.gmra.mxu0 %v2884_v28 }
  0xed   : > { %1979 = vmatprep.mubr.msk.f32.mxu0 %vm778_vm1, %v2887_v29 }
  0xf0   : > { %947 = vmatmul.mubr.f32.gmra.mxu0 %v2893_v30 }
  0xf1   : > { %1980 = vmatprep.mubr.msk.f32.mxu0 %vm778_vm1, %v2896_v31 }
  0xf4   : > { %952 = vmatmul.mubr.f32.gmra.mxu0 %v2902_v32 }
  0xf5   : > { %1981 = vmatprep.mubr.msk.f32.mxu0 %vm778_vm1, %v2905_v33 }
  0xf8   : > { %957 = vmatmul.mubr.f32.gmra.mxu0 %v2911_v34 }
  0xf9   : > { %1982 = vmatprep.mubr.msk.f32.mxu0 %vm778_vm1, %v2914_v35 }
  0xfc   : > { %962 = vmatmul.mubr.f32.gmra.mxu0 %v2920_v36 }
  0xfd   : > { %1983 = vmatprep.mubr.msk.f32.mxu0 %vm778_vm1, %v2923_v37 }
 0x100   : > { %967 = vmatmul.mubr.f32.gmra.mxu0 %v2929_v38 }
 0x101   : > { %2087 = vmatprep.mubr.f32.mxu0 %v1144_v39  ;;  %v974_v39 = vld [vmem:[%s2728_s2 + $0x10] sm:$0xff] }
 0x102   : > { %1026 = vmatpush1.msra.mxu1 %v974_v39 }
 0x103   : > { %1027 = vmatprep.subr.mxu1 %v2415_v51 }
 0x184   : > { %v2933_v40 = vpop.f32.mrf.mxu0 }
 0x186   : > { %v895_v41 = vpop.f32.mrf.mxu0 }
 0x188   : > { %v2935_v42 = vpop.f32.mrf.mxu0 }
 0x18a   : > { %v900_v43 = vpop.f32.mrf.mxu0 }
 0x18b   : > { %v973_v43 = vld [vmem:[%s2728_s2 + $0x8] sm:$0xff] }
 0x18c   : > { %v2937_v44 = vpop.f32.mrf.mxu0  ;;  %1028 = vmatpush1.msra.mxu1 %v973_v43 }
 0x18d   : > { %1029 = vmatprep.subr.mxu1 %v2415_v51 }
 0x18e   : > { %v905_v45 = vpop.f32.mrf.mxu0  ;;  %1030 = vmatpush1.msra.mxu1 %v972_v46 }
 0x18f   : > { %1055 = vmatprep.subr.mxu1 %v2415_v51 }
 0x190   : > { %v2941_v48 = vpop.f32.mrf.mxu0  ;;  %1056 = vmatpush2.msra.mxu1 %v991_v49 }
 0x191   : > { %1057 = vmatprep.subr.mxu1 %v2415_v51 }
 0x192   : > { %v910_v50 = vpop.f32.mrf.mxu0  ;;  %1058 = vmatpush2.msra.mxu1 %v990_v52 }
 0x193   : > { %1059 = vmatprep.subr.mxu1 %v2415_v51 }
 0x194   : > { %v2947_v53 = vpop.f32.mrf.mxu0 }
 0x196   : > { %v915_v55 = vpop.f32.mrf.mxu0 }
 0x197   : > { %v989_v55 = vld [vmem:[%s2728_s2 + $0x88] sm:$0xff] }
 0x198   : > { %v2953_v57 = vpop.f32.mrf.mxu0  ;;  %1060 = vmatpush2.msra.mxu1 %v989_v55 }
 0x199   : > { %1061 = vmatprep.subr.mxu1 %v2415_v51  ;;  %v3004_v51 = vld [vmem:[%s683_s20] ss:$0 sm:$0xff] }
 0x19a   : > { %v920_v59 = vpop.f32.mrf.mxu0  ;;  %1062 = vmatpush2.msra.mxu1 %v988_v58 }
 0x19b   : > { %1064 = vmatmul.mubr.f32.vlgmr.msra.gmra.mxu1 %v2793_v8 }
 0x19c   : > { %v2959_v61 = vpop.f32.mrf.mxu0  ;;  %1986 = vmatprep.mubr.msk.f32.mxu1 %vm778_vm1, %v2797_v9 }
 0x19e   : > { %v925_v63 = vpop.f32.mrf.mxu0 }
 0x19f   : > { %1069 = vmatmul.mubr.f32.gmra.mxu1 %v2803_v10 }
 0x1a0   : > { %v2965_v1 = vpop.f32.mrf.mxu0  ;;  %1987 = vmatprep.mubr.msk.f32.mxu1 %vm778_vm1, %v2806_v11 }
 0x1a2   : > { %v930_v3 = vpop.f32.mrf.mxu0 }
 0x1a3   : > { %1074 = vmatmul.mubr.f32.gmra.mxu1 %v2812_v12 }
 0x1a4   : > { %v2971_v5 = vpop.f32.mrf.mxu0  ;;  %1988 = vmatprep.mubr.msk.f32.mxu1 %vm778_vm1, %v2815_v13 }
 0x1a6   : > { %v935_v7 = vpop.f32.mrf.mxu0 }
 0x1a7   : > { %1079 = vmatmul.mubr.f32.gmra.mxu1 %v2821_v14 }
 0x1a8   : > { %v2977_v41 = vpop.f32.mrf.mxu0  ;;  %1989 = vmatprep.mubr.msk.f32.mxu1 %vm778_vm1, %v2824_v15 }
 0x1a9   : > { %v939_v15 = vadd.f32 %v3004_v51, %v2977_v41 }
 0x1aa   : > { %v940_v45 = vpop.f32.mrf.mxu0 }
 0x1ab   : > { %1084 = vmatmul.mubr.f32.gmra.mxu1 %v2830_v16  ;;  %v934_v16 = vadd.f32 %v3004_v51, %v2971_v5 }
 0x1ac   : > { %v943_v47 = vpop.f32.mrf.mxu0  ;;  %1990 = vmatprep.mubr.msk.f32.mxu1 %vm778_vm1, %v2833_v17  ;;  %v929_v17 = vadd.f32 %v3004_v51, %v2965_v1 }
 0x1ad   : > { %v944_v14 = vadd.f32 %v3004_v51, %v943_v47 }
 0x1ae   : > { %v945_v50 = vpop.f32.mrf.mxu0 }
 0x1af   : > { %1089 = vmatmul.mubr.f32.gmra.mxu1 %v2839_v18  ;;  %v924_v18 = vadd.f32 %v3004_v51, %v2959_v61 }
 0x1b0   : > { %v948_v54 = vpop.f32.mrf.mxu0  ;;  %1991 = vmatprep.mubr.msk.f32.mxu1 %vm778_vm1, %v2842_v19  ;;  %v919_v19 = vadd.f32 %v3004_v51, %v2953_v57 }
 0x1b1   : > { %v949_v13 = vadd.f32 %v3004_v51, %v948_v54 }
 0x1b2   : > { %v950_v56 = vpop.f32.mrf.mxu0 }
 0x1b3   : > { %1094 = vmatmul.mubr.f32.gmra.mxu1 %v2848_v20  ;;  %v914_v20 = vadd.f32 %v3004_v51, %v2947_v53 }
 0x1b4   : > { %v953_v59 = vpop.f32.mrf.mxu0  ;;  %1992 = vmatprep.mubr.msk.f32.mxu1 %vm778_vm1, %v2851_v21  ;;  %v909_v21 = vadd.f32 %v3004_v51, %v2941_v48 }
 0x1b5   : > { %v954_v12 = vadd.f32 %v3004_v51, %v953_v59 }
 0x1b6   : > { %v955_v60 = vpop.f32.mrf.mxu0 }
 0x1b7   : > { %1099 = vmatmul.mubr.f32.gmra.mxu1 %v2857_v22  ;;  %v904_v22 = vadd.f32 %v3004_v51, %v2937_v44 }
 0x1b8   : > { %v958_v62 = vpop.f32.mrf.mxu0  ;;  %1993 = vmatprep.mubr.msk.f32.mxu1 %vm778_vm1, %v2860_v23  ;;  %v899_v23 = vadd.f32 %v3004_v51, %v2935_v42 }
 0x1b9   : > { %v959_v11 = vadd.f32 %v3004_v51, %v958_v62 }
 0x1ba   : > { %v960_v63 = vpop.f32.mrf.mxu0 }
 0x1bb   : > { %1104 = vmatmul.mubr.f32.gmra.mxu1 %v2866_v24  ;;  %v894_v24 = vadd.f32 %v3004_v51, %v2933_v40 }
 0x1bc   : > { %v963_v0 = vpop.f32.mrf.mxu0  ;;  %1994 = vmatprep.mubr.msk.f32.mxu1 %vm778_vm1, %v2869_v25  ;;  %v1145_v25 = vld [vmem:[%s2724_s0 + $0x8] sm:$0xff] }
 0x1bd   : > { %v964_v3 = vadd.f32 %v3004_v51, %v963_v0 }
 0x1be   : > { %v965_v2 = vpop.f32.mrf.mxu0 }
 0x1bf   : > { %1109 = vmatmul.mubr.f32.gmra.mxu1 %v2875_v26  ;;  %v1146_v26 = vld [vmem:[%s2724_s0 + $0x10] sm:$0xff] }
 0x1c0   : > { %v968_v8 = vpop.f32.mrf.mxu0  ;;  %1995 = vmatprep.mubr.msk.f32.mxu1 %vm778_vm1, %v2878_v27  ;;  %v1147_v27 = vld [vmem:[%s2724_s0 + $0x18] sm:$0xff] }
 0x1c1   : > { %v969_v9 = vadd.f32 %v3004_v51, %v968_v8  ;;  %v2416_v51 = vmov 0   ;;  %v1984_v8 = vld [vmem:[%s687_s12] ss:$0 sm:$0xff] }
 0x1c2   : > { %v970_v10 = vpop.f32.mrf.mxu0  ;;  %2257 = vset.pattern.permute.xlu0 %v2416_v51  ;;  %2258 = vset.pattern.permute.xlu1 %v2416_v51 }
 0x1c3   : > { %2055 = vmatprep.subr.mxu0 %v969_v9  ;;  %1114 = vmatmul.mubr.f32.gmra.mxu1 %v2884_v28  ;;  %v1148_v28 = vld [vmem:[%s2724_s0 + $0x20] sm:$0xff] }
 0x1c4   : > { %2056 = vmatpush3.xpose.msra.mxu0 %v969_v9  ;;  %1996 = vmatprep.mubr.msk.f32.mxu1 %vm778_vm1, %v2887_v29  ;;  %v1149_v29 = vld [vmem:[%s2724_s0 + $0x28] sm:$0xff] }
 0x1c5   : > { %2057 = vmatprep.subr.mxu0 %v964_v3 }
 0x1c7   : > { %1119 = vmatmul.mubr.f32.gmra.mxu1 %v2893_v30  ;;  %v1150_v30 = vld [vmem:[%s2724_s0 + $0x30] sm:$0xff] }
 0x1c8   : > { %2058 = vmatpush3.xpose.msra.mxu0 %v964_v3  ;;  %1997 = vmatprep.mubr.msk.f32.mxu1 %vm778_vm1, %v2896_v31  ;;  %v1151_v31 = vld [vmem:[%s2724_s0 + $0x38] sm:$0xff] }
 0x1c9   : > { %2059 = vmatprep.subr.mxu0 %v959_v11 }
 0x1cb   : > { %1124 = vmatmul.mubr.f32.gmra.mxu1 %v2902_v32 }
 0x1cc   : > { %2060 = vmatpush3.xpose.msra.mxu0 %v959_v11  ;;  %1998 = vmatprep.mubr.msk.f32.mxu1 %vm778_vm1, %v2905_v33 }
 0x1cd   : > { %2061 = vmatprep.subr.mxu0 %v954_v12 }
 0x1cf   : > { %1129 = vmatmul.mubr.f32.gmra.mxu1 %v2911_v34 }
 0x1d0   : > { %2062 = vmatpush3.xpose.msra.mxu0 %v954_v12  ;;  %1999 = vmatprep.mubr.msk.f32.mxu1 %vm778_vm1, %v2914_v35 }
 0x1d1   : > { %2063 = vmatprep.subr.mxu0 %v949_v13 }
 0x1d3   : > { %1134 = vmatmul.mubr.f32.gmra.mxu1 %v2920_v36 }
 0x1d4   : > { %2064 = vmatpush3.xpose.msra.mxu0 %v949_v13  ;;  %2000 = vmatprep.mubr.msk.f32.mxu1 %vm778_vm1, %v2923_v37 }
 0x1d5   : > { %2065 = vmatprep.subr.mxu0 %v944_v14 }
 0x1d7   : > { %1139 = vmatmul.mubr.f32.gmra.mxu1 %v2929_v38 }
 0x1d8   : > { %2066 = vmatpush3.xpose.msra.mxu0 %v944_v14 }
 0x1d9   : > { %2067 = vmatprep.subr.mxu0 %v939_v15 }
 0x1dc   : > { %2068 = vmatpush3.xpose.msra.mxu0 %v939_v15 }
 0x1dd   : > { %2069 = vmatprep.subr.mxu0 %v934_v16 }
 0x1e0   : > { %2070 = vmatpush3.xpose.msra.mxu0 %v934_v16 }
 0x1e1   : > { %2071 = vmatprep.subr.mxu0 %v929_v17 }
 0x1e4   : > { %2072 = vmatpush3.xpose.msra.mxu0 %v929_v17 }
 0x1e5   : > { %2073 = vmatprep.subr.mxu0 %v924_v18 }
 0x1e8   : > { %2074 = vmatpush3.xpose.msra.mxu0 %v924_v18 }
 0x1e9   : > { %2075 = vmatprep.subr.mxu0 %v919_v19 }
 0x1ec   : > { %2076 = vmatpush3.xpose.msra.mxu0 %v919_v19 }
 0x1ed   : > { %2077 = vmatprep.subr.mxu0 %v914_v20 }
 0x1f0   : > { %2078 = vmatpush3.xpose.msra.mxu0 %v914_v20 }
 0x1f1   : > { %2079 = vmatprep.subr.mxu0 %v909_v21 }
 0x1f4   : > { %2080 = vmatpush3.xpose.msra.mxu0 %v909_v21 }
 0x1f5   : > { %2081 = vmatprep.subr.mxu0 %v904_v22 }
 0x1f8   : > { %2082 = vmatpush3.xpose.msra.mxu0 %v904_v22 }
 0x1f9   : > { %2083 = vmatprep.subr.mxu0 %v899_v23 }
 0x1fc   : > { %2084 = vmatpush3.xpose.msra.mxu0 %v899_v23 }
 0x1fd   : > { %2085 = vmatprep.subr.mxu0 %v894_v24 }
 0x200   : > { %2086 = vmatpush3.xpose.msra.mxu0 %v894_v24 }
 0x203   : > { %2088 = vmatmul.mubr.f32.vlgmr.msra.gmra.mxu0 %v1145_v25 }
 0x204   : > { %2090 = vmatprep.mubr.f32.mxu0 %v1146_v26  ;;  %v1257_v26 = vld [vmem:[#allocation2] sm:$0xff] }
 0x207   : > { %2091 = vmatmul.mubr.f32.gmra.mxu0 %v1147_v27 }
 0x208   : > { %2093 = vmatprep.mubr.f32.mxu0 %v1148_v28 }
 0x20b   : > { %2094 = vmatmul.mubr.f32.gmra.mxu0 %v1149_v29  ;;  %v1258_v29 = vld [vmem:[#allocation2 + $0x8] sm:$0xff] }
 0x20c   : > { %2096 = vmatprep.mubr.f32.mxu0 %v1150_v30  ;;  %v1259_v30 = vld [vmem:[#allocation2 + $0x10] sm:$0xff] }
 0x20f   : > { %2097 = vmatmul.mubr.f32.gmra.mxu0 %v1151_v31 }
 0x25b   : > { %v3078_v32 = vpop.f32.mrf.mxu1 }
 0x25c   : > { %v1066_v25 = vadd.f32 %v1984_v8, %v3078_v32 }
 0x25d   : > { %v1067_v33 = vpop.f32.mrf.mxu1 }
 0x25f   : > { %v3080_v34 = vpop.f32.mrf.mxu1 }
 0x260   : > { %v1071_v24 = vadd.f32 %v1984_v8, %v3080_v34 }
 0x261   : > { %v1072_v35 = vpop.f32.mrf.mxu1 }
 0x263   : > { %v3082_v36 = vpop.f32.mrf.mxu1 }
 0x264   : > { %v1076_v23 = vadd.f32 %v1984_v8, %v3082_v36 }
 0x265   : > { %v1077_v37 = vpop.f32.mrf.mxu1 }
 0x266   : > { %v1260_v37 = vld [vmem:[#allocation2 + $0x18] sm:$0xff] }
 0x267   : > { %v3084_v38 = vpop.f32.mrf.mxu1 }
 0x268   : > { %v1081_v22 = vadd.f32 %v1984_v8, %v3084_v38  ;;  %v1261_v38 = vld [vmem:[#allocation2 + $0x20] sm:$0xff] }
 0x269   : > { %v1082_v40 = vpop.f32.mrf.mxu1 }
 0x26b   : > { %v3086_v42 = vpop.f32.mrf.mxu1 }
 0x26c   : > { %v1086_v21 = vadd.f32 %v1984_v8, %v3086_v42 }
 0x26d   : > { %v1087_v44 = vpop.f32.mrf.mxu1 }
 0x26f   : > { %v3088_v48 = vpop.f32.mrf.mxu1 }
 0x270   : > { %v1091_v20 = vadd.f32 %v1984_v8, %v3088_v48 }
 0x271   : > { %v1092_v53 = vpop.f32.mrf.mxu1 }
 0x272   : > { %v1262_v53 = vld [vmem:[#allocation2 + $0x28] sm:$0xff] }
 0x273   : > { %v3090_v57 = vpop.f32.mrf.mxu1 }
 0x274   : > { %v1096_v19 = vadd.f32 %v1984_v8, %v3090_v57  ;;  %v3131_v57 = vld [vmem:[#allocation2 + $0x30] sm:$0xff] }
 0x275   : > { %v1097_v61 = vpop.f32.mrf.mxu1 }
 0x277   : > { %v1100_v1 = vpop.f32.mrf.mxu1 }
 0x278   : > { %v1101_v18 = vadd.f32 %v1984_v8, %v1100_v1 }
 0x279   : > { %v1102_v4 = vpop.f32.mrf.mxu1 }
 0x27b   : > { %v1105_v5 = vpop.f32.mrf.mxu1 }
 0x27c   : > { %v1106_v17 = vadd.f32 %v1984_v8, %v1105_v5 }
 0x27d   : > { %v1107_v6 = vpop.f32.mrf.mxu1 }
 0x27f   : > { %v1110_v7 = vpop.f32.mrf.mxu1 }
 0x280   : > { %v1111_v16 = vadd.f32 %v1984_v8, %v1110_v7 }
 0x281   : > { %v1112_v39 = vpop.f32.mrf.mxu1 }
 0x283   : > { %v1115_v41 = vpop.f32.mrf.mxu1 }
 0x284   : > { %v1116_v15 = vadd.f32 %v1984_v8, %v1115_v41  ;;  %v3138_v41 = vld [vmem:[#allocation2 + $0x38] sm:$0xff] }
 0x285   : > { %v1117_v43 = vpop.f32.mrf.mxu1 }
 0x287   : > { %v1120_v45 = vpop.f32.mrf.mxu1 }
 0x288   : > { %v1121_v14 = vadd.f32 %v1984_v8, %v1120_v45 }
 0x289   : > { %v1122_v46 = vpop.f32.mrf.mxu1 }
 0x28b   : > { %v1125_v47 = vpop.f32.mrf.mxu1 }
 0x28c   : > { %v1126_v13 = vadd.f32 %v1984_v8, %v1125_v47 }
 0x28d   : > { %v1127_v49 = vpop.f32.mrf.mxu1 }
 0x28f   : > { %v1130_v50 = vpop.f32.mrf.mxu1 }
 0x290   : > { %v1131_v12 = vadd.f32 %v1984_v8, %v1130_v50 }
 0x291   : > { %v1132_v52 = vpop.f32.mrf.mxu1 }
 0x293   : > { %v1135_v54 = vpop.f32.mrf.mxu1 }
 0x294   : > { %v1136_v10 = vadd.f32 %v1984_v8, %v1135_v54 }
 0x295   : > { %v1137_v55 = vpop.f32.mrf.mxu1 }
 0x297   : > { %v1140_v9 = vpop.f32.mrf.mxu1 }
 0x298   : > { %v1141_v3 = vadd.f32 %v1984_v8, %v1140_v9 }
 0x299   : > { %v1142_v11 = vpop.f32.mrf.mxu1 }
 0x29a   : > { %2099 = vmatprep.subr.mxu1 %v1141_v3 }
 0x29b   : > { %2100 = vmatpush3.msra.mxu1 %v1141_v3 }
 0x29c   : > { %2101 = vmatprep.subr.mxu1 %v1136_v10 }
 0x29d   : > { %2102 = vmatpush3.msra.mxu1 %v1136_v10 }
 0x29e   : > { %2103 = vmatprep.subr.mxu1 %v1131_v12 }
 0x29f   : > { %2104 = vmatpush3.msra.mxu1 %v1131_v12 }
 0x2a0   : > { %2105 = vmatprep.subr.mxu1 %v1126_v13 }
 0x2a1   : > { %2106 = vmatpush3.msra.mxu1 %v1126_v13 }
 0x2a2   : > { %2107 = vmatprep.subr.mxu1 %v1121_v14 }
 0x2a3   : > { %2108 = vmatpush3.msra.mxu1 %v1121_v14 }
 0x2a4   : > { %2109 = vmatprep.subr.mxu1 %v1116_v15 }
 0x2a5   : > { %2110 = vmatpush3.msra.mxu1 %v1116_v15 }
 0x2a6   : > { %2111 = vmatprep.subr.mxu1 %v1111_v16 }
 0x2a7   : > { %2112 = vmatpush3.msra.mxu1 %v1111_v16 }
 0x2a8   : > { %2113 = vmatprep.subr.mxu1 %v1106_v17 }
 0x2a9   : > { %2114 = vmatpush3.msra.mxu1 %v1106_v17 }
 0x2aa   : > { %2115 = vmatprep.subr.mxu1 %v1101_v18 }
 0x2ab   : > { %2116 = vmatpush3.msra.mxu1 %v1101_v18 }
 0x2ac   : > { %2117 = vmatprep.subr.mxu1 %v1096_v19 }
 0x2ad   : > { %2118 = vmatpush3.msra.mxu1 %v1096_v19 }
 0x2ae   : > { %2119 = vmatprep.subr.mxu1 %v1091_v20 }
 0x2af   : > { %2120 = vmatpush3.msra.mxu1 %v1091_v20 }
 0x2b0   : > { %2121 = vmatprep.subr.mxu1 %v1086_v21 }
 0x2b1   : > { %2122 = vmatpush3.msra.mxu1 %v1086_v21 }
 0x2b2   : > { %2123 = vmatprep.subr.mxu1 %v1081_v22 }
 0x2b3   : > { %2124 = vmatpush3.msra.mxu1 %v1081_v22 }
 0x2b4   : > { %2125 = vmatprep.subr.mxu1 %v1076_v23 }
 0x2b5   : > { %2126 = vmatpush3.msra.mxu1 %v1076_v23 }
 0x2b6   : > { %2127 = vmatprep.subr.mxu1 %v1071_v24 }
 0x2b7   : > { %2128 = vmatpush3.msra.mxu1 %v1071_v24 }
 0x2b8   : > { %2129 = vmatprep.subr.mxu1 %v1066_v25 }
 0x2b9   : > { %2130 = vmatpush3.msra.mxu1 %v1066_v25 }
 0x2c3   : > { %v3092_v56 = vpop.f32.mrf.mxu0 }
 0x2c5   : > { %v3094_v58 = vpop.f32.mrf.mxu0 }
 0x2c6   : > { %1265 = vmax.xlane.f32.xlu0 %v3094_v58 }
 0x2c7   : > { %v3097_v59 = vpop.f32.mrf.mxu0 }
 0x2c9   : > { %v3099_v60 = vpop.f32.mrf.mxu0 }
 0x2ca   : > { %1267 = vmax.xlane.f32.xlu0 %v3092_v56  ;;  %1269 = vmax.xlane.f32.xlu1 %v3099_v60 }
 0x2cb   : > { %v3103_v62 = vpop.f32.mrf.mxu0 }
 0x2cd   : > { %v3105_v63 = vpop.f32.mrf.mxu0 }
 0x2ce   : > { %1271 = vmax.xlane.f32.xlu1 %v3097_v59  ;;  %1273 = vmax.xlane.f32.xlu0 %v3105_v63 }
 0x2cf   : > { %v3109_v0 = vpop.f32.mrf.mxu0 }
 0x2d1   : > { %v3111_v2 = vpop.f32.mrf.mxu0 }
 0x2d2   : > { %1275 = vmax.xlane.f32.xlu1 %v3103_v62  ;;  %1277 = vmax.xlane.f32.xlu0 %v3111_v2 }
 0x2d6   : > { %1279 = vmax.xlane.f32.xlu1 %v3109_v0 }
 0x34f   : > { %v1266_v27 = vpop.xlane.xlu0 %1265 }
 0x350   : > { %v1281_v28 = vmax.f32 %v1257_v26, %v1266_v27 }
 0x352   : > { %v1289_v31 = vsub.f32 %v1257_v26, %v1281_v28  ;;  %1603 = vst.msk [vmem:[#allocation2] sm:$0xff] %vm1417_vm2, %v1281_v28  ;;  %1315 = vperm.xlu0 %2257, %v1281_v28  }
 0x353   : > { %v1268_v33 = vpop.xlane.xlu0 %1267  ;;  %v1270_v34 = vpop.xlane.xlu1 %1269 }
 0x354   : > { %v1297_v35 = vmul.f32 1.442695, %v1289_v31  ;;  %v1282_v32 = vmax.f32 %v1258_v29, %v1268_v33  ;;  %v1283_v36 = vmax.f32 %v1259_v30, %v1270_v34 }
 0x356   : > { %2259 = vpow2.f32 %v1297_v35  ;;  %1604 = vst.msk [vmem:[#allocation2 + $0x8] sm:$0xff] %vm1417_vm2, %v1282_v32  ;;  %1605 = vst.msk [vmem:[#allocation2 + $0x10] sm:$0xff] %vm1417_vm2, %v1283_v36  ;;  %1320 = vperm.xlu1 %2258, %v1282_v32   ;;  %v1290_v5 = vsub.f32 %v1258_v29, %v1282_v32  ;;  %v1291_v49 = vsub.f32 %v1259_v30, %v1283_v36 }
 0x357   : > { %v1272_v40 = vpop.xlane.xlu1 %1271  ;;  %v1274_v42 = vpop.xlane.xlu0 %1273 }
 0x358   : > { %v1284_v44 = vmax.f32 %v1260_v37, %v1272_v40  ;;  %v1285_v48 = vmax.f32 %v1261_v38, %v1274_v42  ;;  %v1299_v47 = vmul.f32 1.442695, %v1290_v5  ;;  %v1301_v51 = vmul.f32 1.442695, %v1291_v49 }
 0x35a   : > { %v1292_v61 = vsub.f32 %v1260_v37, %v1284_v44  ;;  %1606 = vst.msk [vmem:[#allocation2 + $0x18] sm:$0xff] %vm1417_vm2, %v1284_v44  ;;  %1330 = vperm.xlu1 %2258, %v1284_v44   ;;  %1607 = vst.msk [vmem:[#allocation2 + $0x20] sm:$0xff] %vm1417_vm2, %v1285_v48  ;;  %v1293_v8 = vsub.f32 %v1261_v38, %v1285_v48 }
 0x35b   : > { %v1276_v1 = vpop.xlane.xlu1 %1275  ;;  %v1278_v4 = vpop.xlane.xlu0 %1277 }
 0x35c   : > { %v1303_v6 = vmul.f32 1.442695, %v1292_v61  ;;  %v1286_v7 = vmax.f32 %v1262_v53, %v1276_v1  ;;  %v3136_v39 = vmax.f32 %v3131_v57, %v1278_v4  ;;  %v1305_v9 = vmul.f32 1.442695, %v1293_v8  ;;  %v1382_v8 = vld [vmem:[#allocation3 + $0x28] sm:$0xff] }
 0x35e   : > { %2261 = vpow2.f32 %v1303_v6  ;;  %v1294_v43 = vsub.f32 %v1262_v53, %v1286_v7  ;;  %1608 = vst.msk [vmem:[#allocation2 + $0x28] sm:$0xff] %vm1417_vm2, %v1286_v7  ;;  %1325 = vperm.xlu1 %2258, %v1283_v36   ;;  %v1295_v45 = vsub.f32 %v3131_v57, %v3136_v39  ;;  %1609 = vst.msk [vmem:[#allocation2 + $0x30] sm:$0xff] %vm1417_vm2, %v3136_v39  ;;  %v1377_v57 = vld [vmem:[#allocation3] sm:$0xff] }
 0x35f   : > { %v1280_v46 = vpop.xlane.xlu1 %1279 }
 0x360   : > { %v1307_v50 = vmul.f32 1.442695, %v1294_v43  ;;  %v3146_v52 = vmax.f32 %v3138_v41, %v1280_v46  ;;  %v1380_v46 = vld [vmem:[#allocation3 + $0x18] sm:$0xff] }
 0x362   : > { %2263 = vpow2.f32 %v1307_v50  ;;  %1340 = vperm.xlu1 %2258, %v1286_v7   ;;  %v1296_v54 = vsub.f32 %v3138_v41, %v3146_v52  ;;  %1610 = vst.msk [vmem:[#allocation2 + $0x38] sm:$0xff] %vm1417_vm2, %v3146_v52 }
 0x363   : > { %v3152_v55 = vpop.eup %2259  ;;  %2265 = vpow2.f32 %v1299_v47 }
 0x364   : > { %1436 = vperm.xlu0 %2257, %v3152_v55   ;;  %2267 = vpow2.f32 %v1301_v51  ;;  %v1311_v40 = vmul.f32 1.442695, %v1296_v54  ;;  %v1385_v5 = vmul.f32 %v3152_v55, %v1377_v57 }
 0x365   : > { %2269 = vpow2.f32 %v1305_v9 }
 0x366   : > { %1335 = vperm.xlu1 %2258, %v1285_v48  }
 0x36a   : > { %1345 = vperm.xlu1 %2258, %v3136_v39   ;;  %v1378_v39 = vld [vmem:[#allocation3 + $0x8] sm:$0xff] }
 0x36b   : > { %v3156_v10 = vpop.eup %2261 }
 0x36c   : > { %1451 = vperm.xlu0 %2257, %v3156_v10   ;;  %v1388_v49 = vmul.f32 %v3156_v10, %v1380_v46 }
 0x36e   : > { %1350 = vperm.xlu1 %2258, %v3146_v52   ;;  %v1379_v52 = vld [vmem:[#allocation3 + $0x10] sm:$0xff] }
 0x36f   : > { %v3160_v3 = vpop.eup %2263 }
 0x370   : > { %1461 = vperm.xlu0 %2257, %v3160_v3   ;;  %v3163_v11 = vpop.eup %2265 }
 0x371   : > { %v3166_v12 = vpop.eup %2267  ;;  %v1386_v43 = vmul.f32 %v3163_v11, %v1378_v39 }
 0x372   : > { %1441 = vperm.xlu1 %2258, %v3163_v11   ;;  %v3169_v13 = vpop.eup %2269  ;;  %v1387_v55 = vmul.f32 %v3166_v12, %v1379_v52  ;;  %v1390_v11 = vmul.f32 %v3160_v3, %v1382_v8 }
 0x376   : > { %1446 = vperm.xlu1 %2258, %v3166_v12  }
 0x37a   : > { %1456 = vperm.xlu1 %2258, %v3169_v13  }
 0x3cd   : > { %v1316_v14 = vpop.permute.xlu0 %1315 }
 0x3ce   : > { %v1353_v15 = vsub.f32 %v3094_v58, %v1316_v14 }
 0x3d0   : > { %v1361_v16 = vmul.f32 1.442695, %v1353_v15  ;;  %v1381_v15 = vld [vmem:[#allocation3 + $0x20] sm:$0xff] }
 0x3d1   : > { %v1321_v17 = vpop.permute.xlu1 %1320  ;;  %v1389_v10 = vmul.f32 %v3169_v13, %v1381_v15 }
 0x3d2   : > { %2271 = vpow2.f32 %v1361_v16  ;;  %v1354_v18 = vsub.f32 %v3092_v56, %v1321_v17 }
 0x3d4   : > { %v1363_v19 = vmul.f32 1.442695, %v1354_v18  ;;  %v1383_v18 = vld [vmem:[#allocation3 + $0x30] sm:$0xff] }
 0x3d5   : > { %v1331_v20 = vpop.permute.xlu1 %1330 }
 0x3d6   : > { %2273 = vpow2.f32 %v1363_v19  ;;  %v1356_v21 = vsub.f32 %v3097_v59, %v1331_v20 }
 0x3d8   : > { %v1367_v22 = vmul.f32 1.442695, %v1356_v21  ;;  %v1384_v21 = vld [vmem:[#allocation3 + $0x38] sm:$0xff] }
 0x3d9   : > { %v1326_v23 = vpop.permute.xlu1 %1325 }
 0x3da   : > { %2275 = vpow2.f32 %v1367_v22  ;;  %v1355_v24 = vsub.f32 %v3099_v60, %v1326_v23 }
 0x3dc   : > { %v1365_v25 = vmul.f32 1.442695, %v1355_v24 }
 0x3dd   : > { %v1341_v26 = vpop.permute.xlu1 %1340 }
 0x3de   : > { %2277 = vpow2.f32 %v1365_v25  ;;  %v1358_v58 = vsub.f32 %v3103_v62, %v1341_v26  ;;  %v1427_v25 = vld [vmem:[#allocation4] sm:$0xff]  ;;  %v1426_v26 = vld [vmem:[#allocation4 + $0x30] sm:$0xff] }
 0x3df   : > { %v2272_v27 = vpop.eup %2271  ;;  %v1437_v53 = vpop.permute.xlu0 %1436 }
 0x3e0   : > { %v1371_v28 = vmul.f32 1.442695, %v1358_v58  ;;  %1393 = vadd.xlane.f32.xlu1 %v2272_v27  ;;  %2131 = vmatprep.mubr.f32.mxu1 %v2272_v27  ;;  %v1474_v27 = vmul.f32 %v1437_v53, %v1426_v26 }
 0x3e1   : > { %v1336_v56 = vpop.permute.xlu1 %1335 }
 0x3e2   : > { %2279 = vpow2.f32 %v1371_v28  ;;  %v1357_v29 = vsub.f32 %v3105_v63, %v1336_v56 }
 0x3e3   : > { %v2274_v30 = vpop.eup %2273 }
 0x3e4   : > { %v1369_v59 = vmul.f32 1.442695, %v1357_v29  ;;  %1395 = vadd.xlane.f32.xlu0 %v2274_v30  ;;  %2132 = vmatmul.mubr.f32.vlgmr.msra.gmra.mxu1 %v2274_v30  ;;  %v1429_v30 = vld [vmem:[#allocation4 + $0x10] sm:$0xff] }
 0x3e5   : > { %v1346_v31 = vpop.permute.xlu1 %1345 }
 0x3e6   : > { %2281 = vpow2.f32 %v1369_v59  ;;  %v1359_v60 = vsub.f32 %v3111_v2, %v1346_v31  ;;  %v1428_v59 = vld [vmem:[#allocation4 + $0x18] sm:$0xff] }
 0x3e7   : > { %v2276_v33 = vpop.eup %2275  ;;  %v1452_v1 = vpop.permute.xlu0 %1451 }
 0x3e8   : > { %v1373_v34 = vmul.f32 1.442695, %v1359_v60  ;;  %1399 = vadd.xlane.f32.xlu1 %v2276_v33  ;;  %v1477_v31 = vmul.f32 %v1452_v1, %v1429_v30 }
 0x3e9   : > { %v1351_v62 = vpop.permute.xlu1 %1350 }
 0x3ea   : > { %2283 = vpow2.f32 %v1373_v34  ;;  %v1360_v35 = vsub.f32 %v3109_v0, %v1351_v62  ;;  %v1309_v0 = vmul.f32 1.442695, %v1295_v45 }
 0x3eb   : > { %v2278_v32 = vpop.eup %2277  ;;  %v1462_v6 = vpop.permute.xlu0 %1461 }
 0x3ec   : > { %v1375_v36 = vmul.f32 1.442695, %v1360_v35  ;;  %1397 = vadd.xlane.f32.xlu0 %v2278_v32  ;;  %2134 = vmatprep.mubr.f32.mxu1 %v2278_v32  ;;  %v1431_v32 = vld [vmem:[#allocation4 + $0x20] sm:$0xff] }
 0x3ed   : > { %2135 = vmatmul.mubr.f32.gmra.mxu1 %v2276_v33  ;;  %v1442_v48 = vpop.permute.xlu1 %1441 }
 0x3ee   : > { %2285 = vpow2.f32 %v1375_v36  ;;  %v1475_v58 = vmul.f32 %v1442_v48, %v1427_v25  ;;  %v1430_v36 = vld [vmem:[#allocation4 + $0x8] sm:$0xff] }
 0x3ef   : > { %v2280_v63 = vpop.eup %2279  ;;  %2287 = vpow2.f32 %v1309_v0  ;;  %v1432_v48 = vld [vmem:[#allocation4 + $0x28] sm:$0xff] }
 0x3f0   : > { %1403 = vadd.xlane.f32.xlu1 %v2280_v63  ;;  %2289 = vpow2.f32 %v1311_v40  ;;  %v1433_v40 = vld [vmem:[#allocation4 + $0x38] sm:$0xff] }
 0x3f1   : > { %v1447_v61 = vpop.permute.xlu1 %1446 }
 0x3f2   : > { %v1476_v33 = vmul.f32 %v1447_v61, %v1428_v59 }
 0x3f3   : > { %v2282_v37 = vpop.eup %2281 }
 0x3f4   : > { %1401 = vadd.xlane.f32.xlu0 %v2282_v37  ;;  %2137 = vmatprep.mubr.f32.mxu1 %v2282_v37 }
 0x3f5   : > { %2138 = vmatmul.mubr.f32.gmra.mxu1 %v2280_v63  ;;  %v3186_v4 = vpop.permute.xlu1 %1456  ;;  %v1479_v63 = vmul.f32 %v1462_v6, %v1431_v32 }
 0x3f7   : > { %v2284_v2 = vpop.eup %2283 }
 0x3f8   : > { %1405 = vadd.xlane.f32.xlu0 %v2284_v2  ;;  %2140 = vmatprep.mubr.f32.mxu1 %v2284_v2  ;;  %v1478_v2 = vmul.f32 %v3186_v4, %v1430_v36 }
 0x3fb   : > { %v2286_v38 = vpop.eup %2285 }
 0x3fc   : > { %1407 = vadd.xlane.f32.xlu1 %v2286_v38  ;;  %2141 = vmatmul.mubr.f32.gmra.mxu1 %v2286_v38  ;;  %v2288_v42 = vpop.eup %2287 }
 0x3fd   : > { %v2290_v44 = vpop.eup %2289  ;;  %v1391_v12 = vmul.f32 %v2288_v42, %v1383_v18 }
 0x3fe   : > { %v1392_v23 = vmul.f32 %v2290_v44, %v1384_v21 }
 0x40d   : > { %1466 = vperm.xlu1 %2258, %v2288_v42  }
 0x40e   : > { %1471 = vperm.xlu0 %2257, %v2290_v44  }
 0x469   : > { %v1394_v7 = vpop.xlane.xlu1 %1393 }
 0x46a   : > { %v1409_v41 = vadd.f32 %v1394_v7, %v1385_v5 }
 0x46c   : > { %1418 = vst.msk [vmem:[#allocation3] sm:$0xff] %vm1417_vm2, %v1409_v41 }
 0x46d   : > { %v1396_v45 = vpop.xlane.xlu0 %1395 }
 0x46e   : > { %v1410_v47 = vadd.f32 %v1396_v45, %v1386_v43 }
 0x470   : > { %1419 = vst.msk [vmem:[#allocation3 + $0x8] sm:$0xff] %vm1417_vm2, %v1410_v47 }
 0x471   : > { %v1400_v50 = vpop.xlane.xlu1 %1399 }
 0x472   : > { %v1412_v54 = vadd.f32 %v1400_v50, %v1388_v49 }
 0x474   : > { %1421 = vst.msk [vmem:[#allocation3 + $0x18] sm:$0xff] %vm1417_vm2, %v1412_v54 }
 0x475   : > { %v1398_v51 = vpop.xlane.xlu0 %1397 }
 0x476   : > { %v1411_v9 = vadd.f32 %v1398_v51, %v1387_v55 }
 0x478   : > { %1420 = vst.msk [vmem:[#allocation3 + $0x10] sm:$0xff] %vm1417_vm2, %v1411_v9 }
 0x479   : > { %v1404_v14 = vpop.xlane.xlu1 %1403 }
 0x47a   : > { %v1414_v16 = vadd.f32 %v1404_v14, %v1390_v11 }
 0x47c   : > { %1423 = vst.msk [vmem:[#allocation3 + $0x28] sm:$0xff] %vm1417_vm2, %v1414_v16 }
 0x47d   : > { %v1402_v17 = vpop.xlane.xlu0 %1401 }
 0x47e   : > { %v1413_v19 = vadd.f32 %v1402_v17, %v1389_v10 }
 0x480   : > { %1422 = vst.msk [vmem:[#allocation3 + $0x20] sm:$0xff] %vm1417_vm2, %v1413_v19 }
 0x481   : > { %v1406_v20 = vpop.xlane.xlu0 %1405 }
 0x482   : > { %v1415_v22 = vadd.f32 %v1406_v20, %v1391_v12 }
 0x484   : > { %1424 = vst.msk [vmem:[#allocation3 + $0x30] sm:$0xff] %vm1417_vm2, %v1415_v22 }
 0x485   : > { %v1408_v3 = vpop.xlane.xlu1 %1407 }
 0x486   : > { %v1416_v24 = vadd.f32 %v1408_v3, %v1392_v23 }
 0x488   : > { %1425 = vst.msk [vmem:[#allocation3 + $0x38] sm:$0xff] %vm1417_vm2, %v1416_v24 }
 0x489   : > { %v1472_v42 = vpop.permute.xlu0 %1471  ;;  %v1467_v53 = vpop.permute.xlu1 %1466 }
 0x48a   : > { %v1481_v61 = vmul.f32 %v1472_v42, %v1433_v40  ;;  %v1480_v57 = vmul.f32 %v1467_v53, %v1432_v48 }
 0x4a4   : > { %v2133_v13 = vpop.f32.mrf.mxu1 }
 0x4a5   : > { %v1588_v28 = vadd.f32 %v2133_v13, %v1475_v58 }
 0x4a6   : > { %v1548_v56 = vpop.f32.mrf.mxu1 }
 0x4a7   : > { %1596 = vst [vmem:[#allocation4] sm:$0xff] %v1588_v28  ;;  %v1587_v29 = vadd.f32 %v1548_v56, %v1474_v27 }
 0x4a9   : > { %1595 = vst [vmem:[#allocation4 + $0x30] sm:$0xff] %v1587_v29 }
 0x4ad   : > { %v2136_v60 = vpop.f32.mrf.mxu1 }
 0x4ae   : > { %v1590_v34 = vadd.f32 %v2136_v60, %v1477_v31 }
 0x4af   : > { %v1558_v62 = vpop.f32.mrf.mxu1 }
 0x4b0   : > { %1598 = vst [vmem:[#allocation4 + $0x10] sm:$0xff] %v1590_v34  ;;  %v1589_v35 = vadd.f32 %v1558_v62, %v1476_v33 }
 0x4b2   : > { %1597 = vst [vmem:[#allocation4 + $0x18] sm:$0xff] %v1589_v35 }
 0x4b5   : > { %v2139_v37 = vpop.f32.mrf.mxu1 }
 0x4b6   : > { %v1592_v38 = vadd.f32 %v2139_v37, %v1479_v63 }
 0x4b7   : > { %v1568_v0 = vpop.f32.mrf.mxu1 }
 0x4b8   : > { %1600 = vst [vmem:[#allocation4 + $0x20] sm:$0xff] %v1592_v38  ;;  %v1591_v44 = vadd.f32 %v1568_v0, %v1478_v2 }
 0x4ba   : > { %1599 = vst [vmem:[#allocation4 + $0x8] sm:$0xff] %v1591_v44 }
 0x4bc   : > { %v2142_v1 = vpop.f32.mrf.mxu1 }
 0x4bd   : > { %v1594_v5 = vadd.f32 %v2142_v1, %v1481_v61  ;;  %1614 = sbr.rel (%p2001_p10) target bundleno = 1373 (0x55d), region = 166 }
 0x4be   : > { %v1578_v7 = vpop.f32.mrf.mxu1 }
 0x4bf   : > { %1602 = vst [vmem:[#allocation4 + $0x38] sm:$0xff] %v1594_v5  ;;  %v1593_v39 = vadd.f32 %v1578_v7, %v1480_v57 }
 0x4c1   : > { %1601 = vst [vmem:[#allocation4 + $0x28] sm:$0xff] %v1593_v39 }
 0x4c2   : > { %v1625_v4 = vld [vmem:[#allocation3 + $0x10] sm:$0xff]  ;;  %v1623_v6 = vld [vmem:[#allocation3] sm:$0xff]  ;;  %v1626_v41 = vld [vmem:[#allocation3 + $0x18] sm:$0xff]  ;;  %v2417_v43 = vmov 0  }
 0x4c3   : > { %2292 = vset.pattern.permute.xlu1 %v2417_v43  ;;  %2291 = vset.pattern.permute.xlu0 %v2417_v43  ;;  %2293 = vrcp.f32 %v1625_v4  ;;  %v1624_v45 = vld [vmem:[#allocation3 + $0x8] sm:$0xff]  ;;  %v1627_v47 = vld [vmem:[#allocation3 + $0x20] sm:$0xff]  ;;  %v1630_v49 = vld [vmem:[#allocation3 + $0x38] sm:$0xff] }
 0x4c4   : > { %2295 = vrcp.f32 %v1623_v6  ;;  %v1628_v46 = vld [vmem:[#allocation3 + $0x28] sm:$0xff]  ;;  %v1629_v50 = vld [vmem:[#allocation3 + $0x30] sm:$0xff]  ;;  %v1617_v15 = vld [vmem:[#allocation4 + $0x18] sm:$0xff] }
 0x4c5   : > { %2297 = vrcp.f32 %v1626_v41  ;;  %v1615_v16 = vld [vmem:[#allocation4 + $0x30] sm:$0xff]  ;;  %v1616_v20 = vld [vmem:[#allocation4] sm:$0xff]  ;;  %v1619_v25 = vld [vmem:[#allocation4 + $0x8] sm:$0xff] }
 0x4c6   : > { %2299 = vrcp.f32 %v1624_v45  ;;  %v1618_v12 = vld [vmem:[#allocation4 + $0x10] sm:$0xff]  ;;  %v1620_v24 = vld [vmem:[#allocation4 + $0x20] sm:$0xff]  ;;  %v1622_v28 = vld [vmem:[#allocation4 + $0x38] sm:$0xff] }
 0x4c7   : > { %2301 = vrcp.f32 %v1628_v46 }
 0x4c8   : > { %2303 = vrcp.f32 %v1627_v47  ;;  %v1621_v56 = vld [vmem:[#allocation4 + $0x28] sm:$0xff] }
 0x4c9   : > { %2305 = vrcp.f32 %v1630_v49 }
 0x4ca   : > { %2307 = vrcp.f32 %v1629_v50 }
 0x4d0   : > { %v2294_v52 = vpop.eup %2293 }
 0x4d1   : > { %v2296_v54 = vpop.eup %2295  ;;  %1651 = vperm.xlu1 %2292, %v2294_v52  }
 0x4d2   : > { %v2298_v55 = vpop.eup %2297  ;;  %1641 = vperm.xlu0 %2291, %v2296_v54  }
 0x4d3   : > { %v2300_v51 = vpop.eup %2299 }
 0x4d4   : > { %v2302_v8 = vpop.eup %2301 }
 0x4d5   : > { %1656 = vperm.xlu1 %2292, %v2298_v55   ;;  %v2304_v9 = vpop.eup %2303 }
 0x4d6   : > { %1646 = vperm.xlu0 %2291, %v2300_v51   ;;  %v2306_v11 = vpop.eup %2305 }
 0x4d7   : > { %v2308_v14 = vpop.eup %2307 }
 0x4d9   : > { %1666 = vperm.xlu1 %2292, %v2302_v8  }
 0x4da   : > { %1661 = vperm.xlu0 %2291, %v2304_v9  }
 0x4dd   : > { %1676 = vperm.xlu1 %2292, %v2306_v11  }
 0x4de   : > { %1671 = vperm.xlu0 %2291, %v2308_v14  }
 0x54c   : > { %v1652_v10 = vpop.permute.xlu1 %1651 }
 0x54d   : > { %v1681_v17 = vmul.f32 %v1652_v10, %v1617_v15  ;;  %v1642_v18 = vpop.permute.xlu0 %1641 }
 0x54e   : > { %v1679_v19 = vmul.f32 %v1642_v18, %v1615_v16 }
 0x54f   : > { %1689 = vst [vmem:[%s2730_s3 + $0x10] sm:$0xff] %v1681_v17 }
 0x550   : > { %1687 = vst [vmem:[%s2730_s3] sm:$0xff] %v1679_v19  ;;  %v1657_v21 = vpop.permute.xlu1 %1656 }
 0x551   : > { %v1682_v22 = vmul.f32 %v1657_v21, %v1618_v12  ;;  %v1647_v23 = vpop.permute.xlu0 %1646 }
 0x552   : > { %v1680_v3 = vmul.f32 %v1647_v23, %v1616_v20 }
 0x553   : > { %1690 = vst [vmem:[%s2730_s3 + $0x18] sm:$0xff] %v1682_v22 }
 0x554   : > { %1688 = vst [vmem:[%s2730_s3 + $0x8] sm:$0xff] %v1680_v3  ;;  %v1667_v26 = vpop.permute.xlu1 %1666 }
 0x555   : > { %v1684_v58 = vmul.f32 %v1667_v26, %v1620_v24  ;;  %v1662_v13 = vpop.permute.xlu0 %1661 }
 0x556   : > { %v1683_v27 = vmul.f32 %v1662_v13, %v1619_v25 }
 0x557   : > { %1692 = vst [vmem:[%s2730_s3 + $0x28] sm:$0xff] %v1684_v58 }
 0x558   : > { %1691 = vst [vmem:[%s2730_s3 + $0x20] sm:$0xff] %v1683_v27  ;;  %v1677_v29 = vpop.permute.xlu1 %1676 }
 0x559   : > { %v1686_v30 = vmul.f32 %v1677_v29, %v1622_v28  ;;  %v1672_v59 = vpop.permute.xlu0 %1671 }
 0x55a   : > { %v1685_v31 = vmul.f32 %v1672_v59, %v1621_v56 }
 0x55b   : > { %1694 = vst [vmem:[%s2730_s3 + $0x38] sm:$0xff] %v1686_v30 }
 0x55c   : > { %1693 = vst [vmem:[%s2730_s3 + $0x30] sm:$0xff] %v1685_v31 }
 0x55d PF: > { %1701 = sbr.rel (!%p2581_p0) target bundleno = 1386 (0x56a), region = 170  ;;  %s3311_s27 = sld [smem:[#allocation9_spill]] (%p2581_p0)  ;;  %v1751_v60 = vld [vmem:[%s2730_s3] sm:$0xff] (%p2581_p0)  ;;  %v1753_v33 = vld [vmem:[%s2730_s3 + $0x8] sm:$0xff] (%p2581_p0)  ;;  %v1755_v34 = vld [vmem:[%s2730_s3 + $0x10] sm:$0xff] (%p2581_p0) }
 0x55e   : > { %s2003_s5 = sshll.u32 (%p2581_p0), %s2395_s29, 4  ;;  %v1757_v62 = vld [vmem:[%s2730_s3 + $0x18] sm:$0xff] (%p2581_p0)  ;;  %v1761_v32 = vld [vmem:[%s2730_s3 + $0x28] sm:$0xff] (%p2581_p0)  ;;  %s3312_s21 = sld [smem:[#allocation21_spill]] (%p2581_p0) }
 0x55f   : > { %v1759_v35 = vld [vmem:[%s2730_s3 + $0x20] sm:$0xff] (%p2581_p0) }
 0x562   : > { %v1765_v63 = vld [vmem:[%s2730_s3 + $0x38] sm:$0xff] }
 0x563   : > { %s1706_s25 = sadd.s32 %s3311_s27, %s2003_s5  ;;  %v1763_v36 = vld [vmem:[%s2730_s3 + $0x30] sm:$0xff] }
 0x564   : > { %s2004_s15 = sshll.u32 %s1706_s25, 3 }
 0x565   : > { %s1708_s30 = scalar_lea.vmem %s3312_s21, %s2004_s15 }
 0x566   : > { %1752 = vst [vmem:[%s1708_s30] sm:$0xff] %v1751_v60  ;;  %1754 = vst [vmem:[%s1708_s30 + $0x10] sm:$0xff] %v1753_v33 }
 0x567   : > { %1756 = vst [vmem:[%s1708_s30 + $0x20] sm:$0xff] %v1755_v34  ;;  %1758 = vst [vmem:[%s1708_s30 + $0x30] sm:$0xff] %v1757_v62 }
 0x568   : > { %1760 = vst [vmem:[%s1708_s30 + $0x40] sm:$0xff] %v1759_v35  ;;  %1762 = vst [vmem:[%s1708_s30 + $0x50] sm:$0xff] %v1761_v32 }
 0x569   : > { %1764 = vst [vmem:[%s1708_s30 + $0x60] sm:$0xff] %v1763_v36  ;;  %1766 = vst [vmem:[%s1708_s30 + $0x70] sm:$0xff] %v1765_v63 }
 0x56a PF: > { %s16_s9 = sadd.s32 1, %s2411_s9   ;;  %s3314_s27 = sld [smem:[#allocation10_spill]] }
 0x56b   : > { %p3228_p11 = scmp.ge.s32.totalorder %s16_s9, 14   ;;  %s3315_s14 = sld [smem:[#allocation11_spill]] }
 0x56c   : > { %s3316_s30 = sld [smem:[#allocation12_spill]]  ;;  %s3320_s21 = smov %s2367_s22 }
 0x56d   : > { %s3317_s20 = sld [smem:[#allocation13_spill]]  ;;  %s3321_s22 = smov %s2563_s4 }
 0x56e   : > { %s3318_s8 = sld [smem:[#allocation14_spill]]  ;;  %s3322_s23 = smov %s2375_s24 }
 0x56f   : > { %s3323_s24 = smov %s2557_s10  ;;  %s3324_s25 = smov %s2383_s26 }
 0x570   : > { %s3325_s26 = smov %s2566_s1  ;;  %s3326_s28 = smov %s2403_s7 }
 0x571   : > { %s3327_s29 = smov %s3315_s14  ;;  %15 = sbr.rel (!%p3228_p11) target bundleno = 15 (0xf), region = 264 }
 0x573   : > { %s3328_s7 = smov %s3317_s20 }

// kernel: cca2_forward.6
= control target key start
LH: loop header
LB: loop body
LE: loop exit
PB: predicated region body
PF: predicated region fallthrough
CT: control target
= control target key end

     0   :  { %s3205_s0 = inlined_call_operand.vmem [shape: f32[2,64,256], index: 0, kind: input, shape index: {}]   ;;  %s3206_s1 = inlined_call_operand.vmem [shape: f32[2,96,192], index: 1, kind: input, shape index: {}]   ;;  %s3207_s2 = inlined_call_operand.vmem [shape: f32[192,512], index: 2, kind: input, shape index: {}, may-alias: {2,3}]   ;;  %s3208_s3 = inlined_call_operand.vmem [shape: f32[192,512], index: 3, kind: input, shape index: {}, may-alias: {2,3}]   ;;  %s3209_s4 = inlined_call_operand.vmem [shape: f32[1,512], index: 4, kind: input, shape index: {}, may-alias: {4,5}]   ;;  %s3210_s5 = inlined_call_operand.vmem [shape: f32[1,512], index: 5, kind: input, shape index: {}, may-alias: {4,5}]   ;;  %s3211_s6 = inlined_call_operand.vmem [shape: f32[2,64,256], index: 6, kind: output, shape index: {}]  }
   0x1   :  { %3214 = sst [smem:[#allocation11_spill]] %s3209_s4 }
   0x2   :  { %3215 = sst [smem:[#allocation12_spill]] %s3210_s5 }
   0x3   :  { %3216 = sst [smem:[#allocation13_spill]] %s3211_s6 }
   0x4   :  { %s2408_s21 = smov 0   ;;  %s2410_s22 = smov 0  }
   0x5   :  { %s2412_s23 = smov 0   ;;  %s2414_s24 = smov 0  }
   0x6   :  { %s2416_s25 = smov 0   ;;  %s2418_s26 = smov 0  }
   0x7   :  { %s2420_s27 = smov 0   ;;  %s2422_s28 = smov 0  }
   0x8   :  { %s2424_s29 = smov 0   ;;  %s2426_s30 = smov 0  }
   0x9   :  { %s2428_s7 = smov 0  }
   0xa LB: > { %s1948_s8 = sadd.s32 4294967295, %s2368_s7   ;;  %s38_s9 = sadd.s32 1, %s2360_s29  ;;  %s2368_s7 = sphi %s2428_s7, %s16_s7   ;;  %s2364_s30 = sphi %s2426_s30, %s3237_s30   ;;  %s2360_s29 = sphi %s2424_s29, %s3236_s29   ;;  %s2356_s28 = sphi %s2422_s28, %s3235_s28   ;;  %s2352_s27 = sphi %s2420_s27, %s3234_s27   ;;  %s2348_s26 = sphi %s2418_s26, %s3233_s26   ;;  %s2344_s25 = sphi %s2416_s25, %s3232_s25   ;;  %s2340_s24 = sphi %s2414_s24, %s3231_s24   ;;  %s2336_s23 = sphi %s2412_s23, %s3230_s23   ;;  %s2332_s22 = sphi %s2410_s22, %s3229_s22   ;;  %s2328_s21 = sphi %s2408_s21, %s3228_s21  }
   0xb   : > { %p40_p0 = scmp.ge.s32.totalorder %s38_s9, 2  ;;  %s42_s10 = sadd.s32 1, %s2364_s30 }
   0xc   : > { %s53_s11 = sadd.s32 1, %s2348_s26  ;;  %p60_p1 = scmp.ne.s32.totalorder %s2348_s26, %s2344_s25 }
   0xd   : > { %s3239_s9 = smov (%p40_p0, %s38_s9), 0  ;;  %s3241_s10 = smov (!%p40_p0, %s42_s10), %s2364_s30 }
   0xe   : > { %3217 = sst [smem:[#allocation9_spill]] %s3239_s9  ;;  %s49_s12 = ssub.s32 %s2360_s29, %s3239_s9 }
   0xf   : > { %p61_p2 = scmp.eq.s32.totalorder %s2368_s7, 0  ;;  %p44_p3 = scmp.ge.s32.totalorder %s3241_s10, 2 }
  0x10   : > { %p105_p4 = scmp.eq.s32.totalorder %s49_s12, 0  ;;  %s107_s14 = sadd.s32 1, %s2340_s24 }
  0x11   : > { %p2480_p5 = por %p61_p2, %p60_p1  ;;  %s3243_s10 = smov (%p44_p3, %s3241_s10), 0 }
  0x12   : > { %3219 = sst [smem:[#allocation10_spill]] %s3243_s10  ;;  %s46_s16 = ssub.s32 %s2364_s30, %s3243_s10 }
  0x13   : > { %s2488_s15 = scalar_select %p105_p4, %s2340_s24, %s107_s14  }
  0x14   : > { %p114_p6 = scmp.ne.s32.totalorder %s2340_s24, %s2336_s23  ;;  %s50_s17 = sor.u32 %s49_s12, %s46_s16 }
  0x15   : > { %s130_s18 = sadd.s32 2, %s2360_s29  ;;  %p51_p7 = scmp.eq.s32.totalorder %s50_s17, 0 }
  0x16   : > { %p2497_p8 = por %p114_p6, %p61_p2  ;;  %s131_s20 = sadd.s32 2, %s3239_s9 }
  0x17   : > { %s135_s6 = sadd.s32 1, %s2332_s22  ;;  %s132_s4 = ssub.s32 %s130_s18, %s131_s20 }
  0x18   : > { %s2504_s5 = scalar_select %p51_p7, %s2348_s26, %s53_s11  }
  0x19   : > { %p142_p9 = scmp.ne.s32.totalorder %s2332_s22, %s2328_s21  ;;  %p133_p10 = scmp.eq.s32.totalorder %s132_s4, 0 }
  0x1a   : > { %p230_p11 = scmp.eq.s32.totalorder %s1948_s8, 3  ;;  %p1951_p0 = scmp.ge.s32.totalorder %s2368_s7, 4 }
  0x1b   : > { %p2510_p12 = por %p142_p9, %p61_p2 }
  0x1c   : > { %s2515_s12 = scalar_select %p133_p10, %s2332_s22, %s135_s6  }
  0x1d   : > { %p2520_p13 = por %p230_p11, %p60_p1  ;;  %252 = sbr.rel (%p1951_p0) target bundleno = 100 (0x64), region = 16 }
  0x22   : > { %255 = sbr.rel (!%p2480_p5) target bundleno = 44 (0x2c), region = 20  ;;  %s257_s4 = sand.u32 (%p2480_p5), 1, %s2348_s26  }
  0x23   : > { %s1953_s8 = sshll.u32 (%p2480_p5), %s2364_s30, 4  ;;  %s1952_s11 = sshll.u32 (%p2480_p5), %s257_s4, 6 }
  0x24   : > { %s264_s17 = sadd.s32 (%p2480_p5), %s2360_s29, %s1953_s8  ;;  %s259_s9 = scalar_lea.vmem (%p2480_p5), [#allocation5], %s1952_s11 }
  0x25   : > { %s1954_s6 = sshll.u32 (%p2480_p5), %s264_s17, 3 }
  0x26   : > { %s266_s10 = scalar_lea.vmem (%p2480_p5), %s3205_s0, %s1954_s6 }
  0x27   : > { %v309_v0 = vld [vmem:[%s266_s10] sm:$0xff]  ;;  %v311_v1 = vld [vmem:[%s266_s10 + $0x10] sm:$0xff] }
  0x28   : > { %v313_v2 = vld [vmem:[%s266_s10 + $0x20] sm:$0xff]  ;;  %310 = vst [vmem:[%s259_s9] sm:$0xff] %v309_v0  ;;  %312 = vst [vmem:[%s259_s9 + $0x8] sm:$0xff] %v311_v1  ;;  %v315_v3 = vld [vmem:[%s266_s10 + $0x30] sm:$0xff] }
  0x29   : > { %314 = vst [vmem:[%s259_s9 + $0x10] sm:$0xff] %v313_v2  ;;  %v317_v4 = vld [vmem:[%s266_s10 + $0x40] sm:$0xff]  ;;  %v319_v5 = vld [vmem:[%s266_s10 + $0x50] sm:$0xff]  ;;  %316 = vst [vmem:[%s259_s9 + $0x18] sm:$0xff] %v315_v3 }
  0x2a   : > { %318 = vst [vmem:[%s259_s9 + $0x20] sm:$0xff] %v317_v4  ;;  %320 = vst [vmem:[%s259_s9 + $0x28] sm:$0xff] %v319_v5  ;;  %v321_v6 = vld [vmem:[%s266_s10 + $0x60] sm:$0xff]  ;;  %v323_v7 = vld [vmem:[%s266_s10 + $0x70] sm:$0xff] }
  0x2b   : > { %322 = vst [vmem:[%s259_s9 + $0x30] sm:$0xff] %v321_v6  ;;  %324 = vst [vmem:[%s259_s9 + $0x38] sm:$0xff] %v323_v7 }
  0x2c PF: > { %344 = sbr.rel (!%p2497_p8) target bundleno = 72 (0x48), region = 62  ;;  %s346_s13 = sand.u32 (%p2497_p8), 1, %s2340_s24  }
  0x2d   : > { %s1955_s4 = sshll.u32 (%p2497_p8), %s2360_s29, 3  ;;  %s2136_s8 = smul.u32 (%p2497_p8), 192, %s346_s13 }
  0x2e   : > { %s2540_s6 = scalar_lea.vmem (%p2497_p8), %s3207_s2, %s1955_s4 }
  0x2f   : > { %v425_v8 = vld [vmem:[%s2540_s6] sm:$0xff] (%p2497_p8)  ;;  %s2548_s9 = scalar_lea.vmem (%p2497_p8), [#allocation6], %s2136_s8 }
  0x30   : > { %v427_v9 = vld [vmem:[%s2540_s6 + $0x20] sm:$0xff] (%p2497_p8)  ;;  %426 = vst [vmem:[%s2548_s9] sm:$0xff] (%p2497_p8), %v425_v8 }
  0x31   : > { %v429_v10 = vld [vmem:[%s2540_s6 + $0x40] sm:$0xff]  ;;  %428 = vst [vmem:[%s2548_s9 + $0x8] sm:$0xff] %v427_v9 }
  0x32   : > { %v431_v11 = vld [vmem:[%s2540_s6 + $0x60] sm:$0xff]  ;;  %430 = vst [vmem:[%s2548_s9 + $0x10] sm:$0xff] %v429_v10 }
  0x33   : > { %v433_v12 = vld [vmem:[%s2540_s6 + $0x80] sm:$0xff]  ;;  %432 = vst [vmem:[%s2548_s9 + $0x18] sm:$0xff] %v431_v11 }
  0x34   : > { %v435_v13 = vld [vmem:[%s2540_s6 + $0xa0] sm:$0xff]  ;;  %434 = vst [vmem:[%s2548_s9 + $0x20] sm:$0xff] %v433_v12 }
  0x35   : > { %436 = vst [vmem:[%s2548_s9 + $0x28] sm:$0xff] %v435_v13  ;;  %v437_v14 = vld [vmem:[%s2540_s6 + $0xc0] sm:$0xff] }
  0x36   : > { %v439_v15 = vld [vmem:[%s2540_s6 + $0xe0] sm:$0xff]  ;;  %438 = vst [vmem:[%s2548_s9 + $0x30] sm:$0xff] %v437_v14 }
  0x37   : > { %v441_v16 = vld [vmem:[%s2540_s6 + $0x100] sm:$0xff]  ;;  %440 = vst [vmem:[%s2548_s9 + $0x38] sm:$0xff] %v439_v15 }
  0x38   : > { %442 = vst [vmem:[%s2548_s9 + $0x40] sm:$0xff] %v441_v16  ;;  %v443_v17 = vld [vmem:[%s2540_s6 + $0x120] sm:$0xff] }
  0x39   : > { %v445_v18 = vld [vmem:[%s2540_s6 + $0x140] sm:$0xff]  ;;  %444 = vst [vmem:[%s2548_s9 + $0x48] sm:$0xff] %v443_v17 }
  0x3a   : > { %v447_v19 = vld [vmem:[%s2540_s6 + $0x160] sm:$0xff]  ;;  %446 = vst [vmem:[%s2548_s9 + $0x50] sm:$0xff] %v445_v18 }
  0x3b   : > { %448 = vst [vmem:[%s2548_s9 + $0x58] sm:$0xff] %v447_v19  ;;  %v449_v20 = vld [vmem:[%s2540_s6 + $0x180] sm:$0xff] }
  0x3c   : > { %v451_v21 = vld [vmem:[%s2540_s6 + $0x1a0] sm:$0xff]  ;;  %450 = vst [vmem:[%s2548_s9 + $0x60] sm:$0xff] %v449_v20 }
  0x3d   : > { %v453_v22 = vld [vmem:[%s2540_s6 + $0x1c0] sm:$0xff]  ;;  %452 = vst [vmem:[%s2548_s9 + $0x68] sm:$0xff] %v451_v21 }
  0x3e   : > { %454 = vst [vmem:[%s2548_s9 + $0x70] sm:$0xff] %v453_v22  ;;  %v455_v23 = vld [vmem:[%s2540_s6 + $0x1e0] sm:$0xff] }
  0x3f   : > { %v457_v24 = vld [vmem:[%s2540_s6 + $0x200] sm:$0xff]  ;;  %456 = vst [vmem:[%s2548_s9 + $0x78] sm:$0xff] %v455_v23 }
  0x40   : > { %v459_v25 = vld [vmem:[%s2540_s6 + $0x220] sm:$0xff]  ;;  %458 = vst [vmem:[%s2548_s9 + $0x80] sm:$0xff] %v457_v24 }
  0x41   : > { %460 = vst [vmem:[%s2548_s9 + $0x88] sm:$0xff] %v459_v25  ;;  %v461_v26 = vld [vmem:[%s2540_s6 + $0x240] sm:$0xff] }
  0x42   : > { %v463_v27 = vld [vmem:[%s2540_s6 + $0x260] sm:$0xff]  ;;  %462 = vst [vmem:[%s2548_s9 + $0x90] sm:$0xff] %v461_v26 }
  0x43   : > { %v465_v28 = vld [vmem:[%s2540_s6 + $0x280] sm:$0xff]  ;;  %464 = vst [vmem:[%s2548_s9 + $0x98] sm:$0xff] %v463_v27 }
  0x44   : > { %466 = vst [vmem:[%s2548_s9 + $0xa0] sm:$0xff] %v465_v28  ;;  %v467_v29 = vld [vmem:[%s2540_s6 + $0x2a0] sm:$0xff] }
  0x45   : > { %v469_v30 = vld [vmem:[%s2540_s6 + $0x2c0] sm:$0xff]  ;;  %468 = vst [vmem:[%s2548_s9 + $0xa8] sm:$0xff] %v467_v29 }
  0x46   : > { %v471_v31 = vld [vmem:[%s2540_s6 + $0x2e0] sm:$0xff]  ;;  %470 = vst [vmem:[%s2548_s9 + $0xb0] sm:$0xff] %v469_v30 }
  0x47   : > { %472 = vst [vmem:[%s2548_s9 + $0xb8] sm:$0xff] %v471_v31 }
  0x48 PF: > { %478 = sbr.rel (!%p2510_p12) target bundleno = 100 (0x64), region = 100  ;;  %s480_s10 = sand.u32 (%p2510_p12), 1, %s2332_s22  }
  0x49   : > { %s1956_s19 = sshll.u32 (%p2510_p12), %s2360_s29, 3  ;;  %s2137_s18 = smul.u32 (%p2510_p12), 192, %s480_s10 }
  0x4a   : > { %s2599_s4 = scalar_lea.vmem (%p2510_p12), %s3208_s3, %s1956_s19 }
  0x4b   : > { %v1957_v32 = vld [vmem:[%s2599_s4 + $0x10] sm:$0xff] (%p2510_p12)  ;;  %s2607_s14 = scalar_lea.vmem (%p2510_p12), [#allocation7], %s2137_s18 }
  0x4c   : > { %v1958_v33 = vld [vmem:[%s2599_s4 + $0x30] sm:$0xff] (%p2510_p12)  ;;  %561 = vst [vmem:[%s2607_s14] sm:$0xff] (%p2510_p12), %v1957_v32 }
  0x4d   : > { %v1959_v34 = vld [vmem:[%s2599_s4 + $0x50] sm:$0xff]  ;;  %563 = vst [vmem:[%s2607_s14 + $0x8] sm:$0xff] %v1958_v33 }
  0x4e   : > { %v1960_v35 = vld [vmem:[%s2599_s4 + $0x70] sm:$0xff]  ;;  %565 = vst [vmem:[%s2607_s14 + $0x10] sm:$0xff] %v1959_v34 }
  0x4f   : > { %v1961_v36 = vld [vmem:[%s2599_s4 + $0x90] sm:$0xff]  ;;  %567 = vst [vmem:[%s2607_s14 + $0x18] sm:$0xff] %v1960_v35 }
  0x50   : > { %v1962_v37 = vld [vmem:[%s2599_s4 + $0xb0] sm:$0xff]  ;;  %569 = vst [vmem:[%s2607_s14 + $0x20] sm:$0xff] %v1961_v36 }
  0x51   : > { %571 = vst [vmem:[%s2607_s14 + $0x28] sm:$0xff] %v1962_v37  ;;  %v1963_v38 = vld [vmem:[%s2599_s4 + $0xd0] sm:$0xff] }
  0x52   : > { %v1964_v39 = vld [vmem:[%s2599_s4 + $0xf0] sm:$0xff]  ;;  %573 = vst [vmem:[%s2607_s14 + $0x30] sm:$0xff] %v1963_v38 }
  0x53   : > { %v1965_v40 = vld [vmem:[%s2599_s4 + $0x110] sm:$0xff]  ;;  %575 = vst [vmem:[%s2607_s14 + $0x38] sm:$0xff] %v1964_v39 }
  0x54   : > { %577 = vst [vmem:[%s2607_s14 + $0x40] sm:$0xff] %v1965_v40  ;;  %v1966_v41 = vld [vmem:[%s2599_s4 + $0x130] sm:$0xff] }
  0x55   : > { %v1967_v42 = vld [vmem:[%s2599_s4 + $0x150] sm:$0xff]  ;;  %579 = vst [vmem:[%s2607_s14 + $0x48] sm:$0xff] %v1966_v41 }
  0x56   : > { %v1968_v43 = vld [vmem:[%s2599_s4 + $0x170] sm:$0xff]  ;;  %581 = vst [vmem:[%s2607_s14 + $0x50] sm:$0xff] %v1967_v42 }
  0x57   : > { %583 = vst [vmem:[%s2607_s14 + $0x58] sm:$0xff] %v1968_v43  ;;  %v1969_v44 = vld [vmem:[%s2599_s4 + $0x190] sm:$0xff] }
  0x58   : > { %v1970_v45 = vld [vmem:[%s2599_s4 + $0x1b0] sm:$0xff]  ;;  %585 = vst [vmem:[%s2607_s14 + $0x60] sm:$0xff] %v1969_v44 }
  0x59   : > { %v1971_v46 = vld [vmem:[%s2599_s4 + $0x1d0] sm:$0xff]  ;;  %587 = vst [vmem:[%s2607_s14 + $0x68] sm:$0xff] %v1970_v45 }
  0x5a   : > { %589 = vst [vmem:[%s2607_s14 + $0x70] sm:$0xff] %v1971_v46  ;;  %v1972_v47 = vld [vmem:[%s2599_s4 + $0x1f0] sm:$0xff] }
  0x5b   : > { %v1973_v48 = vld [vmem:[%s2599_s4 + $0x210] sm:$0xff]  ;;  %591 = vst [vmem:[%s2607_s14 + $0x78] sm:$0xff] %v1972_v47 }
  0x5c   : > { %v1974_v49 = vld [vmem:[%s2599_s4 + $0x230] sm:$0xff]  ;;  %593 = vst [vmem:[%s2607_s14 + $0x80] sm:$0xff] %v1973_v48 }
  0x5d   : > { %595 = vst [vmem:[%s2607_s14 + $0x88] sm:$0xff] %v1974_v49  ;;  %v1975_v50 = vld [vmem:[%s2599_s4 + $0x250] sm:$0xff] }
  0x5e   : > { %v1976_v51 = vld [vmem:[%s2599_s4 + $0x270] sm:$0xff]  ;;  %597 = vst [vmem:[%s2607_s14 + $0x90] sm:$0xff] %v1975_v50 }
  0x5f   : > { %v1977_v52 = vld [vmem:[%s2599_s4 + $0x290] sm:$0xff]  ;;  %599 = vst [vmem:[%s2607_s14 + $0x98] sm:$0xff] %v1976_v51 }
  0x60   : > { %601 = vst [vmem:[%s2607_s14 + $0xa0] sm:$0xff] %v1977_v52  ;;  %v1978_v53 = vld [vmem:[%s2599_s4 + $0x2b0] sm:$0xff] }
  0x61   : > { %v1979_v54 = vld [vmem:[%s2599_s4 + $0x2d0] sm:$0xff]  ;;  %603 = vst [vmem:[%s2607_s14 + $0xa8] sm:$0xff] %v1978_v53 }
  0x62   : > { %v1980_v55 = vld [vmem:[%s2599_s4 + $0x2f0] sm:$0xff]  ;;  %605 = vst [vmem:[%s2607_s14 + $0xb0] sm:$0xff] %v1979_v54 }
  0x63   : > { %607 = vst [vmem:[%s2607_s14 + $0xb8] sm:$0xff] %v1980_v55 }
  0x64 PF: > { %p1981_p1 = scmp.ge.s32.totalorder %s2368_s7, 1  ;;  %p626_p2 = scmp.lt.s32.totalorder %s2368_s7, 5 }
  0x66   : > { %p627_p3 = pnand %p1981_p1, %p626_p2 }
  0x67   : > { %s640_s8 = sand.u32 (!%p627_p3), 1, %s2336_s23   ;;  %p702_p4 = scmp.lt.s32.totalorder (!%p627_p3), %s2356_s28, 1 }
  0x68   : > { %630 = sbr.rel (%p627_p3) target bundleno = 1249 (0x4e1), region = 146  ;;  %s633_s18 = sand.u32 (!%p627_p3), 1, %s2344_s25  }
  0x69   : > { %s2138_s11 = smul.u32 (!%p627_p3), 192, %s640_s8  ;;  %s2819_s20 = sshll.u32 (!%p627_p3), %s633_s18, 6 }
  0x6a   : > { %s2822_s13 = scalar_lea.vmem (!%p627_p3), [#allocation5], %s2819_s20  ;;  %s647_s4 = sand.u32 (!%p627_p3), 1, %s2328_s21  }
  0x6b   : > { %s2658_s6 = scalar_lea.vmem (!%p627_p3), [#allocation6], %s2138_s11  ;;  %s2139_s14 = smul.u32 (!%p627_p3), 192, %s647_s4 }
  0x6c   : > { %p713_p5 = scmp.lt.s32.totalorder (!%p627_p3), %s2352_s27, 3 }
  0x6d   : > { %v2370_v56 = vmov 0.0   ;;  %s703_s17 = scalar_select %p702_p4, %s2356_s28, 1  ;;  %v790_v57 = vld [vmem:[%s2658_s6 + $0x78] sm:$0xff]  ;;  %v789_v58 = vld [vmem:[%s2658_s6 + $0x70] sm:$0xff]  ;;  %v788_v59 = vld [vmem:[%s2658_s6 + $0x68] sm:$0xff]  ;;  %vm806_vm0 = vcmask 523264  }
  0x6e   : > { %843 = vmatprep.subr.mxu0 %v2370_v56  ;;  %999 = vmatprep.subr.mxu1 %v2370_v56  ;;  %v787_v60 = vld [vmem:[%s2658_s6 + $0x60] sm:$0xff]  ;;  %v786_v61 = vld [vmem:[%s2658_s6 + $0x58] sm:$0xff]  ;;  %v785_v62 = vld [vmem:[%s2658_s6 + $0x50] sm:$0xff]  ;;  %s2826_s8 = scalar_lea.vmem [#allocation7], %s2139_s14  ;;  %vm726_vm1 = vcmask 7168   ;;  %vm1245_vm2 = vcmask 785408  }
  0x6f   : > { %844 = vmatpush1.msra.mxu0 %v790_v57  ;;  %s2140_s23 = smul.u32 192, %s703_s17  ;;  %v784_v0 = vld [vmem:[%s2658_s6 + $0x48] sm:$0xff]  ;;  %v783_v1 = vld [vmem:[%s2658_s6 + $0x40] sm:$0xff]  ;;  %v782_v2 = vld [vmem:[%s2658_s6 + $0x38] sm:$0xff]  ;;  %s3223_s17 = sld [smem:[#allocation11_spill]]  ;;  %735 = vst.msk [vmem:[#allocation3] sm:$0xff] %vm726_vm1, %v2370_v56 }
  0x70   : > { %845 = vmatprep.subr.mxu0 %v2370_v56  ;;  %v781_v3 = vld [vmem:[%s2658_s6 + $0x30] sm:$0xff]  ;;  %v780_v4 = vld [vmem:[%s2658_s6 + $0x28] sm:$0xff]  ;;  %v779_v5 = vld [vmem:[%s2658_s6 + $0x20] sm:$0xff]  ;;  %s714_s21 = scalar_select %p713_p5, %s2352_s27, 3  ;;  %736 = vst.msk [vmem:[#allocation3 + $0x8] sm:$0xff] %vm726_vm1, %v2370_v56 }
  0x71   : > { %846 = vmatpush1.msra.mxu0 %v789_v58  ;;  %s2669_s19 = scalar_lea.vmem %s3206_s1, %s2140_s23  ;;  %v778_v6 = vld [vmem:[%s2658_s6 + $0x18] sm:$0xff]  ;;  %v777_v7 = vld [vmem:[%s2658_s6 + $0x10] sm:$0xff]  ;;  %v776_v8 = vld [vmem:[%s2658_s6 + $0x8] sm:$0xff]  ;;  %737 = vst.msk [vmem:[#allocation3 + $0x10] sm:$0xff] %vm726_vm1, %v2370_v56  ;;  %s716_s23 = sadd.s32 2, %s2352_s27 }
  0x72   : > { %847 = vmatprep.subr.mxu0 %v2370_v56  ;;  %v752_v63 = vld [vmem:[%s2669_s19 + $0x8] sm:$0xff]  ;;  %v775_v9 = vld [vmem:[%s2658_s6] sm:$0xff]  ;;  %v798_v10 = vld [vmem:[%s2658_s6 + $0xb8] sm:$0xff]  ;;  %738 = vst.msk [vmem:[#allocation3 + $0x18] sm:$0xff] %vm726_vm1, %v2370_v56  ;;  %p717_p6 = scmp.lt.s32.totalorder %s716_s23, 3 }
  0x73   : > { %848 = vmatpush1.msra.mxu0 %v788_v59  ;;  %1986 = vmatprep.mubr.msk.f32.mxu0 %vm806_vm0, %v752_v63  ;;  %v797_v11 = vld [vmem:[%s2658_s6 + $0xb0] sm:$0xff]  ;;  %v796_v12 = vld [vmem:[%s2658_s6 + $0xa8] sm:$0xff]  ;;  %v795_v13 = vld [vmem:[%s2658_s6 + $0xa0] sm:$0xff]  ;;  %739 = vst.msk [vmem:[#allocation3 + $0x20] sm:$0xff] %vm726_vm1, %v2370_v56 }
  0x74   : > { %849 = vmatprep.subr.mxu0 %v2370_v56  ;;  %1999 = vmatprep.mubr.msk.f32.mxu1 %vm806_vm0, %v752_v63  ;;  %v794_v14 = vld [vmem:[%s2658_s6 + $0x98] sm:$0xff]  ;;  %v793_v15 = vld [vmem:[%s2658_s6 + $0x90] sm:$0xff]  ;;  %v792_v16 = vld [vmem:[%s2658_s6 + $0x88] sm:$0xff]  ;;  %740 = vst.msk [vmem:[#allocation3 + $0x28] sm:$0xff] %vm726_vm1, %v2370_v56  ;;  %s3245_s23 = smov (!%p717_p6, %s716_s23), 3 }
  0x75   : > { %850 = vmatpush1.msra.mxu0 %v787_v60  ;;  %v791_v17 = vld [vmem:[%s2658_s6 + $0x80] sm:$0xff]  ;;  %v2719_v19 = vld [vmem:[%s2669_s19 + $0x18] sm:$0xff]  ;;  %v2725_v20 = vld [vmem:[%s2669_s19 + $0x10] sm:$0xff]  ;;  %s715_s6 = scalar_lea.vmem %s3223_s17, %s714_s21  ;;  %741 = vst.msk [vmem:[#allocation3 + $0x30] sm:$0xff] %vm726_vm1, %v2370_v56  ;;  %s3225_s21 = sld [smem:[#allocation13_spill]] (%p2520_p13) }
  0x76   : > { %851 = vmatprep.subr.mxu0 %v2370_v56  ;;  %v2715_v18 = vld [vmem:[%s2669_s19] sm:$0xff]  ;;  %v2728_v21 = vld [vmem:[%s2669_s19 + $0x28] sm:$0xff]  ;;  %v2737_v23 = vld [vmem:[%s2669_s19 + $0x38] sm:$0xff]  ;;  %742 = vst.msk [vmem:[#allocation3 + $0x38] sm:$0xff] %vm726_vm1, %v2370_v56 }
  0x77   : > { %852 = vmatpush1.msra.mxu0 %v786_v61  ;;  %v2734_v22 = vld [vmem:[%s2669_s19 + $0x20] sm:$0xff]  ;;  %v2743_v24 = vld [vmem:[%s2669_s19 + $0x30] sm:$0xff]  ;;  %v2746_v25 = vld [vmem:[%s2669_s19 + $0x48] sm:$0xff] }
  0x78   : > { %853 = vmatprep.subr.mxu0 %v2370_v56  ;;  %v2752_v26 = vld [vmem:[%s2669_s19 + $0x40] sm:$0xff]  ;;  %v2755_v27 = vld [vmem:[%s2669_s19 + $0x58] sm:$0xff]  ;;  %v2761_v28 = vld [vmem:[%s2669_s19 + $0x50] sm:$0xff] }
  0x79   : > { %854 = vmatpush1.msra.mxu0 %v785_v62  ;;  %v2764_v29 = vld [vmem:[%s2669_s19 + $0x68] sm:$0xff]  ;;  %v2770_v30 = vld [vmem:[%s2669_s19 + $0x60] sm:$0xff]  ;;  %v2773_v31 = vld [vmem:[%s2669_s19 + $0x78] sm:$0xff] }
  0x7a   : > { %855 = vmatprep.subr.mxu0 %v2370_v56  ;;  %v2779_v32 = vld [vmem:[%s2669_s19 + $0x70] sm:$0xff]  ;;  %v2782_v33 = vld [vmem:[%s2669_s19 + $0x88] sm:$0xff]  ;;  %v2788_v34 = vld [vmem:[%s2669_s19 + $0x80] sm:$0xff] }
  0x7b   : > { %856 = vmatpush1.msra.mxu0 %v784_v0  ;;  %v2791_v35 = vld [vmem:[%s2669_s19 + $0x98] sm:$0xff]  ;;  %v2797_v36 = vld [vmem:[%s2669_s19 + $0x90] sm:$0xff]  ;;  %v2800_v37 = vld [vmem:[%s2669_s19 + $0xa8] sm:$0xff] }
  0x7c   : > { %857 = vmatprep.subr.mxu0 %v2370_v56  ;;  %v2806_v38 = vld [vmem:[%s2669_s19 + $0xa0] sm:$0xff]  ;;  %v2809_v39 = vld [vmem:[%s2669_s19 + $0xb8] sm:$0xff]  ;;  %v2815_v40 = vld [vmem:[%s2669_s19 + $0xb0] sm:$0xff]  ;;  %s3224_s19 = sld [smem:[#allocation12_spill]] }
  0x7d   : > { %858 = vmatpush1.msra.mxu0 %v783_v1  ;;  %v1124_v41 = vld [vmem:[%s2822_s13] sm:$0xff]  ;;  %v983_v42 = vld [vmem:[%s2826_s8 + $0x78] sm:$0xff]  ;;  %v982_v43 = vld [vmem:[%s2826_s8 + $0x70] sm:$0xff] }
  0x7e   : > { %859 = vmatprep.subr.mxu0 %v2370_v56  ;;  %1000 = vmatpush1.msra.mxu1 %v983_v42  ;;  %v981_v44 = vld [vmem:[%s2826_s8 + $0x68] sm:$0xff]  ;;  %v980_v45 = vld [vmem:[%s2826_s8 + $0x60] sm:$0xff]  ;;  %v979_v46 = vld [vmem:[%s2826_s8 + $0x58] sm:$0xff] }
  0x7f   : > { %860 = vmatpush1.msra.mxu0 %v782_v2  ;;  %1001 = vmatprep.subr.mxu1 %v2370_v56  ;;  %v978_v47 = vld [vmem:[%s2826_s8 + $0x50] sm:$0xff]  ;;  %v977_v48 = vld [vmem:[%s2826_s8 + $0x48] sm:$0xff]  ;;  %v976_v49 = vld [vmem:[%s2826_s8 + $0x40] sm:$0xff] }
  0x80   : > { %861 = vmatprep.subr.mxu0 %v2370_v56  ;;  %1002 = vmatpush1.msra.mxu1 %v982_v43  ;;  %v975_v50 = vld [vmem:[%s2826_s8 + $0x38] sm:$0xff]  ;;  %v974_v51 = vld [vmem:[%s2826_s8 + $0x30] sm:$0xff]  ;;  %v973_v53 = vld [vmem:[%s2826_s8 + $0x28] sm:$0xff] }
  0x81   : > { %862 = vmatpush1.msra.mxu0 %v781_v3  ;;  %1003 = vmatprep.subr.mxu1 %v2370_v56 }
  0x82   : > { %863 = vmatprep.subr.mxu0 %v2370_v56  ;;  %1004 = vmatpush1.msra.mxu1 %v981_v44  ;;  %s719_s18 = scalar_lea.vmem %s3224_s19, %s3245_s23 }
  0x83   : > { %864 = vmatpush1.msra.mxu0 %v780_v4  ;;  %1005 = vmatprep.subr.mxu1 %v2370_v56 }
  0x84   : > { %865 = vmatprep.subr.mxu0 %v2370_v56  ;;  %1006 = vmatpush1.msra.mxu1 %v980_v45 }
  0x85   : > { %866 = vmatpush1.msra.mxu0 %v779_v5  ;;  %1007 = vmatprep.subr.mxu1 %v2370_v56 }
  0x86   : > { %867 = vmatprep.subr.mxu0 %v2370_v56  ;;  %1008 = vmatpush1.msra.mxu1 %v979_v46 }
  0x87   : > { %868 = vmatpush1.msra.mxu0 %v778_v6  ;;  %1009 = vmatprep.subr.mxu1 %v2370_v56 }
  0x88   : > { %869 = vmatprep.subr.mxu0 %v2370_v56  ;;  %1010 = vmatpush1.msra.mxu1 %v978_v47 }
  0x89   : > { %870 = vmatpush1.msra.mxu0 %v777_v7  ;;  %1011 = vmatprep.subr.mxu1 %v2370_v56 }
  0x8a   : > { %871 = vmatprep.subr.mxu0 %v2370_v56  ;;  %1012 = vmatpush1.msra.mxu1 %v977_v48 }
  0x8b   : > { %872 = vmatpush1.msra.mxu0 %v776_v8  ;;  %1013 = vmatprep.subr.mxu1 %v2370_v56 }
  0x8c   : > { %873 = vmatprep.subr.mxu0 %v2370_v56  ;;  %1014 = vmatpush1.msra.mxu1 %v976_v49 }
  0x8d   : > { %874 = vmatpush1.msra.mxu0 %v775_v9  ;;  %1015 = vmatprep.subr.mxu1 %v2370_v56 }
  0x8e   : > { %891 = vmatprep.subr.mxu0 %v2370_v56  ;;  %1016 = vmatpush1.msra.mxu1 %v975_v50  ;;  %v1125_v50 = vld [vmem:[%s2822_s13 + $0x8] sm:$0xff] }
  0x8f   : > { %892 = vmatpush2.msra.mxu0 %v798_v10  ;;  %1017 = vmatprep.subr.mxu1 %v2370_v56 }
  0x90   : > { %893 = vmatprep.subr.mxu0 %v2370_v56  ;;  %1018 = vmatpush1.msra.mxu1 %v974_v51  ;;  %v1126_v51 = vld [vmem:[%s2822_s13 + $0x10] sm:$0xff] }
  0x91   : > { %894 = vmatpush2.msra.mxu0 %v797_v11  ;;  %1019 = vmatprep.subr.mxu1 %v2370_v56 }
  0x92   : > { %895 = vmatprep.subr.mxu0 %v2370_v56  ;;  %1020 = vmatpush1.msra.mxu1 %v973_v53  ;;  %v1127_v53 = vld [vmem:[%s2822_s13 + $0x18] sm:$0xff] }
  0x93   : > { %896 = vmatpush2.msra.mxu0 %v796_v12  ;;  %1021 = vmatprep.subr.mxu1 %v2370_v56  ;;  %v1985_v12 = vld [vmem:[%s715_s6] ss:$0 sm:$0xff] }
  0x94   : > { %897 = vmatprep.subr.mxu0 %v2370_v56 }
  0x95   : > { %898 = vmatpush2.msra.mxu0 %v795_v13 }
  0x96   : > { %899 = vmatprep.subr.mxu0 %v2370_v56 }
  0x97   : > { %900 = vmatpush2.msra.mxu0 %v794_v14 }
  0x98   : > { %901 = vmatprep.subr.mxu0 %v2370_v56 }
  0x99   : > { %902 = vmatpush2.msra.mxu0 %v793_v15 }
  0x9a   : > { %903 = vmatprep.subr.mxu0 %v2370_v56 }
  0x9b   : > { %904 = vmatpush2.msra.mxu0 %v792_v16 }
  0x9c   : > { %905 = vmatprep.subr.mxu0 %v2370_v56 }
  0x9d   : > { %906 = vmatpush2.msra.mxu0 %v791_v17 }
  0x9e   : > { %908 = vmatmul.mubr.f32.vlgmr.msra.gmra.mxu0 %v2715_v18 }
  0x9f   : > { %1987 = vmatprep.mubr.msk.f32.mxu0 %vm806_vm0, %v2719_v19 }
  0xa2   : > { %913 = vmatmul.mubr.f32.gmra.mxu0 %v2725_v20 }
  0xa3   : > { %1988 = vmatprep.mubr.msk.f32.mxu0 %vm806_vm0, %v2728_v21 }
  0xa6   : > { %918 = vmatmul.mubr.f32.gmra.mxu0 %v2734_v22 }
  0xa7   : > { %1989 = vmatprep.mubr.msk.f32.mxu0 %vm806_vm0, %v2737_v23 }
  0xaa   : > { %923 = vmatmul.mubr.f32.gmra.mxu0 %v2743_v24 }
  0xab   : > { %1990 = vmatprep.mubr.msk.f32.mxu0 %vm806_vm0, %v2746_v25 }
  0xae   : > { %928 = vmatmul.mubr.f32.gmra.mxu0 %v2752_v26 }
  0xaf   : > { %1991 = vmatprep.mubr.msk.f32.mxu0 %vm806_vm0, %v2755_v27 }
  0xb2   : > { %933 = vmatmul.mubr.f32.gmra.mxu0 %v2761_v28 }
  0xb3   : > { %1992 = vmatprep.mubr.msk.f32.mxu0 %vm806_vm0, %v2764_v29 }
  0xb6   : > { %938 = vmatmul.mubr.f32.gmra.mxu0 %v2770_v30 }
  0xb7   : > { %1993 = vmatprep.mubr.msk.f32.mxu0 %vm806_vm0, %v2773_v31 }
  0xba   : > { %943 = vmatmul.mubr.f32.gmra.mxu0 %v2779_v32 }
  0xbb   : > { %1994 = vmatprep.mubr.msk.f32.mxu0 %vm806_vm0, %v2782_v33 }
  0xbe   : > { %948 = vmatmul.mubr.f32.gmra.mxu0 %v2788_v34 }
  0xbf   : > { %1995 = vmatprep.mubr.msk.f32.mxu0 %vm806_vm0, %v2791_v35 }
  0xc2   : > { %953 = vmatmul.mubr.f32.gmra.mxu0 %v2797_v36 }
  0xc3   : > { %1996 = vmatprep.mubr.msk.f32.mxu0 %vm806_vm0, %v2800_v37 }
  0xc6   : > { %958 = vmatmul.mubr.f32.gmra.mxu0 %v2806_v38 }
  0xc7   : > { %1997 = vmatprep.mubr.msk.f32.mxu0 %vm806_vm0, %v2809_v39 }
  0xca   : > { %963 = vmatmul.mubr.f32.gmra.mxu0 %v2815_v40 }
  0xcb   : > { %2088 = vmatprep.mubr.f32.mxu0 %v1124_v41 }
 0x15e   : > { %v2846_v52 = vpop.f32.mrf.mxu0 }
 0x15f   : > { %v910_v49 = vadd.f32 %v1985_v12, %v2846_v52  ;;  %v1131_v52 = vld [vmem:[%s2822_s13 + $0x38] sm:$0xff] }
 0x160   : > { %v911_v54 = vpop.f32.mrf.mxu0 }
 0x161   : > { %v1128_v54 = vld [vmem:[%s2822_s13 + $0x20] sm:$0xff] }
 0x162   : > { %v914_v55 = vpop.f32.mrf.mxu0 }
 0x163   : > { %v915_v48 = vadd.f32 %v1985_v12, %v914_v55  ;;  %v1129_v55 = vld [vmem:[%s2822_s13 + $0x28] sm:$0xff] }
 0x164   : > { %v916_v57 = vpop.f32.mrf.mxu0 }
 0x165   : > { %v1130_v57 = vld [vmem:[%s2822_s13 + $0x30] sm:$0xff]  ;;  %s3147_s13 = scalar_lea.vmem [#allocation8], %s2819_s20  ;;  %s2020_s20 = sshll.u32 (%p2520_p13), %s2356_s28, 4 }
 0x166   : > { %v919_v58 = vpop.f32.mrf.mxu0  ;;  %s1726_s4 = sadd.s32 (%p2520_p13), %s2352_s27, %s2020_s20 }
 0x167   : > { %v920_v47 = vadd.f32 %v1985_v12, %v919_v58  ;;  %v972_v58 = vld [vmem:[%s2826_s8 + $0x20] sm:$0xff]  ;;  %s2021_s16 = sshll.u32 (%p2520_p13), %s1726_s4, 3 }
 0x168   : > { %v921_v59 = vpop.f32.mrf.mxu0  ;;  %1022 = vmatpush1.msra.mxu1 %v972_v58  ;;  %s1728_s25 = scalar_lea.vmem (%p2520_p13), %s3225_s21, %s2021_s16 }
 0x169   : > { %1023 = vmatprep.subr.mxu1 %v2370_v56  ;;  %v971_v59 = vld [vmem:[%s2826_s8 + $0x18] sm:$0xff] }
 0x16a   : > { %v924_v60 = vpop.f32.mrf.mxu0  ;;  %1024 = vmatpush1.msra.mxu1 %v971_v59 }
 0x16b   : > { %v925_v46 = vadd.f32 %v1985_v12, %v924_v60  ;;  %1025 = vmatprep.subr.mxu1 %v2370_v56  ;;  %v970_v60 = vld [vmem:[%s2826_s8 + $0x10] sm:$0xff] }
 0x16c   : > { %v926_v61 = vpop.f32.mrf.mxu0  ;;  %1026 = vmatpush1.msra.mxu1 %v970_v60 }
 0x16d   : > { %1027 = vmatprep.subr.mxu1 %v2370_v56  ;;  %v969_v61 = vld [vmem:[%s2826_s8 + $0x8] sm:$0xff] }
 0x16e   : > { %v929_v62 = vpop.f32.mrf.mxu0  ;;  %1028 = vmatpush1.msra.mxu1 %v969_v61 }
 0x16f   : > { %v930_v45 = vadd.f32 %v1985_v12, %v929_v62  ;;  %1029 = vmatprep.subr.mxu1 %v2370_v56  ;;  %v968_v62 = vld [vmem:[%s2826_s8] sm:$0xff] }
 0x170   : > { %v931_v63 = vpop.f32.mrf.mxu0  ;;  %1030 = vmatpush1.msra.mxu1 %v968_v62 }
 0x171   : > { %v991_v63 = vld [vmem:[%s2826_s8 + $0xb8] sm:$0xff]  ;;  %1047 = vmatprep.subr.mxu1 %v2370_v56 }
 0x172   : > { %v934_v0 = vpop.f32.mrf.mxu0  ;;  %1048 = vmatpush2.msra.mxu1 %v991_v63 }
 0x173   : > { %v935_v44 = vadd.f32 %v1985_v12, %v934_v0  ;;  %1049 = vmatprep.subr.mxu1 %v2370_v56  ;;  %v990_v0 = vld [vmem:[%s2826_s8 + $0xb0] sm:$0xff] }
 0x174   : > { %v936_v1 = vpop.f32.mrf.mxu0  ;;  %1050 = vmatpush2.msra.mxu1 %v990_v0 }
 0x175   : > { %v989_v1 = vld [vmem:[%s2826_s8 + $0xa8] sm:$0xff]  ;;  %1051 = vmatprep.subr.mxu1 %v2370_v56 }
 0x176   : > { %v939_v2 = vpop.f32.mrf.mxu0  ;;  %1052 = vmatpush2.msra.mxu1 %v989_v1 }
 0x177   : > { %v940_v43 = vadd.f32 %v1985_v12, %v939_v2  ;;  %v988_v2 = vld [vmem:[%s2826_s8 + $0xa0] sm:$0xff]  ;;  %1053 = vmatprep.subr.mxu1 %v2370_v56 }
 0x178   : > { %v941_v3 = vpop.f32.mrf.mxu0  ;;  %1054 = vmatpush2.msra.mxu1 %v988_v2 }
 0x179   : > { %v987_v3 = vld [vmem:[%s2826_s8 + $0x98] sm:$0xff]  ;;  %1055 = vmatprep.subr.mxu1 %v2370_v56 }
 0x17a   : > { %v944_v4 = vpop.f32.mrf.mxu0  ;;  %1056 = vmatpush2.msra.mxu1 %v987_v3 }
 0x17b   : > { %v945_v42 = vadd.f32 %v1985_v12, %v944_v4  ;;  %v986_v4 = vld [vmem:[%s2826_s8 + $0x90] sm:$0xff]  ;;  %1057 = vmatprep.subr.mxu1 %v2370_v56 }
 0x17c   : > { %v946_v5 = vpop.f32.mrf.mxu0  ;;  %1058 = vmatpush2.msra.mxu1 %v986_v4 }
 0x17d   : > { %v985_v5 = vld [vmem:[%s2826_s8 + $0x88] sm:$0xff]  ;;  %1059 = vmatprep.subr.mxu1 %v2370_v56 }
 0x17e   : > { %v949_v6 = vpop.f32.mrf.mxu0  ;;  %1060 = vmatpush2.msra.mxu1 %v985_v5 }
 0x17f   : > { %v950_v41 = vadd.f32 %v1985_v12, %v949_v6  ;;  %v2371_v6 = vmov -inf   ;;  %1061 = vmatprep.subr.mxu1 %v2370_v56 }
 0x180   : > { %v951_v7 = vpop.f32.mrf.mxu0  ;;  %727 = vst.msk [vmem:[#allocation2] sm:$0xff] %vm726_vm1, %v2371_v6  ;;  %728 = vst.msk [vmem:[#allocation2 + $0x8] sm:$0xff] %vm726_vm1, %v2371_v6 }
 0x181   : > { %729 = vst.msk [vmem:[#allocation2 + $0x10] sm:$0xff] %vm726_vm1, %v2371_v6  ;;  %730 = vst.msk [vmem:[#allocation2 + $0x18] sm:$0xff] %vm726_vm1, %v2371_v6  ;;  %v984_v7 = vld [vmem:[%s2826_s8 + $0x80] sm:$0xff] }
 0x182   : > { %v954_v8 = vpop.f32.mrf.mxu0  ;;  %731 = vst.msk [vmem:[#allocation2 + $0x20] sm:$0xff] %vm726_vm1, %v2371_v6  ;;  %732 = vst.msk [vmem:[#allocation2 + $0x28] sm:$0xff] %vm726_vm1, %v2371_v6  ;;  %1062 = vmatpush2.msra.mxu1 %v984_v7 }
 0x183   : > { %v955_v17 = vadd.f32 %v1985_v12, %v954_v8  ;;  %733 = vst.msk [vmem:[#allocation2 + $0x30] sm:$0xff] %vm726_vm1, %v2371_v6  ;;  %734 = vst.msk [vmem:[#allocation2 + $0x38] sm:$0xff] %vm726_vm1, %v2371_v6  ;;  %1064 = vmatmul.mubr.f32.vlgmr.msra.gmra.mxu1 %v2715_v18 }
 0x184   : > { %v956_v9 = vpop.f32.mrf.mxu0  ;;  %2000 = vmatprep.mubr.msk.f32.mxu1 %vm806_vm0, %v2719_v19 }
 0x186   : > { %v959_v10 = vpop.f32.mrf.mxu0 }
 0x187   : > { %v960_v16 = vadd.f32 %v1985_v12, %v959_v10  ;;  %1069 = vmatmul.mubr.f32.gmra.mxu1 %v2725_v20  ;;  %v3004_v58 = vld [vmem:[#allocation2 + $0x8] sm:$0xff] }
 0x188   : > { %v961_v11 = vpop.f32.mrf.mxu0  ;;  %2001 = vmatprep.mubr.msk.f32.mxu1 %vm806_vm0, %v2728_v21  ;;  %v3006_v59 = vld [vmem:[#allocation2 + $0x10] sm:$0xff]  ;;  %v3021_v3 = vld [vmem:[#allocation2 + $0x18] sm:$0xff] }
 0x189   : > { %v3023_v4 = vld [vmem:[#allocation2 + $0x20] sm:$0xff] }
 0x18a   : > { %v964_v13 = vpop.f32.mrf.mxu0 }
 0x18b   : > { %v965_v14 = vadd.f32 %v1985_v12, %v964_v13  ;;  %1074 = vmatmul.mubr.f32.gmra.mxu1 %v2734_v22 }
 0x18c   : > { %v966_v15 = vpop.f32.mrf.mxu0  ;;  %2002 = vmatprep.mubr.msk.f32.mxu1 %vm806_vm0, %v2737_v23 }
 0x18d   : > { %2064 = vmatprep.subr.mxu0 %v965_v14 }
 0x18e   : > { %2065 = vmatpush3.xpose.msra.mxu0 %v965_v14 }
 0x18f   : > { %2066 = vmatprep.subr.mxu0 %v960_v16  ;;  %1079 = vmatmul.mubr.f32.gmra.mxu1 %v2743_v24 }
 0x190   : > { %2003 = vmatprep.mubr.msk.f32.mxu1 %vm806_vm0, %v2746_v25 }
 0x192   : > { %2067 = vmatpush3.xpose.msra.mxu0 %v960_v16 }
 0x193   : > { %2068 = vmatprep.subr.mxu0 %v955_v17  ;;  %1084 = vmatmul.mubr.f32.gmra.mxu1 %v2752_v26 }
 0x194   : > { %2004 = vmatprep.mubr.msk.f32.mxu1 %vm806_vm0, %v2755_v27 }
 0x196   : > { %2069 = vmatpush3.xpose.msra.mxu0 %v955_v17 }
 0x197   : > { %2070 = vmatprep.subr.mxu0 %v950_v41  ;;  %1089 = vmatmul.mubr.f32.gmra.mxu1 %v2761_v28 }
 0x198   : > { %2005 = vmatprep.mubr.msk.f32.mxu1 %vm806_vm0, %v2764_v29 }
 0x19a   : > { %2071 = vmatpush3.xpose.msra.mxu0 %v950_v41 }
 0x19b   : > { %2072 = vmatprep.subr.mxu0 %v945_v42  ;;  %1094 = vmatmul.mubr.f32.gmra.mxu1 %v2770_v30 }
 0x19c   : > { %2006 = vmatprep.mubr.msk.f32.mxu1 %vm806_vm0, %v2773_v31 }
 0x19e   : > { %2073 = vmatpush3.xpose.msra.mxu0 %v945_v42 }
 0x19f   : > { %2074 = vmatprep.subr.mxu0 %v940_v43  ;;  %1099 = vmatmul.mubr.f32.gmra.mxu1 %v2779_v32  ;;  %v2372_v32 = vmov 0  }
 0x1a0   : > { %2007 = vmatprep.mubr.msk.f32.mxu1 %vm806_vm0, %v2782_v33  ;;  %2232 = vset.pattern.permute.xlu0 %v2372_v32 }
 0x1a1   : > { %2233 = vset.pattern.permute.xlu1 %v2372_v32 }
 0x1a2   : > { %2075 = vmatpush3.xpose.msra.mxu0 %v940_v43 }
 0x1a3   : > { %2076 = vmatprep.subr.mxu0 %v935_v44  ;;  %1104 = vmatmul.mubr.f32.gmra.mxu1 %v2788_v34 }
 0x1a4   : > { %2008 = vmatprep.mubr.msk.f32.mxu1 %vm806_vm0, %v2791_v35 }
 0x1a6   : > { %2077 = vmatpush3.xpose.msra.mxu0 %v935_v44 }
 0x1a7   : > { %2078 = vmatprep.subr.mxu0 %v930_v45  ;;  %1109 = vmatmul.mubr.f32.gmra.mxu1 %v2797_v36 }
 0x1a8   : > { %2009 = vmatprep.mubr.msk.f32.mxu1 %vm806_vm0, %v2800_v37 }
 0x1aa   : > { %2079 = vmatpush3.xpose.msra.mxu0 %v930_v45  ;;  %v2992_v45 = vld [vmem:[%s719_s18] ss:$0 sm:$0xff] }
 0x1ab   : > { %2080 = vmatprep.subr.mxu0 %v925_v46  ;;  %1114 = vmatmul.mubr.f32.gmra.mxu1 %v2806_v38 }
 0x1ac   : > { %2010 = vmatprep.mubr.msk.f32.mxu1 %vm806_vm0, %v2809_v39 }
 0x1ae   : > { %2081 = vmatpush3.xpose.msra.mxu0 %v925_v46 }
 0x1af   : > { %2082 = vmatprep.subr.mxu0 %v920_v47  ;;  %1119 = vmatmul.mubr.f32.gmra.mxu1 %v2815_v40 }
 0x1b2   : > { %2083 = vmatpush3.xpose.msra.mxu0 %v920_v47 }
 0x1b3   : > { %2084 = vmatprep.subr.mxu0 %v915_v48 }
 0x1b6   : > { %2085 = vmatpush3.xpose.msra.mxu0 %v915_v48 }
 0x1b7   : > { %2086 = vmatprep.subr.mxu0 %v910_v49 }
 0x1ba   : > { %2087 = vmatpush3.xpose.msra.mxu0 %v910_v49 }
 0x1bd   : > { %2089 = vmatmul.mubr.f32.vlgmr.msra.gmra.mxu0 %v1125_v50 }
 0x1be   : > { %2091 = vmatprep.mubr.f32.mxu0 %v1126_v51 }
 0x1c1   : > { %2092 = vmatmul.mubr.f32.gmra.mxu0 %v1127_v53  ;;  %v2997_v53 = vld [vmem:[#allocation2] sm:$0xff] }
 0x1c2   : > { %2094 = vmatprep.mubr.f32.mxu0 %v1128_v54 }
 0x1c5   : > { %2095 = vmatmul.mubr.f32.gmra.mxu0 %v1129_v55 }
 0x1c6   : > { %2097 = vmatprep.mubr.f32.mxu0 %v1130_v57 }
 0x1c9   : > { %2098 = vmatmul.mubr.f32.gmra.mxu0 %v1131_v52 }
 0x243   : > { %v2980_v34 = vpop.f32.mrf.mxu1 }
 0x245   : > { %v1067_v35 = vpop.f32.mrf.mxu1 }
 0x247   : > { %v2982_v36 = vpop.f32.mrf.mxu1 }
 0x249   : > { %v1072_v37 = vpop.f32.mrf.mxu1 }
 0x24b   : > { %v2984_v38 = vpop.f32.mrf.mxu1 }
 0x24c   : > { %v1076_v32 = vadd.f32 %v2992_v45, %v2984_v38  ;;  %v1071_v38 = vadd.f32 %v2992_v45, %v2982_v36 }
 0x24d   : > { %v1077_v39 = vpop.f32.mrf.mxu1 }
 0x24f   : > { %v2986_v40 = vpop.f32.mrf.mxu1 }
 0x251   : > { %v1082_v8 = vpop.f32.mrf.mxu1 }
 0x253   : > { %v1085_v9 = vpop.f32.mrf.mxu1 }
 0x254   : > { %v1086_v5 = vadd.f32 %v2992_v45, %v1085_v9  ;;  %v3066_v9 = vld [vmem:[#allocation2 + $0x38] sm:$0xff] }
 0x255   : > { %v1087_v10 = vpop.f32.mrf.mxu1 }
 0x256   : > { %v1066_v10 = vadd.f32 %v2992_v45, %v2980_v34 }
 0x257   : > { %v1090_v11 = vpop.f32.mrf.mxu1 }
 0x258   : > { %v1091_v0 = vadd.f32 %v2992_v45, %v1090_v11 }
 0x259   : > { %v1092_v12 = vpop.f32.mrf.mxu1 }
 0x25b   : > { %v1095_v13 = vpop.f32.mrf.mxu1 }
 0x25c   : > { %v1096_v60 = vadd.f32 %v2992_v45, %v1095_v13 }
 0x25d   : > { %v1097_v14 = vpop.f32.mrf.mxu1 }
 0x25f   : > { %v1100_v15 = vpop.f32.mrf.mxu1 }
 0x260   : > { %v1101_v57 = vadd.f32 %v2992_v45, %v1100_v15 }
 0x261   : > { %v1102_v16 = vpop.f32.mrf.mxu1 }
 0x263   : > { %v1105_v17 = vpop.f32.mrf.mxu1 }
 0x264   : > { %v1106_v54 = vadd.f32 %v2992_v45, %v1105_v17 }
 0x265   : > { %v1107_v41 = vpop.f32.mrf.mxu1 }
 0x267   : > { %v1110_v42 = vpop.f32.mrf.mxu1 }
 0x268   : > { %v1111_v51 = vadd.f32 %v2992_v45, %v1110_v42 }
 0x269   : > { %v1112_v43 = vpop.f32.mrf.mxu1 }
 0x26b   : > { %v1115_v44 = vpop.f32.mrf.mxu1 }
 0x26c   : > { %v1116_v48 = vadd.f32 %v2992_v45, %v1115_v44 }
 0x26d   : > { %v1117_v46 = vpop.f32.mrf.mxu1 }
 0x26f   : > { %v1120_v47 = vpop.f32.mrf.mxu1 }
 0x270   : > { %v1121_v49 = vadd.f32 %v2992_v45, %v1120_v47 }
 0x271   : > { %v1122_v50 = vpop.f32.mrf.mxu1 }
 0x272   : > { %2100 = vmatprep.subr.mxu1 %v1121_v49 }
 0x273   : > { %2101 = vmatpush3.msra.mxu1 %v1121_v49 }
 0x274   : > { %2102 = vmatprep.subr.mxu1 %v1116_v48 }
 0x275   : > { %2103 = vmatpush3.msra.mxu1 %v1116_v48 }
 0x276   : > { %2104 = vmatprep.subr.mxu1 %v1111_v51 }
 0x277   : > { %2105 = vmatpush3.msra.mxu1 %v1111_v51 }
 0x278   : > { %2106 = vmatprep.subr.mxu1 %v1106_v54 }
 0x279   : > { %2107 = vmatpush3.msra.mxu1 %v1106_v54 }
 0x27a   : > { %2108 = vmatprep.subr.mxu1 %v1101_v57 }
 0x27b   : > { %2109 = vmatpush3.msra.mxu1 %v1101_v57 }
 0x27c   : > { %2110 = vmatprep.subr.mxu1 %v1096_v60 }
 0x27d   : > { %v2948_v56 = vpop.f32.mrf.mxu0  ;;  %2111 = vmatpush3.msra.mxu1 %v1096_v60 }
 0x27e   : > { %v1249_v22 = vsel %vm1245_vm2, %v2948_v56, -inf  ;;  %2112 = vmatprep.subr.mxu1 %v1091_v0 }
 0x27f   : > { %v2950_v18 = vpop.f32.mrf.mxu0  ;;  %2113 = vmatpush3.msra.mxu1 %v1091_v0 }
 0x280   : > { %v1246_v19 = vsel %vm1245_vm2, %v2950_v18, -inf  ;;  %2114 = vmatprep.subr.mxu1 %v1086_v5 }
 0x281   : > { %1247 = vmax.xlane.f32.xlu0 %v1246_v19  ;;  %v2954_v20 = vpop.f32.mrf.mxu0  ;;  %2115 = vmatpush3.msra.mxu1 %v1086_v5 }
 0x282   : > { %v1255_v26 = vsel %vm1245_vm2, %v2954_v20, -inf }
 0x283   : > { %v2956_v21 = vpop.f32.mrf.mxu0 }
 0x284   : > { %v1252_v23 = vsel %vm1245_vm2, %v2956_v21, -inf }
 0x285   : > { %1250 = vmax.xlane.f32.xlu0 %v1249_v22  ;;  %1253 = vmax.xlane.f32.xlu1 %v1252_v23  ;;  %v2962_v24 = vpop.f32.mrf.mxu0  ;;  %v1081_v23 = vadd.f32 %v2992_v45, %v2986_v40 }
 0x286   : > { %v1261_v29 = vsel %vm1245_vm2, %v2962_v24, -inf }
 0x287   : > { %v2964_v25 = vpop.f32.mrf.mxu0  ;;  %2116 = vmatprep.subr.mxu1 %v1081_v23 }
 0x288   : > { %v1258_v27 = vsel %vm1245_vm2, %v2964_v25, -inf  ;;  %2117 = vmatpush3.msra.mxu1 %v1081_v23 }
 0x289   : > { %1256 = vmax.xlane.f32.xlu1 %v1255_v26  ;;  %1259 = vmax.xlane.f32.xlu0 %v1258_v27  ;;  %v2970_v28 = vpop.f32.mrf.mxu0 }
 0x28a   : > { %v1267_v33 = vsel %vm1245_vm2, %v2970_v28, -inf  ;;  %2118 = vmatprep.subr.mxu1 %v1076_v32 }
 0x28b   : > { %v2974_v30 = vpop.f32.mrf.mxu0  ;;  %2119 = vmatpush3.msra.mxu1 %v1076_v32 }
 0x28c   : > { %v1264_v31 = vsel %vm1245_vm2, %v2974_v30, -inf  ;;  %2120 = vmatprep.subr.mxu1 %v1071_v38 }
 0x28d   : > { %1262 = vmax.xlane.f32.xlu1 %v1261_v29  ;;  %1265 = vmax.xlane.f32.xlu0 %v1264_v31  ;;  %v3043_v29 = vld [vmem:[#allocation2 + $0x28] sm:$0xff]  ;;  %v3045_v31 = vld [vmem:[#allocation2 + $0x30] sm:$0xff] }
 0x28e   : > { %2121 = vmatpush3.msra.mxu1 %v1071_v38 }
 0x28f   : > { %2122 = vmatprep.subr.mxu1 %v1066_v10 }
 0x290   : > { %2123 = vmatpush3.msra.mxu1 %v1066_v10 }
 0x291   : > { %1268 = vmax.xlane.f32.xlu1 %v1267_v33 }
 0x30a   : > { %v1248_v55 = vpop.xlane.xlu0 %1247 }
 0x30b   : > { %v3002_v52 = vmax.f32 %v2997_v53, %v1248_v55 }
 0x30d   : > { %v1278_v61 = vsub.f32 %v2997_v53, %v3002_v52  ;;  %1624 = vst.msk [vmem:[#allocation2] sm:$0xff] %vm726_vm1, %v3002_v52  ;;  %1304 = vperm.xlu0 %2232, %v3002_v52  }
 0x30e   : > { %v1251_v62 = vpop.xlane.xlu0 %1250  ;;  %v1254_v63 = vpop.xlane.xlu1 %1253 }
 0x30f   : > { %v3016_v1 = vmax.f32 %v3004_v58, %v1251_v62  ;;  %v3019_v2 = vmax.f32 %v3006_v59, %v1254_v63 }
 0x311   : > { %v1279_v6 = vsub.f32 %v3004_v58, %v3016_v1  ;;  %1625 = vst.msk [vmem:[#allocation2 + $0x8] sm:$0xff] %vm726_vm1, %v3016_v1  ;;  %v1280_v7 = vsub.f32 %v3006_v59, %v3019_v2  ;;  %1626 = vst.msk [vmem:[#allocation2 + $0x10] sm:$0xff] %vm726_vm1, %v3019_v2  ;;  %1309 = vperm.xlu1 %2233, %v3016_v1  }
 0x312   : > { %v1257_v19 = vpop.xlane.xlu1 %1256  ;;  %v1260_v22 = vpop.xlane.xlu0 %1259 }
 0x313   : > { %v3038_v26 = vmax.f32 %v3021_v3, %v1257_v19  ;;  %v3041_v27 = vmax.f32 %v3023_v4, %v1260_v22 }
 0x315   : > { %v1281_v33 = vsub.f32 %v3021_v3, %v3038_v26  ;;  %1627 = vst.msk [vmem:[#allocation2 + $0x18] sm:$0xff] %vm726_vm1, %v3038_v26  ;;  %1319 = vperm.xlu1 %2233, %v3038_v26   ;;  %v1282_v35 = vsub.f32 %v3023_v4, %v3041_v27  ;;  %1628 = vst.msk [vmem:[#allocation2 + $0x20] sm:$0xff] %vm726_vm1, %v3041_v27 }
 0x316   : > { %v1263_v37 = vpop.xlane.xlu1 %1262  ;;  %v1266_v39 = vpop.xlane.xlu0 %1265 }
 0x317   : > { %v3061_v40 = vmax.f32 %v3043_v29, %v1263_v37  ;;  %v3064_v8 = vmax.f32 %v3045_v31, %v1266_v39  ;;  %v1292_v58 = vmul.f32 1.442695, %v1281_v33  ;;  %v1294_v1 = vmul.f32 1.442695, %v1282_v35  ;;  %v1367_v35 = vld [vmem:[#allocation3 + $0x8] sm:$0xff] }
 0x319   : > { %1314 = vperm.xlu1 %2233, %v3019_v2   ;;  %v1283_v11 = vsub.f32 %v3043_v29, %v3061_v40  ;;  %1629 = vst.msk [vmem:[#allocation2 + $0x28] sm:$0xff] %vm726_vm1, %v3061_v40  ;;  %v1284_v36 = vsub.f32 %v3045_v31, %v3064_v8  ;;  %1630 = vst.msk [vmem:[#allocation2 + $0x30] sm:$0xff] %vm726_vm1, %v3064_v8  ;;  %v1366_v29 = vld [vmem:[#allocation3] sm:$0xff] }
 0x31a   : > { %v1269_v12 = vpop.xlane.xlu1 %1268 }
 0x31b   : > { %v3080_v34 = vmax.f32 %v3066_v9, %v1269_v12  ;;  %v1288_v12 = vmul.f32 1.442695, %v1279_v6  ;;  %v1296_v53 = vmul.f32 1.442695, %v1283_v11  ;;  %v1298_v52 = vmul.f32 1.442695, %v1284_v36 }
 0x31c   : > { %v1369_v11 = vld [vmem:[#allocation3 + $0x18] sm:$0xff] }
 0x31d   : > { %1329 = vperm.xlu1 %2233, %v3061_v40   ;;  %v1285_v13 = vsub.f32 %v3066_v9, %v3080_v34  ;;  %1631 = vst.msk [vmem:[#allocation2 + $0x38] sm:$0xff] %vm726_vm1, %v3080_v34 }
 0x31f   : > { %v1300_v59 = vmul.f32 1.442695, %v1285_v13 }
 0x321   : > { %1324 = vperm.xlu1 %2233, %v3041_v27  }
 0x325   : > { %1334 = vperm.xlu1 %2233, %v3064_v8  }
 0x329   : > { %1339 = vperm.xlu1 %2233, %v3080_v34  }
 0x388   : > { %v1305_v14 = vpop.permute.xlu0 %1304 }
 0x389   : > { %v1342_v15 = vsub.f32 %v2950_v18, %v1305_v14 }
 0x38b   : > { %v1350_v16 = vmul.f32 1.442695, %v1342_v15  ;;  %v1286_v15 = vmul.f32 1.442695, %v1278_v61 }
 0x38c   : > { %v1310_v17 = vpop.permute.xlu1 %1309 }
 0x38d   : > { %2234 = vpow2.f32 %v1350_v16  ;;  %v1343_v41 = vsub.f32 %v2948_v56, %v1310_v17  ;;  %v1290_v16 = vmul.f32 1.442695, %v1280_v7  ;;  %v1368_v17 = vld [vmem:[#allocation3 + $0x10] sm:$0xff] }
 0x38f   : > { %v1352_v42 = vmul.f32 1.442695, %v1343_v41 }
 0x390   : > { %v1320_v43 = vpop.permute.xlu1 %1319 }
 0x391   : > { %2236 = vpow2.f32 %v1352_v42  ;;  %v1345_v44 = vsub.f32 %v2954_v20, %v1320_v43 }
 0x393   : > { %v1356_v45 = vmul.f32 1.442695, %v1345_v44 }
 0x394   : > { %v1315_v46 = vpop.permute.xlu1 %1314 }
 0x395   : > { %2238 = vpow2.f32 %v1356_v45  ;;  %v1344_v47 = vsub.f32 %v2956_v21, %v1315_v46  ;;  %v1371_v45 = vld [vmem:[#allocation3 + $0x28] sm:$0xff] }
 0x397   : > { %v1354_v48 = vmul.f32 1.442695, %v1344_v47 }
 0x398   : > { %v1330_v49 = vpop.permute.xlu1 %1329 }
 0x399   : > { %2240 = vpow2.f32 %v1354_v48  ;;  %v1347_v18 = vsub.f32 %v2962_v24, %v1330_v49 }
 0x39a   : > { %v2235_v50 = vpop.eup %2234 }
 0x39b   : > { %v1360_v51 = vmul.f32 1.442695, %v1347_v18  ;;  %2124 = vmatprep.mubr.msk.f32.mxu1 %vm1245_vm2, %v2235_v50  ;;  %v1382_v56 = vsel %vm1245_vm2, %v2235_v50, 0.0  ;;  %v1370_v18 = vld [vmem:[#allocation3 + $0x20] sm:$0xff] }
 0x39c   : > { %v1325_v54 = vpop.permute.xlu1 %1324  ;;  %1383 = vadd.xlane.f32.xlu1 %v1382_v56 }
 0x39d   : > { %2242 = vpow2.f32 %v1360_v51  ;;  %v1346_v20 = vsub.f32 %v2964_v25, %v1325_v54 }
 0x39e   : > { %v2237_v55 = vpop.eup %2236 }
 0x39f   : > { %v1358_v57 = vmul.f32 1.442695, %v1346_v20  ;;  %2125 = vmatmul.mubr.msk.f32.vlgmr.msra.gmra.mxu1 %vm1245_vm2, %v2237_v55  ;;  %v1385_v21 = vsel %vm1245_vm2, %v2237_v55, 0.0  ;;  %v1372_v20 = vld [vmem:[#allocation3 + $0x30] sm:$0xff] }
 0x3a0   : > { %1386 = vadd.xlane.f32.xlu0 %v1385_v21  ;;  %v1335_v60 = vpop.permute.xlu1 %1334 }
 0x3a1   : > { %2244 = vpow2.f32 %v1358_v57  ;;  %v1348_v24 = vsub.f32 %v2974_v30, %v1335_v60 }
 0x3a2   : > { %v2239_v62 = vpop.eup %2238 }
 0x3a3   : > { %v1362_v63 = vmul.f32 1.442695, %v1348_v24  ;;  %v1391_v0 = vsel %vm1245_vm2, %v2239_v62, 0.0 }
 0x3a4   : > { %v1340_v5 = vpop.permute.xlu1 %1339  ;;  %1392 = vadd.xlane.f32.xlu1 %v1391_v0 }
 0x3a5   : > { %2246 = vpow2.f32 %v1362_v63  ;;  %v1349_v25 = vsub.f32 %v2970_v28, %v1340_v5 }
 0x3a6   : > { %v2241_v19 = vpop.eup %2240 }
 0x3a7   : > { %v1364_v22 = vmul.f32 1.442695, %v1349_v25  ;;  %2127 = vmatprep.mubr.msk.f32.mxu1 %vm1245_vm2, %v2241_v19  ;;  %v1388_v23 = vsel %vm1245_vm2, %v2241_v19, 0.0 }
 0x3a8   : > { %1389 = vadd.xlane.f32.xlu0 %v1388_v23  ;;  %2128 = vmatmul.mubr.msk.f32.gmra.mxu1 %vm1245_vm2, %v2239_v62  ;;  %v1373_v62 = vld [vmem:[#allocation3 + $0x38] sm:$0xff] }
 0x3a9   : > { %2248 = vpow2.f32 %v1364_v22 }
 0x3aa   : > { %v2243_v30 = vpop.eup %2242  ;;  %2250 = vpow2.f32 %v1288_v12 }
 0x3ab   : > { %v1397_v32 = vsel %vm1245_vm2, %v2243_v30, 0.0  ;;  %2252 = vpow2.f32 %v1286_v15 }
 0x3ac   : > { %1398 = vadd.xlane.f32.xlu1 %v1397_v32  ;;  %2254 = vpow2.f32 %v1290_v16 }
 0x3ad   : > { %2256 = vpow2.f32 %v1292_v58 }
 0x3ae   : > { %v2245_v37 = vpop.eup %2244  ;;  %2258 = vpow2.f32 %v1294_v1 }
 0x3af   : > { %2130 = vmatprep.mubr.msk.f32.mxu1 %vm1245_vm2, %v2245_v37  ;;  %v1394_v39 = vsel %vm1245_vm2, %v2245_v37, 0.0  ;;  %2260 = vpow2.f32 %v1296_v53 }
 0x3b0   : > { %1395 = vadd.xlane.f32.xlu0 %v1394_v39  ;;  %2131 = vmatmul.mubr.msk.f32.gmra.mxu1 %vm1245_vm2, %v2243_v30  ;;  %2262 = vpow2.f32 %v1298_v52 }
 0x3b1   : > { %2264 = vpow2.f32 %v1300_v59 }
 0x3b2   : > { %v2247_v28 = vpop.eup %2246 }
 0x3b3   : > { %2133 = vmatprep.mubr.msk.f32.mxu1 %vm1245_vm2, %v2247_v28  ;;  %v1400_v38 = vsel %vm1245_vm2, %v2247_v28, 0.0 }
 0x3b4   : > { %1401 = vadd.xlane.f32.xlu0 %v1400_v38 }
 0x3b6   : > { %v2249_v10 = vpop.eup %2248 }
 0x3b7   : > { %2134 = vmatmul.mubr.msk.f32.gmra.mxu1 %vm1245_vm2, %v2249_v10  ;;  %v1403_v14 = vsel %vm1245_vm2, %v2249_v10, 0.0  ;;  %v2251_v61 = vpop.eup %2250 }
 0x3b8   : > { %1404 = vadd.xlane.f32.xlu1 %v1403_v14  ;;  %v2253_v2 = vpop.eup %2252  ;;  %v1375_v8 = vmul.f32 %v2251_v61, %v1367_v35 }
 0x3b9   : > { %v2255_v3 = vpop.eup %2254  ;;  %v1374_v31 = vmul.f32 %v2253_v2, %v1366_v29 }
 0x3ba   : > { %v2257_v4 = vpop.eup %2256  ;;  %v1376_v43 = vmul.f32 %v2255_v3, %v1368_v17 }
 0x3bb   : > { %v2259_v6 = vpop.eup %2258  ;;  %v1377_v34 = vmul.f32 %v2257_v4, %v1369_v11 }
 0x3bc   : > { %v2261_v7 = vpop.eup %2260  ;;  %v1378_v56 = vmul.f32 %v2259_v6, %v1370_v18 }
 0x3bd   : > { %v2263_v26 = vpop.eup %2262  ;;  %v1379_v48 = vmul.f32 %v2261_v7, %v1371_v45 }
 0x3be   : > { %v2265_v27 = vpop.eup %2264  ;;  %v1380_v21 = vmul.f32 %v2263_v26, %v1372_v20 }
 0x3bf   : > { %v1381_v5 = vmul.f32 %v2265_v27, %v1373_v62 }
 0x3c9   : > { %1438 = vperm.xlu1 %2233, %v2251_v61  }
 0x3ca   : > { %1433 = vperm.xlu0 %2232, %v2253_v2  }
 0x3cd   : > { %1443 = vperm.xlu1 %2233, %v2255_v3  }
 0x3ce   : > { %1448 = vperm.xlu0 %2232, %v2257_v4  }
 0x3d1   : > { %1453 = vperm.xlu1 %2233, %v2259_v6  }
 0x3d2   : > { %1458 = vperm.xlu0 %2232, %v2261_v7  }
 0x3d5   : > { %1463 = vperm.xlu1 %2233, %v2263_v26  }
 0x3d6   : > { %1468 = vperm.xlu0 %2232, %v2265_v27  }
 0x425   : > { %v1384_v33 = vpop.xlane.xlu1 %1383 }
 0x426   : > { %v1406_v40 = vadd.f32 %v1384_v33, %v1374_v31 }
 0x428   : > { %1415 = vst.msk [vmem:[#allocation3] sm:$0xff] %vm726_vm1, %v1406_v40 }
 0x429   : > { %v1387_v9 = vpop.xlane.xlu0 %1386 }
 0x42a   : > { %v1407_v36 = vadd.f32 %v1387_v9, %v1375_v8 }
 0x42c   : > { %1416 = vst.msk [vmem:[#allocation3 + $0x8] sm:$0xff] %vm726_vm1, %v1407_v36 }
 0x42d   : > { %v1393_v13 = vpop.xlane.xlu1 %1392 }
 0x42e   : > { %v1409_v41 = vadd.f32 %v1393_v13, %v1377_v34 }
 0x42f   : > { %v1643_v42 = vld [vmem:[#allocation3] sm:$0xff] }
 0x430   : > { %1418 = vst.msk [vmem:[#allocation3 + $0x18] sm:$0xff] %vm726_vm1, %v1409_v41  ;;  %2266 = vrcp.f32 %v1643_v42 }
 0x431   : > { %v1390_v44 = vpop.xlane.xlu0 %1389 }
 0x432   : > { %v1408_v46 = vadd.f32 %v1390_v44, %v1376_v43 }
 0x433   : > { %v1644_v47 = vld [vmem:[#allocation3 + $0x8] sm:$0xff] }
 0x434   : > { %1417 = vst.msk [vmem:[#allocation3 + $0x10] sm:$0xff] %vm726_vm1, %v1408_v46  ;;  %2268 = vrcp.f32 %v1644_v47 }
 0x435   : > { %v1399_v49 = vpop.xlane.xlu1 %1398 }
 0x436   : > { %v1411_v50 = vadd.f32 %v1399_v49, %v1379_v48 }
 0x437   : > { %v1646_v51 = vld [vmem:[#allocation3 + $0x18] sm:$0xff] }
 0x438   : > { %1420 = vst.msk [vmem:[#allocation3 + $0x28] sm:$0xff] %vm726_vm1, %v1411_v50  ;;  %2270 = vrcp.f32 %v1646_v51 }
 0x439   : > { %v1396_v54 = vpop.xlane.xlu0 %1395 }
 0x43a   : > { %v1410_v55 = vadd.f32 %v1396_v54, %v1378_v56 }
 0x43b   : > { %v1645_v57 = vld [vmem:[#allocation3 + $0x10] sm:$0xff] }
 0x43c   : > { %1419 = vst.msk [vmem:[#allocation3 + $0x20] sm:$0xff] %vm726_vm1, %v1410_v55  ;;  %2272 = vrcp.f32 %v1645_v57 }
 0x43d   : > { %v2267_v60 = vpop.eup %2266  ;;  %v1402_v24 = vpop.xlane.xlu0 %1401 }
 0x43e   : > { %v1412_v63 = vadd.f32 %v1402_v24, %v1380_v21  ;;  %1661 = vperm.xlu1 %2233, %v2267_v60  }
 0x43f   : > { %v1648_v0 = vld [vmem:[#allocation3 + $0x28] sm:$0xff] }
 0x440   : > { %1421 = vst.msk [vmem:[#allocation3 + $0x30] sm:$0xff] %vm726_vm1, %v1412_v63  ;;  %2274 = vrcp.f32 %v1648_v0 }
 0x441   : > { %v2269_v25 = vpop.eup %2268  ;;  %v1405_v19 = vpop.xlane.xlu1 %1404 }
 0x442   : > { %v1413_v22 = vadd.f32 %v1405_v19, %v1381_v5  ;;  %1666 = vperm.xlu0 %2232, %v2269_v25  }
 0x443   : > { %v1647_v23 = vld [vmem:[#allocation3 + $0x20] sm:$0xff] }
 0x444   : > { %1422 = vst.msk [vmem:[#allocation3 + $0x38] sm:$0xff] %vm726_vm1, %v1413_v22  ;;  %2276 = vrcp.f32 %v1647_v23 }
 0x445   : > { %v2271_v30 = vpop.eup %2270  ;;  %v1439_v14 = vpop.permute.xlu1 %1438 }
 0x446   : > { %1676 = vperm.xlu0 %2232, %v2271_v30   ;;  %v1434_v15 = vpop.permute.xlu0 %1433  ;;  %v1472_v7 = vmul.f32 0.0, %v1439_v14 }
 0x447   : > { %v1649_v32 = vld [vmem:[#allocation3 + $0x30] sm:$0xff]  ;;  %v1471_v2 = vmul.f32 0.0, %v1434_v15 }
 0x448   : > { %2278 = vrcp.f32 %v1649_v32 }
 0x449   : > { %v2273_v37 = vpop.eup %2272  ;;  %v1444_v16 = vpop.permute.xlu1 %1443 }
 0x44a   : > { %1671 = vperm.xlu1 %2233, %v2273_v37   ;;  %v1449_v58 = vpop.permute.xlu0 %1448  ;;  %v1473_v11 = vmul.f32 0.0, %v1444_v16 }
 0x44b   : > { %v1650_v39 = vld [vmem:[#allocation3 + $0x38] sm:$0xff]  ;;  %v1474_v33 = vmul.f32 0.0, %v1449_v58 }
 0x44c   : > { %2280 = vrcp.f32 %v1650_v39 }
 0x44d   : > { %v2275_v28 = vpop.eup %2274  ;;  %v1454_v1 = vpop.permute.xlu1 %1453 }
 0x44e   : > { %1686 = vperm.xlu0 %2232, %v2275_v28   ;;  %v1459_v52 = vpop.permute.xlu0 %1458  ;;  %v1475_v47 = vmul.f32 0.0, %v1454_v1 }
 0x44f   : > { %v1476_v41 = vmul.f32 0.0, %v1459_v52 }
 0x451   : > { %v2277_v38 = vpop.eup %2276  ;;  %v1464_v59 = vpop.permute.xlu1 %1463 }
 0x452   : > { %1681 = vperm.xlu1 %2233, %v2277_v38   ;;  %v1469_v4 = vpop.permute.xlu0 %1468  ;;  %v1477_v51 = vmul.f32 0.0, %v1464_v59 }
 0x453   : > { %v1478_v55 = vmul.f32 0.0, %v1469_v4 }
 0x455   : > { %v2279_v10 = vpop.eup %2278 }
 0x456   : > { %1691 = vperm.xlu1 %2233, %v2279_v10  }
 0x459   : > { %v2281_v12 = vpop.eup %2280 }
 0x45a   : > { %1696 = vperm.xlu0 %2232, %v2281_v12  }
 0x45f   : > { %v2126_v53 = vpop.f32.mrf.mxu1 }
 0x460   : > { %v1609_v27 = vadd.f32 %v2126_v53, %v1472_v7 }
 0x461   : > { %v1569_v61 = vpop.f32.mrf.mxu1 }
 0x462   : > { %v1608_v3 = vadd.f32 %v1569_v61, %v1471_v2 }
 0x468   : > { %v2129_v29 = vpop.f32.mrf.mxu1 }
 0x469   : > { %v1611_v40 = vadd.f32 %v2129_v29, %v1474_v33 }
 0x46a   : > { %v1579_v8 = vpop.f32.mrf.mxu1 }
 0x46b   : > { %v1610_v13 = vadd.f32 %v1579_v8, %v1473_v11 }
 0x470   : > { %v2132_v34 = vpop.f32.mrf.mxu1 }
 0x471   : > { %v1613_v44 = vadd.f32 %v2132_v34, %v1476_v41 }
 0x472   : > { %v1589_v43 = vpop.f32.mrf.mxu1 }
 0x473   : > { %v1612_v49 = vadd.f32 %v1589_v43, %v1475_v47 }
 0x477   : > { %v2135_v45 = vpop.f32.mrf.mxu1 }
 0x478   : > { %v1615_v21 = vadd.f32 %v2135_v45, %v1478_v55 }
 0x479   : > { %v1599_v18 = vpop.f32.mrf.mxu1 }
 0x47a   : > { %v1614_v54 = vadd.f32 %v1599_v18, %v1477_v51 }
 0x4b9   : > { %v1662_v6 = vpop.permute.xlu1 %1661 }
 0x4ba   : > { %v1699_v26 = vmul.f32 %v1662_v6, %v1608_v3 }
 0x4bc   : > { %1707 = vst [vmem:[%s3147_s13] sm:$0xff] %v1699_v26 }
 0x4bd   : > { %v1667_v31 = vpop.permute.xlu0 %1666 }
 0x4be   : > { %v1700_v35 = vmul.f32 %v1667_v31, %v1609_v27 }
 0x4c0   : > { %1708 = vst [vmem:[%s3147_s13 + $0x8] sm:$0xff] %v1700_v35 }
 0x4c1   : > { %v1677_v9 = vpop.permute.xlu0 %1676 }
 0x4c2   : > { %v1702_v36 = vmul.f32 %v1677_v9, %v1611_v40 }
 0x4c3   : > { %v1771_v62 = vld [vmem:[%s3147_s13] sm:$0xff] (%p2520_p13) }
 0x4c4   : > { %1710 = vst [vmem:[%s3147_s13 + $0x18] sm:$0xff] %v1702_v36  ;;  %1772 = vst [vmem:[%s1728_s25] sm:$0xff] (%p2520_p13), %v1771_v62 }
 0x4c5   : > { %v1672_v17 = vpop.permute.xlu1 %1671 }
 0x4c6   : > { %v1701_v42 = vmul.f32 %v1672_v17, %v1610_v13 }
 0x4c7   : > { %v1773_v63 = vld [vmem:[%s3147_s13 + $0x8] sm:$0xff] (%p2520_p13) }
 0x4c8   : > { %1709 = vst [vmem:[%s3147_s13 + $0x10] sm:$0xff] %v1701_v42  ;;  %1774 = vst [vmem:[%s1728_s25 + $0x10] sm:$0xff] (%p2520_p13), %v1773_v63 }
 0x4c9   : > { %v1687_v46 = vpop.permute.xlu0 %1686 }
 0x4ca   : > { %v1704_v48 = vmul.f32 %v1687_v46, %v1613_v44 }
 0x4cb   : > { %v1777_v5 = vld [vmem:[%s3147_s13 + $0x18] sm:$0xff] (%p2520_p13) }
 0x4cc   : > { %1712 = vst [vmem:[%s3147_s13 + $0x28] sm:$0xff] %v1704_v48  ;;  %1778 = vst [vmem:[%s1728_s25 + $0x30] sm:$0xff] (%p2520_p13), %v1777_v5 }
 0x4cd   : > { %v1682_v50 = vpop.permute.xlu1 %1681 }
 0x4ce   : > { %v1703_v56 = vmul.f32 %v1682_v50, %v1612_v49 }
 0x4cf   : > { %v1775_v0 = vld [vmem:[%s3147_s13 + $0x10] sm:$0xff] (%p2520_p13) }
 0x4d0   : > { %1711 = vst [vmem:[%s3147_s13 + $0x20] sm:$0xff] %v1703_v56  ;;  %1776 = vst [vmem:[%s1728_s25 + $0x20] sm:$0xff] (%p2520_p13), %v1775_v0 }
 0x4d1   : > { %v1692_v20 = vpop.permute.xlu1 %1691 }
 0x4d2   : > { %v1705_v57 = vmul.f32 %v1692_v20, %v1614_v54 }
 0x4d3   : > { %v1781_v19 = vld [vmem:[%s3147_s13 + $0x28] sm:$0xff] (%p2520_p13) }
 0x4d4   : > { %1713 = vst [vmem:[%s3147_s13 + $0x30] sm:$0xff] %v1705_v57  ;;  %1721 = sbr.rel (!%p2520_p13) target bundleno = 1249 (0x4e1), region = 170  ;;  %1782 = vst [vmem:[%s1728_s25 + $0x50] sm:$0xff] (%p2520_p13), %v1781_v19 }
 0x4d5   : > { %v1697_v60 = vpop.permute.xlu0 %1696 }
 0x4d6   : > { %v1706_v24 = vmul.f32 %v1697_v60, %v1615_v21 }
 0x4d7   : > { %v1779_v25 = vld [vmem:[%s3147_s13 + $0x20] sm:$0xff] (%p2520_p13) }
 0x4d8   : > { %1714 = vst [vmem:[%s3147_s13 + $0x38] sm:$0xff] %v1706_v24  ;;  %1780 = vst [vmem:[%s1728_s25 + $0x40] sm:$0xff] (%p2520_p13), %v1779_v25 }
 0x4db   : > { %v1783_v22 = vld [vmem:[%s3147_s13 + $0x30] sm:$0xff] }
 0x4dc   : > { %1784 = vst [vmem:[%s1728_s25 + $0x60] sm:$0xff] %v1783_v22 }
 0x4df   : > { %v1785_v23 = vld [vmem:[%s3147_s13 + $0x38] sm:$0xff] }
 0x4e0   : > { %1786 = vst [vmem:[%s1728_s25 + $0x70] sm:$0xff] %v1785_v23 }
 0x4e1 PF: > { %s16_s7 = sadd.s32 1, %s2368_s7   ;;  %s3226_s11 = sld [smem:[#allocation9_spill]] }
 0x4e2   : > { %p13_p7 = scmp.ge.s32.totalorder %s16_s7, 6   ;;  %s3227_s17 = sld [smem:[#allocation10_spill]] }
 0x4e3   : > { %s3228_s21 = smov %s2332_s22  ;;  %s3229_s22 = smov %s2515_s12 }
 0x4e4   : > { %s3230_s23 = smov %s2340_s24  ;;  %s3231_s24 = smov %s2488_s15 }
 0x4e5   : > { %s3232_s25 = smov %s2348_s26  ;;  %s3233_s26 = smov %s2504_s5 }
 0x4e6   : > { %s3234_s27 = smov %s2360_s29  ;;  %s3235_s28 = smov %s2364_s30 }
 0x4e7   : > { %s3236_s29 = smov %s3226_s11  ;;  %15 = sbr.rel (!%p13_p7) target bundleno = 10 (0xa), region = 264 }
 0x4e8   : > { %s3237_s30 = smov %s3227_s17 }

// kernel: cca2_forward.7
= control target key start
LH: loop header
LB: loop body
LE: loop exit
PB: predicated region body
PF: predicated region fallthrough
CT: control target
= control target key end

     0   :  { %12 = vsyncpa [#allocation4], 0  ;;  %s2806_s0 = inlined_call_operand.vmem [shape: f32[128,256], index: 0, kind: input, shape index: {}]   ;;  %s2807_s1 = inlined_call_operand.vmem [shape: f32[128,256], index: 1, kind: input, shape index: {}]   ;;  %s2808_s2 = inlined_call_operand.vmem [shape: f32[128,256], index: 2, kind: input, shape index: {}]   ;;  %s2809_s3 = inlined_call_operand.vmem [shape: f32[768,256], index: 3, kind: input, shape index: {}, may-alias: {3,4,5}]   ;;  %s2810_s4 = inlined_call_operand.vmem [shape: f32[768,256], index: 4, kind: input, shape index: {}, may-alias: {3,4,5}]   ;;  %s2811_s5 = inlined_call_operand.vmem [shape: f32[768,256], index: 5, kind: input, shape index: {}, may-alias: {3,4,5}]   ;;  %s2812_s6 = inlined_call_operand.vmem [shape: f32[1,256], index: 6, kind: input, shape index: {}]   ;;  %s2813_s7 = inlined_call_operand.hbm [shape: f32[128,256], index: 7, kind: output, shape index: {}]  }
   0x1   :  { %14 = vsyncpa [#allocation4 + $0x1], 0  ;;  %s1975_s24 = smov 0   ;;  %s1977_s25 = smov 0  }
   0x2   :  { %s1979_s26 = smov 0   ;;  %s1981_s27 = smov 0  }
   0x3   :  { %s1983_s28 = smov 0   ;;  %s1985_s29 = smov 0  }
   0x4 LB: > { %s1575_s30 = sadd.s32 4294967295, %s1930_s29   ;;  %s1576_s8 = sadd.s32 4294967294, %s1930_s29   ;;  %s1930_s29 = sphi %s1985_s29, %s20_s29   ;;  %s1926_s28 = sphi %s1983_s28, %s2821_s28   ;;  %s1922_s27 = sphi %s1981_s27, %s2820_s27   ;;  %s1918_s26 = sphi %s1979_s26, %s2819_s26   ;;  %s1914_s25 = sphi %s1977_s25, %s2818_s25   ;;  %s1910_s24 = sphi %s1975_s24, %s2817_s24  }
   0x5   : > { %s39_s9 = sadd.s32 1, %s1926_s28  ;;  %s246_s10 = sadd.s32 1, %s1918_s26 }
   0x6   : > { %p41_p0 = scmp.ge.s32.totalorder %s39_s9, 2  ;;  %p256_p1 = scmp.ne.s32.totalorder %s1918_s26, %s1914_s25 }
   0x7   : > { %p257_p2 = scmp.eq.s32.totalorder %s1575_s30, 1  ;;  %p262_p3 = scmp.ne.s32.totalorder %s1914_s25, %s1910_s24 }
   0x8   : > { %s2823_s9 = smov (%p41_p0, %s39_s9), 0  ;;  %p263_p5 = scmp.eq.s32.totalorder %s1576_s8, 1 }
   0x9   : > { %p2015_p4 = por %p257_p2, %p256_p1  ;;  %s241_s12 = ssub.s32 %s1926_s28, %s2823_s9 }
   0xa   : > { %p1583_p6 = scmp.ge.s32.totalorder %s1930_s29, 1  ;;  %p244_p7 = scmp.eq.s32.totalorder %s241_s12, 0 }
   0xb   : > { %p2022_p8 = por %p263_p5, %p262_p3  ;;  %p383_p9 = scmp.lt.s32.totalorder %s1930_s29, 3 }
   0xc   : > { %s2028_s14 = scalar_select %p244_p7, %s1918_s26, %s246_s10  }
   0xd   : > { %p384_p10 = pnand %p1583_p6, %p383_p9 }
   0xe   : > { %s1585_s21 = sshll.u32 (!%p384_p10), %s1922_s27, 3  ;;  %s1932_s8 = smov (!%p384_p10), [#allocation3]  }
   0xf   : > { %387 = sbr.rel (%p384_p10) target bundleno = 392 (0x188), region = 48  ;;  %p2333_p11 = scmp.lt.s32.totalorder (!%p384_p10), %s1585_s21, 15 }
  0x10   : > { %s1858_s10 = sshll.u32 (!%p384_p10), %s1932_s8, 4  ;;  %s1859_s10 = int_to_ptr.vmem [resolvable:$false] %s1858_s10 }
  0x14   : > { %v642_v0 = vld [vmem:[%s2809_s3 + $0xf8] sm:$0xff]  ;;  %v641_v2 = vld [vmem:[%s2809_s3 + $0xf0] sm:$0xff]  ;;  %v640_v4 = vld [vmem:[%s2809_s3 + $0xe8] sm:$0xff]  ;;  %s2825_s21 = smov (!%p2333_p11, %s1585_s21), 15 }
  0x15   : > { %v1625_v1 = vld [vmem:[%s2810_s4 + $0x2f8] sm:$0xff]  ;;  %675 = vmatprep.subr.mxu0 %v642_v0  ;;  %v1624_v3 = vld [vmem:[%s2810_s4 + $0x2f0] sm:$0xff]  ;;  %v1623_v5 = vld [vmem:[%s2810_s4 + $0x2e8] sm:$0xff]  ;;  %s2389_s19 = sshll.u32 %s2825_s21, 4  ;;  %s1860_s21 = scalar_lea.vmem %s1859_s10, 4096 }
  0x16   : > { %916 = vmatprep.subr.mxu1 %v1625_v1  ;;  %676 = vmatpush1.msra.mxu0 %v641_v2  ;;  %v639_v6 = vld [vmem:[%s2809_s3 + $0xe0] sm:$0xff]  ;;  %v638_v8 = vld [vmem:[%s2809_s3 + $0xd8] sm:$0xff]  ;;  %v637_v10 = vld [vmem:[%s2809_s3 + $0xd0] sm:$0xff]  ;;  %s2413_s30 = scalar_lea.vmem %s2806_s0, %s2389_s19  ;;  %s2425_s16 = scalar_lea.vmem %s2807_s1, %s2389_s19 }
  0x17   : > { %917 = vmatpush1.msra.mxu1 %v1624_v3  ;;  %v1622_v7 = vld [vmem:[%s2810_s4 + $0x2e0] sm:$0xff]  ;;  %677 = vmatprep.subr.mxu0 %v640_v4  ;;  %v1621_v9 = vld [vmem:[%s2810_s4 + $0x2d8] sm:$0xff]  ;;  %v1620_v11 = vld [vmem:[%s2810_s4 + $0x2d0] sm:$0xff]  ;;  %s2661_s20 = scalar_lea.vmem %s2808_s2, %s2389_s19  ;;  %s473_s19 = sand.u32 1, %s1914_s25  }
  0x18   : > { %918 = vmatprep.subr.mxu1 %v1623_v5  ;;  %678 = vmatpush1.msra.mxu0 %v639_v6  ;;  %v636_v12 = vld [vmem:[%s2809_s3 + $0xc8] sm:$0xff]  ;;  %v635_v14 = vld [vmem:[%s2809_s3 + $0xc0] sm:$0xff]  ;;  %v634_v16 = vld [vmem:[%s2809_s3 + $0xb8] sm:$0xff]  ;;  %s1584_s15 = sshll.u32 %s473_s19, 7 }
  0x19   : > { %919 = vmatpush1.msra.mxu1 %v1622_v7  ;;  %v1619_v13 = vld [vmem:[%s2810_s4 + $0x2c8] sm:$0xff]  ;;  %679 = vmatprep.subr.mxu0 %v638_v8  ;;  %v1618_v15 = vld [vmem:[%s2810_s4 + $0x2c0] sm:$0xff]  ;;  %v1617_v17 = vld [vmem:[%s2810_s4 + $0x2b8] sm:$0xff] }
  0x1a   : > { %920 = vmatprep.subr.mxu1 %v1621_v9  ;;  %680 = vmatpush1.msra.mxu0 %v637_v10  ;;  %v633_v18 = vld [vmem:[%s2809_s3 + $0xb0] sm:$0xff]  ;;  %v632_v20 = vld [vmem:[%s2809_s3 + $0xa8] sm:$0xff]  ;;  %v631_v22 = vld [vmem:[%s2809_s3 + $0xa0] sm:$0xff] }
  0x1b   : > { %921 = vmatpush1.msra.mxu1 %v1620_v11  ;;  %681 = vmatprep.subr.mxu0 %v636_v12  ;;  %v1616_v19 = vld [vmem:[%s2810_s4 + $0x2b0] sm:$0xff]  ;;  %v1615_v21 = vld [vmem:[%s2810_s4 + $0x2a8] sm:$0xff]  ;;  %v1614_v23 = vld [vmem:[%s2810_s4 + $0x2a0] sm:$0xff] }
  0x1c   : > { %922 = vmatprep.subr.mxu1 %v1619_v13  ;;  %682 = vmatpush1.msra.mxu0 %v635_v14  ;;  %v630_v24 = vld [vmem:[%s2809_s3 + $0x98] sm:$0xff]  ;;  %v629_v26 = vld [vmem:[%s2809_s3 + $0x90] sm:$0xff]  ;;  %v628_v28 = vld [vmem:[%s2809_s3 + $0x88] sm:$0xff] }
  0x1d   : > { %923 = vmatpush1.msra.mxu1 %v1618_v15  ;;  %683 = vmatprep.subr.mxu0 %v634_v16  ;;  %v1613_v25 = vld [vmem:[%s2810_s4 + $0x298] sm:$0xff]  ;;  %v1612_v27 = vld [vmem:[%s2810_s4 + $0x290] sm:$0xff]  ;;  %v1611_v29 = vld [vmem:[%s2810_s4 + $0x288] sm:$0xff] }
  0x1e   : > { %924 = vmatprep.subr.mxu1 %v1617_v17  ;;  %684 = vmatpush1.msra.mxu0 %v633_v18  ;;  %v627_v30 = vld [vmem:[%s2809_s3 + $0x80] sm:$0xff]  ;;  %v626_v32 = vld [vmem:[%s2809_s3 + $0x78] sm:$0xff]  ;;  %v625_v34 = vld [vmem:[%s2809_s3 + $0x70] sm:$0xff] }
  0x1f   : > { %925 = vmatpush1.msra.mxu1 %v1616_v19  ;;  %685 = vmatprep.subr.mxu0 %v632_v20  ;;  %v1610_v31 = vld [vmem:[%s2810_s4 + $0x280] sm:$0xff]  ;;  %v1609_v33 = vld [vmem:[%s2810_s4 + $0x278] sm:$0xff]  ;;  %v1608_v35 = vld [vmem:[%s2810_s4 + $0x270] sm:$0xff] }
  0x20   : > { %926 = vmatprep.subr.mxu1 %v1615_v21  ;;  %686 = vmatpush1.msra.mxu0 %v631_v22  ;;  %v624_v36 = vld [vmem:[%s2809_s3 + $0x68] sm:$0xff]  ;;  %v623_v38 = vld [vmem:[%s2809_s3 + $0x60] sm:$0xff]  ;;  %v622_v40 = vld [vmem:[%s2809_s3 + $0x58] sm:$0xff] }
  0x21   : > { %927 = vmatpush1.msra.mxu1 %v1614_v23  ;;  %687 = vmatprep.subr.mxu0 %v630_v24  ;;  %v1607_v37 = vld [vmem:[%s2810_s4 + $0x268] sm:$0xff]  ;;  %v1606_v39 = vld [vmem:[%s2810_s4 + $0x260] sm:$0xff]  ;;  %v1605_v41 = vld [vmem:[%s2810_s4 + $0x258] sm:$0xff] }
  0x22   : > { %928 = vmatprep.subr.mxu1 %v1613_v25  ;;  %688 = vmatpush1.msra.mxu0 %v629_v26  ;;  %v621_v42 = vld [vmem:[%s2809_s3 + $0x50] sm:$0xff]  ;;  %v620_v44 = vld [vmem:[%s2809_s3 + $0x48] sm:$0xff]  ;;  %v619_v46 = vld [vmem:[%s2809_s3 + $0x40] sm:$0xff] }
  0x23   : > { %929 = vmatpush1.msra.mxu1 %v1612_v27  ;;  %689 = vmatprep.subr.mxu0 %v628_v28  ;;  %v1604_v43 = vld [vmem:[%s2810_s4 + $0x250] sm:$0xff]  ;;  %v1603_v45 = vld [vmem:[%s2810_s4 + $0x248] sm:$0xff]  ;;  %v1602_v47 = vld [vmem:[%s2810_s4 + $0x240] sm:$0xff] }
  0x24   : > { %930 = vmatprep.subr.mxu1 %v1611_v29  ;;  %690 = vmatpush1.msra.mxu0 %v627_v30  ;;  %v618_v48 = vld [vmem:[%s2809_s3 + $0x38] sm:$0xff]  ;;  %v617_v50 = vld [vmem:[%s2809_s3 + $0x30] sm:$0xff]  ;;  %v616_v52 = vld [vmem:[%s2809_s3 + $0x28] sm:$0xff] }
  0x25   : > { %931 = vmatpush1.msra.mxu1 %v1610_v31  ;;  %691 = vmatprep.subr.mxu0 %v626_v32  ;;  %v1601_v49 = vld [vmem:[%s2810_s4 + $0x238] sm:$0xff]  ;;  %v1600_v51 = vld [vmem:[%s2810_s4 + $0x230] sm:$0xff]  ;;  %v1599_v53 = vld [vmem:[%s2810_s4 + $0x228] sm:$0xff] }
  0x26   : > { %932 = vmatprep.subr.mxu1 %v1609_v33  ;;  %692 = vmatpush1.msra.mxu0 %v625_v34  ;;  %v615_v54 = vld [vmem:[%s2809_s3 + $0x20] sm:$0xff]  ;;  %v614_v56 = vld [vmem:[%s2809_s3 + $0x18] sm:$0xff]  ;;  %v613_v58 = vld [vmem:[%s2809_s3 + $0x10] sm:$0xff] }
  0x27   : > { %933 = vmatpush1.msra.mxu1 %v1608_v35  ;;  %693 = vmatprep.subr.mxu0 %v624_v36  ;;  %v1598_v55 = vld [vmem:[%s2810_s4 + $0x220] sm:$0xff]  ;;  %v1597_v57 = vld [vmem:[%s2810_s4 + $0x218] sm:$0xff]  ;;  %v1596_v59 = vld [vmem:[%s2810_s4 + $0x210] sm:$0xff] }
  0x28   : > { %934 = vmatprep.subr.mxu1 %v1607_v37  ;;  %694 = vmatpush1.msra.mxu0 %v623_v38  ;;  %v612_v60 = vld [vmem:[%s2809_s3 + $0x8] sm:$0xff]  ;;  %v611_v62 = vld [vmem:[%s2809_s3] sm:$0xff]  ;;  %v674_v0 = vld [vmem:[%s2809_s3 + $0x1f8] sm:$0xff] }
  0x29   : > { %935 = vmatpush1.msra.mxu1 %v1606_v39  ;;  %695 = vmatprep.subr.mxu0 %v622_v40  ;;  %v1595_v61 = vld [vmem:[%s2810_s4 + $0x208] sm:$0xff]  ;;  %v1594_v63 = vld [vmem:[%s2810_s4 + $0x200] sm:$0xff]  ;;  %v1657_v1 = vld [vmem:[%s2810_s4 + $0x3f8] sm:$0xff] }
  0x2a   : > { %936 = vmatprep.subr.mxu1 %v1605_v41  ;;  %696 = vmatpush1.msra.mxu0 %v621_v42  ;;  %v673_v2 = vld [vmem:[%s2809_s3 + $0x1f0] sm:$0xff]  ;;  %v672_v4 = vld [vmem:[%s2809_s3 + $0x1e8] sm:$0xff]  ;;  %v671_v6 = vld [vmem:[%s2809_s3 + $0x1e0] sm:$0xff] }
  0x2b   : > { %937 = vmatpush1.msra.mxu1 %v1604_v43  ;;  %697 = vmatprep.subr.mxu0 %v620_v44  ;;  %v1656_v3 = vld [vmem:[%s2810_s4 + $0x3f0] sm:$0xff]  ;;  %v1655_v5 = vld [vmem:[%s2810_s4 + $0x3e8] sm:$0xff]  ;;  %v1654_v7 = vld [vmem:[%s2810_s4 + $0x3e0] sm:$0xff] }
  0x2c   : > { %938 = vmatprep.subr.mxu1 %v1603_v45  ;;  %698 = vmatpush1.msra.mxu0 %v619_v46  ;;  %v670_v8 = vld [vmem:[%s2809_s3 + $0x1d8] sm:$0xff]  ;;  %v669_v10 = vld [vmem:[%s2809_s3 + $0x1d0] sm:$0xff]  ;;  %v668_v12 = vld [vmem:[%s2809_s3 + $0x1c8] sm:$0xff] }
  0x2d   : > { %939 = vmatpush1.msra.mxu1 %v1602_v47  ;;  %699 = vmatprep.subr.mxu0 %v618_v48  ;;  %v1653_v9 = vld [vmem:[%s2810_s4 + $0x3d8] sm:$0xff]  ;;  %v1652_v11 = vld [vmem:[%s2810_s4 + $0x3d0] sm:$0xff]  ;;  %v1651_v13 = vld [vmem:[%s2810_s4 + $0x3c8] sm:$0xff] }
  0x2e   : > { %940 = vmatprep.subr.mxu1 %v1601_v49  ;;  %700 = vmatpush1.msra.mxu0 %v617_v50  ;;  %v667_v14 = vld [vmem:[%s2809_s3 + $0x1c0] sm:$0xff]  ;;  %v666_v16 = vld [vmem:[%s2809_s3 + $0x1b8] sm:$0xff]  ;;  %v665_v18 = vld [vmem:[%s2809_s3 + $0x1b0] sm:$0xff] }
  0x2f   : > { %941 = vmatpush1.msra.mxu1 %v1600_v51  ;;  %701 = vmatprep.subr.mxu0 %v616_v52  ;;  %v1650_v15 = vld [vmem:[%s2810_s4 + $0x3c0] sm:$0xff]  ;;  %v1649_v17 = vld [vmem:[%s2810_s4 + $0x3b8] sm:$0xff]  ;;  %v1648_v19 = vld [vmem:[%s2810_s4 + $0x3b0] sm:$0xff] }
  0x30   : > { %942 = vmatprep.subr.mxu1 %v1599_v53  ;;  %702 = vmatpush1.msra.mxu0 %v615_v54  ;;  %v664_v20 = vld [vmem:[%s2809_s3 + $0x1a8] sm:$0xff]  ;;  %v663_v22 = vld [vmem:[%s2809_s3 + $0x1a0] sm:$0xff]  ;;  %v662_v24 = vld [vmem:[%s2809_s3 + $0x198] sm:$0xff] }
  0x31   : > { %943 = vmatpush1.msra.mxu1 %v1598_v55  ;;  %703 = vmatprep.subr.mxu0 %v614_v56  ;;  %v1647_v21 = vld [vmem:[%s2810_s4 + $0x3a8] sm:$0xff]  ;;  %v1646_v23 = vld [vmem:[%s2810_s4 + $0x3a0] sm:$0xff]  ;;  %v1645_v25 = vld [vmem:[%s2810_s4 + $0x398] sm:$0xff] }
  0x32   : > { %944 = vmatprep.subr.mxu1 %v1597_v57  ;;  %704 = vmatpush1.msra.mxu0 %v613_v58  ;;  %v661_v26 = vld [vmem:[%s2809_s3 + $0x190] sm:$0xff]  ;;  %v660_v28 = vld [vmem:[%s2809_s3 + $0x188] sm:$0xff]  ;;  %v659_v30 = vld [vmem:[%s2809_s3 + $0x180] sm:$0xff] }
  0x33   : > { %945 = vmatpush1.msra.mxu1 %v1596_v59  ;;  %705 = vmatprep.subr.mxu0 %v612_v60  ;;  %v1644_v27 = vld [vmem:[%s2810_s4 + $0x390] sm:$0xff]  ;;  %v1643_v29 = vld [vmem:[%s2810_s4 + $0x388] sm:$0xff]  ;;  %v1642_v31 = vld [vmem:[%s2810_s4 + $0x380] sm:$0xff] }
  0x34   : > { %946 = vmatprep.subr.mxu1 %v1595_v61  ;;  %706 = vmatpush1.msra.mxu0 %v611_v62  ;;  %v658_v32 = vld [vmem:[%s2809_s3 + $0x178] sm:$0xff]  ;;  %v657_v34 = vld [vmem:[%s2809_s3 + $0x170] sm:$0xff]  ;;  %v656_v36 = vld [vmem:[%s2809_s3 + $0x168] sm:$0xff] }
  0x35   : > { %947 = vmatpush1.msra.mxu1 %v1594_v63  ;;  %707 = vmatprep.subr.mxu0 %v674_v0  ;;  %v1641_v33 = vld [vmem:[%s2810_s4 + $0x378] sm:$0xff]  ;;  %v1640_v35 = vld [vmem:[%s2810_s4 + $0x370] sm:$0xff]  ;;  %v1639_v37 = vld [vmem:[%s2810_s4 + $0x368] sm:$0xff] }
  0x36   : > { %948 = vmatprep.subr.mxu1 %v1657_v1  ;;  %708 = vmatpush2.msra.mxu0 %v673_v2  ;;  %v655_v38 = vld [vmem:[%s2809_s3 + $0x160] sm:$0xff]  ;;  %v654_v40 = vld [vmem:[%s2809_s3 + $0x158] sm:$0xff]  ;;  %v653_v42 = vld [vmem:[%s2809_s3 + $0x150] sm:$0xff] }
  0x37   : > { %949 = vmatpush2.msra.mxu1 %v1656_v3  ;;  %709 = vmatprep.subr.mxu0 %v672_v4  ;;  %v1638_v39 = vld [vmem:[%s2810_s4 + $0x360] sm:$0xff]  ;;  %v1637_v41 = vld [vmem:[%s2810_s4 + $0x358] sm:$0xff]  ;;  %v1636_v43 = vld [vmem:[%s2810_s4 + $0x350] sm:$0xff] }
  0x38   : > { %950 = vmatprep.subr.mxu1 %v1655_v5  ;;  %710 = vmatpush2.msra.mxu0 %v671_v6  ;;  %v652_v44 = vld [vmem:[%s2809_s3 + $0x148] sm:$0xff]  ;;  %v651_v46 = vld [vmem:[%s2809_s3 + $0x140] sm:$0xff]  ;;  %v650_v48 = vld [vmem:[%s2809_s3 + $0x138] sm:$0xff] }
  0x39   : > { %951 = vmatpush2.msra.mxu1 %v1654_v7  ;;  %711 = vmatprep.subr.mxu0 %v670_v8  ;;  %v1635_v45 = vld [vmem:[%s2810_s4 + $0x348] sm:$0xff]  ;;  %v1634_v47 = vld [vmem:[%s2810_s4 + $0x340] sm:$0xff]  ;;  %v1633_v49 = vld [vmem:[%s2810_s4 + $0x338] sm:$0xff] }
  0x3a   : > { %952 = vmatprep.subr.mxu1 %v1653_v9  ;;  %712 = vmatpush2.msra.mxu0 %v669_v10  ;;  %v649_v50 = vld [vmem:[%s2809_s3 + $0x130] sm:$0xff]  ;;  %v648_v52 = vld [vmem:[%s2809_s3 + $0x128] sm:$0xff]  ;;  %v647_v54 = vld [vmem:[%s2809_s3 + $0x120] sm:$0xff] }
  0x3b   : > { %953 = vmatpush2.msra.mxu1 %v1652_v11  ;;  %713 = vmatprep.subr.mxu0 %v668_v12  ;;  %v1632_v51 = vld [vmem:[%s2810_s4 + $0x330] sm:$0xff]  ;;  %v1631_v53 = vld [vmem:[%s2810_s4 + $0x328] sm:$0xff]  ;;  %v1630_v55 = vld [vmem:[%s2810_s4 + $0x320] sm:$0xff] }
  0x3c   : > { %954 = vmatprep.subr.mxu1 %v1651_v13  ;;  %714 = vmatpush2.msra.mxu0 %v667_v14  ;;  %v646_v56 = vld [vmem:[%s2809_s3 + $0x118] sm:$0xff]  ;;  %v645_v58 = vld [vmem:[%s2809_s3 + $0x110] sm:$0xff]  ;;  %v644_v60 = vld [vmem:[%s2809_s3 + $0x108] sm:$0xff] }
  0x3d   : > { %955 = vmatpush2.msra.mxu1 %v1650_v15  ;;  %715 = vmatprep.subr.mxu0 %v666_v16  ;;  %v1629_v57 = vld [vmem:[%s2810_s4 + $0x318] sm:$0xff]  ;;  %v1628_v59 = vld [vmem:[%s2810_s4 + $0x310] sm:$0xff]  ;;  %v1627_v61 = vld [vmem:[%s2810_s4 + $0x308] sm:$0xff] }
  0x3e   : > { %956 = vmatprep.subr.mxu1 %v1649_v17  ;;  %716 = vmatpush2.msra.mxu0 %v665_v18  ;;  %v643_v62 = vld [vmem:[%s2809_s3 + $0x100] sm:$0xff]  ;;  %v596_v63 = vld [vmem:[%s2413_s30 + $0x8] sm:$0xff]  ;;  %v1689_v4 = vld [vmem:[%s2811_s5 + $0x4f8] sm:$0xff] }
  0x3f   : > { %957 = vmatpush2.msra.mxu1 %v1648_v19  ;;  %717 = vmatprep.subr.mxu0 %v664_v20  ;;  %v1626_v0 = vld [vmem:[%s2810_s4 + $0x300] sm:$0xff]  ;;  %v837_v1 = vld [vmem:[%s2425_s16 + $0x8] sm:$0xff]  ;;  %v1688_v5 = vld [vmem:[%s2811_s5 + $0x4f0] sm:$0xff] }
  0x40   : > { %958 = vmatprep.subr.mxu1 %v1647_v21  ;;  %718 = vmatpush2.msra.mxu0 %v663_v22  ;;  %v595_v2 = vld [vmem:[%s2413_s30] sm:$0xff]  ;;  %v1687_v6 = vld [vmem:[%s2811_s5 + $0x4e8] sm:$0xff]  ;;  %v1685_v8 = vld [vmem:[%s2811_s5 + $0x4d8] sm:$0xff] }
  0x41   : > { %959 = vmatpush2.msra.mxu1 %v1646_v23  ;;  %719 = vmatprep.subr.mxu0 %v662_v24  ;;  %v836_v3 = vld [vmem:[%s2425_s16] sm:$0xff]  ;;  %v1684_v9 = vld [vmem:[%s2811_s5 + $0x4d0] sm:$0xff]  ;;  %v1683_v10 = vld [vmem:[%s2811_s5 + $0x4c8] sm:$0xff] }
  0x42   : > { %960 = vmatprep.subr.mxu1 %v1645_v25  ;;  %720 = vmatpush2.msra.mxu0 %v661_v26  ;;  %v1686_v7 = vld [vmem:[%s2811_s5 + $0x4e0] sm:$0xff]  ;;  %v1681_v12 = vld [vmem:[%s2811_s5 + $0x4b8] sm:$0xff]  ;;  %v1680_v13 = vld [vmem:[%s2811_s5 + $0x4b0] sm:$0xff] }
  0x43   : > { %961 = vmatpush2.msra.mxu1 %v1644_v27  ;;  %721 = vmatprep.subr.mxu0 %v660_v28  ;;  %v1682_v11 = vld [vmem:[%s2811_s5 + $0x4c0] sm:$0xff]  ;;  %v1679_v14 = vld [vmem:[%s2811_s5 + $0x4a8] sm:$0xff]  ;;  %v1677_v16 = vld [vmem:[%s2811_s5 + $0x498] sm:$0xff] }
  0x44   : > { %962 = vmatprep.subr.mxu1 %v1643_v29  ;;  %722 = vmatpush2.msra.mxu0 %v659_v30  ;;  %v1678_v15 = vld [vmem:[%s2811_s5 + $0x4a0] sm:$0xff]  ;;  %v1676_v17 = vld [vmem:[%s2811_s5 + $0x490] sm:$0xff]  ;;  %v1675_v18 = vld [vmem:[%s2811_s5 + $0x488] sm:$0xff] }
  0x45   : > { %963 = vmatpush2.msra.mxu1 %v1642_v31  ;;  %723 = vmatprep.subr.mxu0 %v658_v32  ;;  %v1674_v19 = vld [vmem:[%s2811_s5 + $0x480] sm:$0xff]  ;;  %v1673_v20 = vld [vmem:[%s2811_s5 + $0x478] sm:$0xff]  ;;  %v1672_v21 = vld [vmem:[%s2811_s5 + $0x470] sm:$0xff] }
  0x46   : > { %964 = vmatprep.subr.mxu1 %v1641_v33  ;;  %724 = vmatpush2.msra.mxu0 %v657_v34  ;;  %v1671_v22 = vld [vmem:[%s2811_s5 + $0x468] sm:$0xff]  ;;  %v1670_v23 = vld [vmem:[%s2811_s5 + $0x460] sm:$0xff]  ;;  %v1669_v24 = vld [vmem:[%s2811_s5 + $0x458] sm:$0xff] }
  0x47   : > { %965 = vmatpush2.msra.mxu1 %v1640_v35  ;;  %725 = vmatprep.subr.mxu0 %v656_v36  ;;  %v1668_v25 = vld [vmem:[%s2811_s5 + $0x450] sm:$0xff]  ;;  %v1667_v26 = vld [vmem:[%s2811_s5 + $0x448] sm:$0xff]  ;;  %v1666_v27 = vld [vmem:[%s2811_s5 + $0x440] sm:$0xff] }
  0x48   : > { %966 = vmatprep.subr.mxu1 %v1639_v37  ;;  %726 = vmatpush2.msra.mxu0 %v655_v38  ;;  %v1665_v28 = vld [vmem:[%s2811_s5 + $0x438] sm:$0xff]  ;;  %v1664_v29 = vld [vmem:[%s2811_s5 + $0x430] sm:$0xff]  ;;  %v1663_v30 = vld [vmem:[%s2811_s5 + $0x428] sm:$0xff] }
  0x49   : > { %967 = vmatpush2.msra.mxu1 %v1638_v39  ;;  %727 = vmatprep.subr.mxu0 %v654_v40  ;;  %v1662_v31 = vld [vmem:[%s2811_s5 + $0x420] sm:$0xff]  ;;  %v1661_v32 = vld [vmem:[%s2811_s5 + $0x418] sm:$0xff]  ;;  %v1660_v33 = vld [vmem:[%s2811_s5 + $0x410] sm:$0xff] }
  0x4a   : > { %968 = vmatprep.subr.mxu1 %v1637_v41  ;;  %728 = vmatpush2.msra.mxu0 %v653_v42  ;;  %v1659_v34 = vld [vmem:[%s2811_s5 + $0x408] sm:$0xff]  ;;  %v1658_v35 = vld [vmem:[%s2811_s5 + $0x400] sm:$0xff]  ;;  %v1721_v36 = vld [vmem:[%s2811_s5 + $0x5f8] sm:$0xff] }
  0x4b   : > { %969 = vmatpush2.msra.mxu1 %v1636_v43  ;;  %729 = vmatprep.subr.mxu0 %v652_v44  ;;  %v598_v37 = vld [vmem:[%s2413_s30 + $0x18] sm:$0xff]  ;;  %v1720_v39 = vld [vmem:[%s2811_s5 + $0x5f0] sm:$0xff]  ;;  %v1719_v42 = vld [vmem:[%s2811_s5 + $0x5e8] sm:$0xff] }
  0x4c   : > { %970 = vmatprep.subr.mxu1 %v1635_v45  ;;  %730 = vmatpush2.msra.mxu0 %v651_v46  ;;  %v839_v38 = vld [vmem:[%s2425_s16 + $0x18] sm:$0xff]  ;;  %v597_v40 = vld [vmem:[%s2413_s30 + $0x10] sm:$0xff]  ;;  %v1718_v43 = vld [vmem:[%s2811_s5 + $0x5e0] sm:$0xff] }
  0x4d   : > { %971 = vmatpush2.msra.mxu1 %v1634_v47  ;;  %731 = vmatprep.subr.mxu0 %v650_v48  ;;  %v838_v41 = vld [vmem:[%s2425_s16 + $0x10] sm:$0xff]  ;;  %v1717_v44 = vld [vmem:[%s2811_s5 + $0x5d8] sm:$0xff]  ;;  %v600_v45 = vld [vmem:[%s2413_s30 + $0x28] sm:$0xff] }
  0x4e   : > { %972 = vmatprep.subr.mxu1 %v1633_v49  ;;  %732 = vmatpush2.msra.mxu0 %v649_v50  ;;  %v841_v46 = vld [vmem:[%s2425_s16 + $0x28] sm:$0xff]  ;;  %v1716_v47 = vld [vmem:[%s2811_s5 + $0x5d0] sm:$0xff]  ;;  %v599_v48 = vld [vmem:[%s2413_s30 + $0x20] sm:$0xff] }
  0x4f   : > { %973 = vmatpush2.msra.mxu1 %v1632_v51  ;;  %733 = vmatprep.subr.mxu0 %v648_v52  ;;  %v840_v49 = vld [vmem:[%s2425_s16 + $0x20] sm:$0xff]  ;;  %v1715_v50 = vld [vmem:[%s2811_s5 + $0x5c8] sm:$0xff]  ;;  %v1713_v52 = vld [vmem:[%s2811_s5 + $0x5b8] sm:$0xff] }
  0x50   : > { %974 = vmatprep.subr.mxu1 %v1631_v53  ;;  %734 = vmatpush2.msra.mxu0 %v647_v54  ;;  %v1714_v51 = vld [vmem:[%s2811_s5 + $0x5c0] sm:$0xff]  ;;  %v602_v53 = vld [vmem:[%s2413_s30 + $0x38] sm:$0xff] }
  0x51   : > { %975 = vmatpush2.msra.mxu1 %v1630_v55  ;;  %735 = vmatprep.subr.mxu0 %v646_v56  ;;  %v843_v54 = vld [vmem:[%s2425_s16 + $0x38] sm:$0xff]  ;;  %v1712_v55 = vld [vmem:[%s2811_s5 + $0x5b0] sm:$0xff] }
  0x52   : > { %976 = vmatprep.subr.mxu1 %v1629_v57  ;;  %736 = vmatpush2.msra.mxu0 %v645_v58  ;;  %v601_v56 = vld [vmem:[%s2413_s30 + $0x30] sm:$0xff]  ;;  %v1711_v58 = vld [vmem:[%s2811_s5 + $0x5a8] sm:$0xff] }
  0x53   : > { %977 = vmatpush2.msra.mxu1 %v1628_v59  ;;  %737 = vmatprep.subr.mxu0 %v644_v60  ;;  %v842_v57 = vld [vmem:[%s2425_s16 + $0x30] sm:$0xff]  ;;  %v1710_v59 = vld [vmem:[%s2811_s5 + $0x5a0] sm:$0xff]  ;;  %v1709_v60 = vld [vmem:[%s2811_s5 + $0x598] sm:$0xff] }
  0x54   : > { %978 = vmatprep.subr.mxu1 %v1627_v61  ;;  %738 = vmatpush2.msra.mxu0 %v643_v62  ;;  %v604_v61 = vld [vmem:[%s2413_s30 + $0x48] sm:$0xff] }
  0x55   : > { %739 = vmatprep.mubr.f32.mxu0 %v596_v63  ;;  %979 = vmatpush2.msra.mxu1 %v1626_v0  ;;  %v845_v62 = vld [vmem:[%s2425_s16 + $0x48] sm:$0xff]  ;;  %v1708_v63 = vld [vmem:[%s2811_s5 + $0x590] sm:$0xff]  ;;  %v603_v0 = vld [vmem:[%s2413_s30 + $0x40] sm:$0xff] }
  0x56   : > { %980 = vmatprep.mubr.f32.mxu1 %v837_v1  ;;  %740 = vmatmul.mubr.f32.vlgmr.msra.gmra.mxu0 %v595_v2  ;;  %v844_v1 = vld [vmem:[%s2425_s16 + $0x40] sm:$0xff]  ;;  %v1707_v2 = vld [vmem:[%s2811_s5 + $0x588] sm:$0xff] }
  0x57   : > { %981 = vmatmul.mubr.f32.vlgmr.msra.gmra.mxu1 %v836_v3  ;;  %1157 = vmatprep.subr.mxu0 %v1689_v4  ;;  %v1706_v3 = vld [vmem:[%s2811_s5 + $0x580] sm:$0xff] }
  0x58   : > { %1733 = vmatprep.subr.mxu1 %v1689_v4  ;;  %1158 = vmatpush1.msra.mxu0 %v1688_v5  ;;  %v1705_v4 = vld [vmem:[%s2811_s5 + $0x578] sm:$0xff] }
  0x59   : > { %1765 = vmatpush1.msra.mxu1 %v1688_v5  ;;  %1159 = vmatprep.subr.mxu0 %v1687_v6  ;;  %v606_v5 = vld [vmem:[%s2413_s30 + $0x58] sm:$0xff] }
  0x5a   : > { %1734 = vmatprep.subr.mxu1 %v1687_v6  ;;  %1160 = vmatpush1.msra.mxu0 %v1686_v7  ;;  %v847_v6 = vld [vmem:[%s2425_s16 + $0x58] sm:$0xff] }
  0x5b   : > { %1766 = vmatpush1.msra.mxu1 %v1686_v7  ;;  %1161 = vmatprep.subr.mxu0 %v1685_v8  ;;  %v1704_v7 = vld [vmem:[%s2811_s5 + $0x570] sm:$0xff] }
  0x5c   : > { %1735 = vmatprep.subr.mxu1 %v1685_v8  ;;  %1162 = vmatpush1.msra.mxu0 %v1684_v9  ;;  %v605_v8 = vld [vmem:[%s2413_s30 + $0x50] sm:$0xff] }
  0x5d   : > { %1767 = vmatpush1.msra.mxu1 %v1684_v9  ;;  %1163 = vmatprep.subr.mxu0 %v1683_v10  ;;  %v846_v9 = vld [vmem:[%s2425_s16 + $0x50] sm:$0xff] }
  0x5e   : > { %1736 = vmatprep.subr.mxu1 %v1683_v10  ;;  %1164 = vmatpush1.msra.mxu0 %v1682_v11  ;;  %v1703_v10 = vld [vmem:[%s2811_s5 + $0x568] sm:$0xff] }
  0x5f   : > { %1768 = vmatpush1.msra.mxu1 %v1682_v11  ;;  %1165 = vmatprep.subr.mxu0 %v1681_v12  ;;  %v1702_v11 = vld [vmem:[%s2811_s5 + $0x560] sm:$0xff] }
  0x60   : > { %1737 = vmatprep.subr.mxu1 %v1681_v12  ;;  %1166 = vmatpush1.msra.mxu0 %v1680_v13  ;;  %v1701_v12 = vld [vmem:[%s2811_s5 + $0x558] sm:$0xff] }
  0x61   : > { %1769 = vmatpush1.msra.mxu1 %v1680_v13  ;;  %1167 = vmatprep.subr.mxu0 %v1679_v14  ;;  %v608_v13 = vld [vmem:[%s2413_s30 + $0x68] sm:$0xff] }
  0x62   : > { %1738 = vmatprep.subr.mxu1 %v1679_v14  ;;  %1168 = vmatpush1.msra.mxu0 %v1678_v15  ;;  %v849_v14 = vld [vmem:[%s2425_s16 + $0x68] sm:$0xff] }
  0x63   : > { %1770 = vmatpush1.msra.mxu1 %v1678_v15  ;;  %1169 = vmatprep.subr.mxu0 %v1677_v16  ;;  %v1700_v15 = vld [vmem:[%s2811_s5 + $0x550] sm:$0xff] }
  0x64   : > { %1739 = vmatprep.subr.mxu1 %v1677_v16  ;;  %1170 = vmatpush1.msra.mxu0 %v1676_v17  ;;  %v607_v16 = vld [vmem:[%s2413_s30 + $0x60] sm:$0xff] }
  0x65   : > { %1771 = vmatpush1.msra.mxu1 %v1676_v17  ;;  %1171 = vmatprep.subr.mxu0 %v1675_v18  ;;  %v848_v17 = vld [vmem:[%s2425_s16 + $0x60] sm:$0xff] }
  0x66   : > { %1740 = vmatprep.subr.mxu1 %v1675_v18  ;;  %1172 = vmatpush1.msra.mxu0 %v1674_v19  ;;  %v1699_v18 = vld [vmem:[%s2811_s5 + $0x548] sm:$0xff] }
  0x67   : > { %1772 = vmatpush1.msra.mxu1 %v1674_v19  ;;  %1173 = vmatprep.subr.mxu0 %v1673_v20  ;;  %v1698_v19 = vld [vmem:[%s2811_s5 + $0x540] sm:$0xff] }
  0x68   : > { %1741 = vmatprep.subr.mxu1 %v1673_v20  ;;  %1174 = vmatpush1.msra.mxu0 %v1672_v21  ;;  %v1697_v20 = vld [vmem:[%s2811_s5 + $0x538] sm:$0xff] }
  0x69   : > { %1773 = vmatpush1.msra.mxu1 %v1672_v21  ;;  %1175 = vmatprep.subr.mxu0 %v1671_v22  ;;  %v610_v21 = vld [vmem:[%s2413_s30 + $0x78] sm:$0xff] }
  0x6a   : > { %1742 = vmatprep.subr.mxu1 %v1671_v22  ;;  %1176 = vmatpush1.msra.mxu0 %v1670_v23  ;;  %v851_v22 = vld [vmem:[%s2425_s16 + $0x78] sm:$0xff] }
  0x6b   : > { %1774 = vmatpush1.msra.mxu1 %v1670_v23  ;;  %1177 = vmatprep.subr.mxu0 %v1669_v24  ;;  %v1696_v23 = vld [vmem:[%s2811_s5 + $0x530] sm:$0xff] }
  0x6c   : > { %1743 = vmatprep.subr.mxu1 %v1669_v24  ;;  %1178 = vmatpush1.msra.mxu0 %v1668_v25  ;;  %v609_v24 = vld [vmem:[%s2413_s30 + $0x70] sm:$0xff]  ;;  %s2711_s30 = scalar_lea.vmem [#allocation3], %s1584_s15 }
  0x6d   : > { %1775 = vmatpush1.msra.mxu1 %v1668_v25  ;;  %1179 = vmatprep.subr.mxu0 %v1667_v26  ;;  %v850_v25 = vld [vmem:[%s2425_s16 + $0x70] sm:$0xff]  ;;  %s1732_s16 = sshll.u32 %s1922_s27, 11  ;;  %s1382_s17 = sshll.u32 %s2711_s30, 4  ;;  %s2751_s17 = int_to_ptr.vmem [resolvable:$true] %s1382_s17 }
  0x6e   : > { %1744 = vmatprep.subr.mxu1 %v1667_v26  ;;  %1180 = vmatpush1.msra.mxu0 %v1666_v27  ;;  %v1695_v26 = vld [vmem:[%s2811_s5 + $0x528] sm:$0xff]  ;;  %s2749_s23 = scalar_lea.hbm %s2813_s7, %s1732_s16  ;;  %s2761_s27 = scalar_lea.sflag [#allocation4], %s473_s19 }
  0x6f   : > { %1776 = vmatpush1.msra.mxu1 %v1666_v27  ;;  %1181 = vmatprep.subr.mxu0 %v1665_v28  ;;  %v1694_v27 = vld [vmem:[%s2811_s5 + $0x520] sm:$0xff]  ;;  %s1854_s22 = scalar_lea.vmem %s2751_s17, 2048  ;;  %p1861_p1 = scmp.lt.s32.totalorder %s2751_s17, %s1859_s10 }
  0x70   : > { %1745 = vmatprep.subr.mxu1 %v1665_v28  ;;  %1182 = vmatpush1.msra.mxu0 %v1664_v29  ;;  %v1693_v28 = vld [vmem:[%s2811_s5 + $0x518] sm:$0xff]  ;;  %p1855_p12 = scmp.ne.s32.totalorder %s2751_s17, %s1854_s22  ;;  %p1862_p2 = scmp.lt.s32.totalorder %s1860_s21, %s1854_s22 }
  0x71   : > { %1777 = vmatpush1.msra.mxu1 %v1664_v29  ;;  %1183 = vmatprep.subr.mxu0 %v1663_v30  ;;  %v1692_v29 = vld [vmem:[%s2811_s5 + $0x510] sm:$0xff] }
  0x72   : > { %1746 = vmatprep.subr.mxu1 %v1663_v30  ;;  %1184 = vmatpush1.msra.mxu0 %v1662_v31  ;;  %v1691_v30 = vld [vmem:[%s2811_s5 + $0x508] sm:$0xff]  ;;  %p1856_p13 = pnand %p1855_p12, %p2015_p4  ;;  %p1863_p3 = por %p1862_p2, %p1861_p1 }
  0x73   : > { %1778 = vmatpush1.msra.mxu1 %v1662_v31  ;;  %1185 = vmatprep.subr.mxu0 %v1661_v32  ;;  %v1690_v31 = vld [vmem:[%s2811_s5 + $0x500] sm:$0xff] }
  0x74   : > { %1747 = vmatprep.subr.mxu1 %v1661_v32  ;;  %1186 = vmatpush1.msra.mxu0 %v1660_v33  ;;  %v1078_v32 = vld [vmem:[%s2661_s20 + $0x8] sm:$0xff]  ;;  %p1857_p0 = pneg %p1856_p13 }
  0x75   : > { %1779 = vmatpush1.msra.mxu1 %v1660_v33  ;;  %1187 = vmatprep.subr.mxu0 %v1659_v34  ;;  %v1086_v33 = vld [vmem:[%s2661_s20 + $0x48] sm:$0xff] }
  0x76   : > { %1748 = vmatprep.subr.mxu1 %v1659_v34  ;;  %1188 = vmatpush1.msra.mxu0 %v1658_v35  ;;  %v1077_v34 = vld [vmem:[%s2661_s20] sm:$0xff]  ;;  %p1864_p5 = pnand %p1863_p3, %p1857_p0 }
  0x77   : > { %1780 = vmatpush1.msra.mxu1 %v1658_v35  ;;  %1189 = vmatprep.subr.mxu0 %v1721_v36  ;;  %v1085_v35 = vld [vmem:[%s2661_s20 + $0x40] sm:$0xff] }
  0x78   : > { %1749 = vmatprep.subr.mxu1 %v1721_v36  ;;  %745 = vmatprep.mubr.f32.mxu0 %v598_v37  ;;  %v1080_v36 = vld [vmem:[%s2661_s20 + $0x18] sm:$0xff] }
  0x79   : > { %986 = vmatprep.mubr.f32.mxu1 %v839_v38  ;;  %1190 = vmatpush2.msra.mxu0 %v1720_v39  ;;  %v1088_v37 = vld [vmem:[%s2661_s20 + $0x58] sm:$0xff]  ;;  %v1079_v38 = vld [vmem:[%s2661_s20 + $0x10] sm:$0xff] }
  0x7a   : > { %1781 = vmatpush2.msra.mxu1 %v1720_v39  ;;  %746 = vmatmul.mubr.f32.gmra.mxu0 %v597_v40  ;;  %v1087_v39 = vld [vmem:[%s2661_s20 + $0x50] sm:$0xff]  ;;  %v1082_v40 = vld [vmem:[%s2661_s20 + $0x28] sm:$0xff] }
  0x7b   : > { %987 = vmatmul.mubr.f32.gmra.mxu1 %v838_v41  ;;  %1191 = vmatprep.subr.mxu0 %v1719_v42  ;;  %v1090_v41 = vld [vmem:[%s2661_s20 + $0x68] sm:$0xff] }
  0x7c   : > { %1750 = vmatprep.subr.mxu1 %v1719_v42  ;;  %1192 = vmatpush2.msra.mxu0 %v1718_v43  ;;  %v1081_v42 = vld [vmem:[%s2661_s20 + $0x20] sm:$0xff] }
  0x7d   : > { %1782 = vmatpush2.msra.mxu1 %v1718_v43  ;;  %1193 = vmatprep.subr.mxu0 %v1717_v44  ;;  %v1089_v43 = vld [vmem:[%s2661_s20 + $0x60] sm:$0xff] }
  0x7e   : > { %1751 = vmatprep.subr.mxu1 %v1717_v44  ;;  %751 = vmatprep.mubr.f32.mxu0 %v600_v45  ;;  %v1084_v44 = vld [vmem:[%s2661_s20 + $0x38] sm:$0xff] }
  0x7f   : > { %992 = vmatprep.mubr.f32.mxu1 %v841_v46  ;;  %1194 = vmatpush2.msra.mxu0 %v1716_v47  ;;  %v1092_v45 = vld [vmem:[%s2661_s20 + $0x78] sm:$0xff]  ;;  %v1083_v46 = vld [vmem:[%s2661_s20 + $0x30] sm:$0xff] }
  0x80   : > { %1783 = vmatpush2.msra.mxu1 %v1716_v47  ;;  %752 = vmatmul.mubr.f32.gmra.mxu0 %v599_v48  ;;  %v1091_v47 = vld [vmem:[%s2661_s20 + $0x70] sm:$0xff] }
  0x81   : > { %993 = vmatmul.mubr.f32.gmra.mxu1 %v840_v49  ;;  %1195 = vmatprep.subr.mxu0 %v1715_v50 }
  0x82   : > { %1752 = vmatprep.subr.mxu1 %v1715_v50  ;;  %1196 = vmatpush2.msra.mxu0 %v1714_v51 }
  0x83   : > { %1784 = vmatpush2.msra.mxu1 %v1714_v51  ;;  %1197 = vmatprep.subr.mxu0 %v1713_v52 }
  0x84   : > { %1753 = vmatprep.subr.mxu1 %v1713_v52  ;;  %757 = vmatprep.mubr.f32.mxu0 %v602_v53 }
  0x85   : > { %998 = vmatprep.mubr.f32.mxu1 %v843_v54  ;;  %1198 = vmatpush2.msra.mxu0 %v1712_v55 }
  0x86   : > { %1785 = vmatpush2.msra.mxu1 %v1712_v55  ;;  %758 = vmatmul.mubr.f32.gmra.mxu0 %v601_v56 }
  0x87   : > { %999 = vmatmul.mubr.f32.gmra.mxu1 %v842_v57  ;;  %1199 = vmatprep.subr.mxu0 %v1711_v58 }
  0x88   : > { %1754 = vmatprep.subr.mxu1 %v1711_v58  ;;  %1200 = vmatpush2.msra.mxu0 %v1710_v59 }
  0x89   : > { %1786 = vmatpush2.msra.mxu1 %v1710_v59  ;;  %1201 = vmatprep.subr.mxu0 %v1709_v60 }
  0x8a   : > { %1755 = vmatprep.subr.mxu1 %v1709_v60  ;;  %763 = vmatprep.mubr.f32.mxu0 %v604_v61 }
  0x8b   : > { %1004 = vmatprep.mubr.f32.mxu1 %v845_v62  ;;  %1202 = vmatpush2.msra.mxu0 %v1708_v63 }
  0x8c   : > { %1787 = vmatpush2.msra.mxu1 %v1708_v63  ;;  %764 = vmatmul.mubr.f32.gmra.mxu0 %v603_v0 }
  0x8d   : > { %1005 = vmatmul.mubr.f32.gmra.mxu1 %v844_v1  ;;  %1203 = vmatprep.subr.mxu0 %v1707_v2 }
  0x8e   : > { %1756 = vmatprep.subr.mxu1 %v1707_v2  ;;  %1204 = vmatpush2.msra.mxu0 %v1706_v3 }
  0x8f   : > { %1788 = vmatpush2.msra.mxu1 %v1706_v3  ;;  %1205 = vmatprep.subr.mxu0 %v1705_v4 }
  0x90   : > { %1757 = vmatprep.subr.mxu1 %v1705_v4  ;;  %769 = vmatprep.mubr.f32.mxu0 %v606_v5 }
  0x91   : > { %1010 = vmatprep.mubr.f32.mxu1 %v847_v6  ;;  %1206 = vmatpush2.msra.mxu0 %v1704_v7 }
  0x92   : > { %1789 = vmatpush2.msra.mxu1 %v1704_v7  ;;  %770 = vmatmul.mubr.f32.gmra.mxu0 %v605_v8 }
  0x93   : > { %1011 = vmatmul.mubr.f32.gmra.mxu1 %v846_v9  ;;  %1207 = vmatprep.subr.mxu0 %v1703_v10 }
  0x94   : > { %1758 = vmatprep.subr.mxu1 %v1703_v10  ;;  %1208 = vmatpush2.msra.mxu0 %v1702_v11  ;;  %v1323_v10 = vlaneseq }
  0x95   : > { %1790 = vmatpush2.msra.mxu1 %v1702_v11  ;;  %1209 = vmatprep.subr.mxu0 %v1701_v12 }
  0x96   : > { %1759 = vmatprep.subr.mxu1 %v1701_v12  ;;  %775 = vmatprep.mubr.f32.mxu0 %v608_v13  ;;  %v1324_v13 = vshrl.u32 %v1323_v10, 7 }
  0x97   : > { %1016 = vmatprep.mubr.f32.mxu1 %v849_v14  ;;  %1210 = vmatpush2.msra.mxu0 %v1700_v15 }
  0x98   : > { %1791 = vmatpush2.msra.mxu1 %v1700_v15  ;;  %776 = vmatmul.mubr.f32.gmra.mxu0 %v607_v16  ;;  %v1325_v16 = vsub.s32 0, %v1324_v13 }
  0x99   : > { %1017 = vmatmul.mubr.f32.gmra.mxu1 %v848_v17  ;;  %1211 = vmatprep.subr.mxu0 %v1699_v18  ;;  %v1321_v17 = vld [vmem:[%s2812_s6] sm:$0x3] }
  0x9a   : > { %1760 = vmatprep.subr.mxu1 %v1699_v18  ;;  %1212 = vmatpush2.msra.mxu0 %v1698_v19  ;;  %v1329_v18 = vsub.s32 1, %v1324_v13 }
  0x9b   : > { %1792 = vmatpush2.msra.mxu1 %v1698_v19  ;;  %1213 = vmatprep.subr.mxu0 %v1697_v20 }
  0x9c   : > { %1761 = vmatprep.subr.mxu1 %v1697_v20  ;;  %781 = vmatprep.mubr.f32.mxu0 %v610_v21 }
  0x9d   : > { %1022 = vmatprep.mubr.f32.mxu1 %v851_v22  ;;  %1214 = vmatpush2.msra.mxu0 %v1696_v23 }
  0x9e   : > { %1793 = vmatpush2.msra.mxu1 %v1696_v23  ;;  %782 = vmatmul.mubr.f32.gmra.mxu0 %v609_v24  ;;  %v2705_v23 = vrot.slane %v1321_v17, %v1325_v16 }
  0x9f   : > { %1023 = vmatmul.mubr.f32.gmra.mxu1 %v850_v25  ;;  %1215 = vmatprep.subr.mxu0 %v1695_v26 }
  0xa0   : > { %1762 = vmatprep.subr.mxu1 %v1695_v26  ;;  %1216 = vmatpush2.msra.mxu0 %v1694_v27  ;;  %v2707_v26 = vrot.slane %v1321_v17, %v1329_v18 }
  0xa1   : > { %1794 = vmatpush2.msra.mxu1 %v1694_v27  ;;  %1217 = vmatprep.subr.mxu0 %v1693_v28 }
  0xa2   : > { %1763 = vmatprep.subr.mxu1 %v1693_v28  ;;  %1218 = vmatpush2.msra.mxu0 %v1692_v29 }
  0xa3   : > { %1795 = vmatpush2.msra.mxu1 %v1692_v29  ;;  %1219 = vmatprep.subr.mxu0 %v1691_v30 }
  0xa4   : > { %1764 = vmatprep.subr.mxu1 %v1691_v30  ;;  %1220 = vmatpush2.msra.mxu0 %v1690_v31 }
  0xa5   : > { %1796 = vmatpush2.msra.mxu1 %v1690_v31  ;;  %1221 = vmatprep.mubr.f32.mxu0 %v1078_v32 }
  0xa6   : > { %1245 = vmatprep.mubr.f32.mxu1 %v1086_v33  ;;  %1222 = vmatmul.mubr.f32.vlgmr.msra.gmra.mxu0 %v1077_v34 }
  0xa7   : > { %1246 = vmatmul.mubr.f32.vlgmr.msra.gmra.mxu1 %v1085_v35  ;;  %1227 = vmatprep.mubr.f32.mxu0 %v1080_v36 }
  0xa8   : > { %1251 = vmatprep.mubr.f32.mxu1 %v1088_v37 }
  0xaa   : > { %1228 = vmatmul.mubr.f32.gmra.mxu0 %v1079_v38 }
  0xab   : > { %1252 = vmatmul.mubr.f32.gmra.mxu1 %v1087_v39  ;;  %1233 = vmatprep.mubr.f32.mxu0 %v1082_v40 }
  0xac   : > { %1257 = vmatprep.mubr.f32.mxu1 %v1090_v41 }
  0xae   : > { %1234 = vmatmul.mubr.f32.gmra.mxu0 %v1081_v42 }
  0xaf   : > { %1258 = vmatmul.mubr.f32.gmra.mxu1 %v1089_v43  ;;  %1239 = vmatprep.mubr.f32.mxu0 %v1084_v44 }
  0xb0   : > { %1263 = vmatprep.mubr.f32.mxu1 %v1092_v45 }
  0xb2   : > { %1240 = vmatmul.mubr.f32.gmra.mxu0 %v1083_v46 }
  0xb3   : > { %1264 = vmatmul.mubr.f32.gmra.mxu1 %v1091_v47 }
 0x116   : > { %v741_v48 = vpop.f32.mrf.mxu0 }
 0x117   : > { %v982_v49 = vpop.f32.mrf.mxu1 }
 0x118   : > { %v743_v50 = vpop.f32.mrf.mxu0  ;;  %v1029_v21 = vadd.f32 %v982_v49, %v741_v48 }
 0x119   : > { %v984_v51 = vpop.f32.mrf.mxu1 }
 0x11a   : > { %v1030_v27 = vadd.f32 %v984_v51, %v743_v50 }
 0x13a   : > { %v747_v52 = vpop.f32.mrf.mxu0 }
 0x13b   : > { %v988_v53 = vpop.f32.mrf.mxu1 }
 0x13c   : > { %v749_v54 = vpop.f32.mrf.mxu0  ;;  %v1031_v31 = vadd.f32 %v988_v53, %v747_v52 }
 0x13d   : > { %v990_v55 = vpop.f32.mrf.mxu1 }
 0x13e   : > { %v1032_v39 = vadd.f32 %v990_v55, %v749_v54 }
 0x140   : > { %v753_v56 = vpop.f32.mrf.mxu0 }
 0x141   : > { %v994_v57 = vpop.f32.mrf.mxu1 }
 0x142   : > { %v2685_v58 = vpop.f32.mrf.mxu0  ;;  %v1033_v47 = vadd.f32 %v994_v57, %v753_v56 }
 0x143   : > { %v2687_v59 = vpop.f32.mrf.mxu1 }
 0x144   : > { %v1034_v55 = vadd.f32 %v2687_v59, %v2685_v58 }
 0x146   : > { %v2689_v60 = vpop.f32.mrf.mxu0 }
 0x147   : > { %v2691_v61 = vpop.f32.mrf.mxu1 }
 0x148   : > { %v2693_v62 = vpop.f32.mrf.mxu0 }
 0x149   : > { %v2695_v63 = vpop.f32.mrf.mxu1 }
 0x14c   : > { %v765_v0 = vpop.f32.mrf.mxu0 }
 0x14d   : > { %v1006_v1 = vpop.f32.mrf.mxu1 }
 0x14e   : > { %v767_v2 = vpop.f32.mrf.mxu0  ;;  %v1037_v22 = vadd.f32 %v1006_v1, %v765_v0 }
 0x14f   : > { %v1008_v3 = vpop.f32.mrf.mxu1 }
 0x150   : > { %v1038_v28 = vadd.f32 %v1008_v3, %v767_v2 }
 0x152   : > { %v771_v4 = vpop.f32.mrf.mxu0 }
 0x153   : > { %v1012_v5 = vpop.f32.mrf.mxu1 }
 0x154   : > { %v773_v6 = vpop.f32.mrf.mxu0  ;;  %v1039_v32 = vadd.f32 %v1012_v5, %v771_v4  ;;  %v1035_v5 = vadd.f32 %v2691_v61, %v2689_v60 }
 0x155   : > { %v1014_v7 = vpop.f32.mrf.mxu1 }
 0x156   : > { %v1040_v40 = vadd.f32 %v1014_v7, %v773_v6 }
 0x158   : > { %v777_v8 = vpop.f32.mrf.mxu0 }
 0x159   : > { %v1018_v9 = vpop.f32.mrf.mxu1 }
 0x15a   : > { %v779_v11 = vpop.f32.mrf.mxu0  ;;  %v1041_v48 = vadd.f32 %v1018_v9, %v777_v8 }
 0x15b   : > { %v1020_v12 = vpop.f32.mrf.mxu1 }
 0x15c   : > { %v1042_v0 = vadd.f32 %v1020_v12, %v779_v11  ;;  %v1036_v11 = vadd.f32 %v2695_v63, %v2693_v62 }
 0x15e   : > { %v783_v14 = vpop.f32.mrf.mxu0 }
 0x15f   : > { %v1024_v15 = vpop.f32.mrf.mxu1 }
 0x160   : > { %v2701_v19 = vpop.f32.mrf.mxu0  ;;  %v1043_v6 = vadd.f32 %v1024_v15, %v783_v14 }
 0x161   : > { %v1026_v20 = vpop.f32.mrf.mxu1 }
 0x162   : > { %v1044_v60 = vadd.f32 %v1026_v20, %v2701_v19 }
 0x166   : > { %v1223_v24 = vpop.f32.mrf.mxu0 }
 0x167   : > { %v1247_v25 = vpop.f32.mrf.mxu1  ;;  %v1270_v29 = vadd.f32 %v1223_v24, %v1029_v21 }
 0x168   : > { %v1278_v30 = vadd.f32 %v1247_v25, %v1037_v22  ;;  %v1225_v33 = vpop.f32.mrf.mxu0 }
 0x169   : > { %v1249_v34 = vpop.f32.mrf.mxu1  ;;  %v1333_v35 = vadd.f32 %v2705_v23, %v1270_v29  ;;  %v1271_v37 = vadd.f32 %v1225_v33, %v1030_v27 }
 0x16a   : > { %v1341_v36 = vadd.f32 %v2705_v23, %v1278_v30  ;;  %v1279_v38 = vadd.f32 %v1249_v34, %v1038_v28  ;;  %v1229_v41 = vpop.f32.mrf.mxu0 }
 0x16b   : > { %v1253_v42 = vpop.f32.mrf.mxu1  ;;  %1349 = vst [vmem:[%s2711_s30] sm:$0xff] %v1333_v35  ;;  %v1334_v43 = vadd.f32 %v2707_v26, %v1271_v37  ;;  %v1272_v45 = vadd.f32 %v1229_v41, %v1031_v31 }
 0x16c   : > { %1357 = vst [vmem:[%s2711_s30 + $0x40] sm:$0xff] %v1341_v36  ;;  %v1342_v44 = vadd.f32 %v2707_v26, %v1279_v38  ;;  %v1280_v46 = vadd.f32 %v1253_v42, %v1039_v32  ;;  %v1231_v49 = vpop.f32.mrf.mxu0 }
 0x16d   : > { %v1255_v50 = vpop.f32.mrf.mxu1  ;;  %1350 = vst [vmem:[%s2711_s30 + $0x8] sm:$0xff] %v1334_v43  ;;  %v1335_v51 = vadd.f32 %v2705_v23, %v1272_v45  ;;  %v1273_v53 = vadd.f32 %v1231_v49, %v1032_v39 }
 0x16e   : > { %1358 = vst [vmem:[%s2711_s30 + $0x48] sm:$0xff] %v1342_v44  ;;  %v1343_v52 = vadd.f32 %v2705_v23, %v1280_v46  ;;  %v1281_v54 = vadd.f32 %v1255_v50, %v1040_v40  ;;  %v1235_v1 = vpop.f32.mrf.mxu0 }
 0x16f   : > { %v1259_v2 = vpop.f32.mrf.mxu1  ;;  %1351 = vst [vmem:[%s2711_s30 + $0x10] sm:$0xff] %v1335_v51  ;;  %v1336_v56 = vadd.f32 %v2707_v26, %v1273_v53  ;;  %v1274_v3 = vadd.f32 %v1235_v1, %v1033_v47 }
 0x170   : > { %1359 = vst [vmem:[%s2711_s30 + $0x50] sm:$0xff] %v1343_v52  ;;  %v1344_v57 = vadd.f32 %v2707_v26, %v1281_v54  ;;  %v1282_v4 = vadd.f32 %v1259_v2, %v1041_v48  ;;  %v1237_v7 = vpop.f32.mrf.mxu0 }
 0x171   : > { %v1261_v8 = vpop.f32.mrf.mxu1  ;;  %1352 = vst [vmem:[%s2711_s30 + $0x18] sm:$0xff] %v1336_v56  ;;  %v1337_v58 = vadd.f32 %v2705_v23, %v1274_v3  ;;  %v1275_v9 = vadd.f32 %v1237_v7, %v1034_v55 }
 0x172   : > { %1360 = vst [vmem:[%s2711_s30 + $0x58] sm:$0xff] %v1344_v57  ;;  %v1345_v59 = vadd.f32 %v2705_v23, %v1282_v4  ;;  %v1283_v10 = vadd.f32 %v1261_v8, %v1042_v0  ;;  %v1241_v61 = vpop.f32.mrf.mxu0 }
 0x173   : > { %v1265_v12 = vpop.f32.mrf.mxu1  ;;  %1353 = vst [vmem:[%s2711_s30 + $0x20] sm:$0xff] %v1337_v58  ;;  %v1338_v13 = vadd.f32 %v2707_v26, %v1275_v9  ;;  %v1276_v15 = vadd.f32 %v1241_v61, %v1035_v5 }
 0x174   : > { %1361 = vst [vmem:[%s2711_s30 + $0x60] sm:$0xff] %v1345_v59  ;;  %v1346_v14 = vadd.f32 %v2707_v26, %v1283_v10  ;;  %v1284_v16 = vadd.f32 %v1265_v12, %v1043_v6  ;;  %v1243_v17 = vpop.f32.mrf.mxu0 }
 0x175   : > { %v1267_v62 = vpop.f32.mrf.mxu1  ;;  %1354 = vst [vmem:[%s2711_s30 + $0x28] sm:$0xff] %v1338_v13  ;;  %v1339_v63 = vadd.f32 %v2705_v23, %v1276_v15  ;;  %v1277_v19 = vadd.f32 %v1243_v17, %v1036_v11 }
 0x176   : > { %1362 = vst [vmem:[%s2711_s30 + $0x68] sm:$0xff] %v1346_v14  ;;  %v1347_v18 = vadd.f32 %v2705_v23, %v1284_v16  ;;  %v1285_v20 = vadd.f32 %v1267_v62, %v1044_v60 }
 0x177   : > { %1355 = vst [vmem:[%s2711_s30 + $0x30] sm:$0xff] %v1339_v63  ;;  %v1340_v21 = vadd.f32 %v2707_v26, %v1277_v19 }
 0x178   : > { %1363 = vst [vmem:[%s2711_s30 + $0x70] sm:$0xff] %v1347_v18  ;;  %v1348_v22 = vadd.f32 %v2707_v26, %v1285_v20 }
 0x179   : > { %1356 = vst [vmem:[%s2711_s30 + $0x38] sm:$0xff] %v1340_v21 }
 0x17a   : > { %1364 = vst [vmem:[%s2711_s30 + $0x78] sm:$0xff] %v1348_v22 }
 0x17b   : > { %1867 = shalt.err (!%p1864_p5)
}
 0x17c   : > { %s1868_s19 = scalar_lea.hbm %s2749_s23, 2048  ;;  %s1872_s30 = scalar_lea.hbm %s2813_s7, 4096 }
 0x17d   : > { %p1869_p6 = scmp.ne.s32.totalorder %s2749_s23, %s1868_s19  ;;  %p1873_p10 = scmp.lt.s32.totalorder %s2749_s23, %s2813_s7 }
 0x17e   : > { %p1874_p11 = scmp.lt.s32.totalorder %s1872_s30, %s1868_s19 }
 0x17f   : > { %p1870_p7 = pnand %p1869_p6, %p2015_p4 }
 0x180   : > { %p1875_p12 = por %p1874_p11, %p1873_p10 }
 0x181   : > { %p1871_p9 = pneg %p1870_p7 }
 0x183   : > { %p1876_p13 = pnand %p1875_p12, %p1871_p9 }
 0x185   : > { %1879 = shalt.err (!%p1876_p13)
}
 0x186   : > { %s1933_s20 = smov 256   ;;  %s1934_s22 = smov 16  }
 0x187   : > { %1797 = dma.vmem_to_hbm [thread:$0]  (%p2015_p4), %s2751_s17, 2048, %s2749_s23, %s2761_s27, %s1933_s20, %s1933_s20, %s1934_s22  }
 0x188 PF: > { %p1803_p0 = scmp.ge.s32.totalorder %s1930_s29, 2  ;;  %s1397_s8 = sand.u32 1, %s1910_s24  }
 0x189   : > { %s1398_s10 = scalar_lea.sflag [#allocation4], %s1397_s8 }
 0x18a   : > { %p1800_p1 = pnand %p1803_p0, %p2022_p8 }
 0x18c   : > { %p1801_p2 = pneg %p1800_p1 }
 0x18e   : > { %1905 = dma.done.wait (%p1801_p2), %s1398_s10, 2048  }
 0x18f   : > { %1907 = vsyncadd (%p1801_p2), %s1398_s10, 4294965248  ;;  %s20_s29 = sadd.s32 1, %s1930_s29   ;;  %s2817_s24 = smov %s1914_s25 }
 0x190   : > { %p17_p3 = scmp.ge.s32.totalorder %s20_s29, 4   ;;  %s2818_s25 = smov %s1918_s26 }
 0x191   : > { %s2819_s26 = smov %s2028_s14  ;;  %s2820_s27 = smov %s1926_s28 }
 0x192   : > { %s2821_s28 = smov %s2823_s9  ;;  %19 = sbr.rel (!%p17_p3) target bundleno = 4 (0x4), region = 109 }
 0x197   :  { %1403 = vsyncpa [#allocation4], 1 }
 0x198   :  { %1405 = vsyncpa [#allocation4 + $0x1], 1 }

</bundles_post_ra>
